<compile_context>
chip_gen: v6e
topology: v6e:2x2x1
jax: 0.10.0
libtpu: 0.0.40
codegen_flags: <defaults>
</compile_context>

<pallas_src>
import jax
import jax.numpy as jnp
from jax.experimental import pallas as pl
from jax.experimental.pallas import tpu as pltpu

HIDDEN = 256    # the PyTorch module's hidden_size (lane-dense: 2 x 128)
VOCAB = 128     # small stand-in vocabulary (input_size)
SEQ_LEN = 8     # demo sequence length (>= 8 keeps the output sublane-aligned)


def encoder_gru_kernel(tok_ref, emb_ref, w_ih_ref, b_ih_ref, w_hh_ref,
                       b_hh_ref, h0_ref, out_ref, gi_ref):
    # tok_ref : SMEM (T,) int32 token ids (scalar-prefetched).
    # emb_ref : (V, H)  bf16 embedding table              (VMEM-resident)
    # w_ih_ref: (H, 3H) bf16 W_ih^T                       (VMEM-resident)
    # b_ih_ref: (1, 3H) f32  b_ih
    # w_hh_ref: (H, 3H) bf16 W_hh^T                       (VMEM-resident)
    # b_hh_ref: (1, 3H) f32  b_hh
    # h0_ref  : (1, H)  f32  initial hidden state
    # out_ref : (T, H)  f32  GRU output rows              (VMEM-resident, one flush)
    # gi_ref  : (V, 3H) f32  VMEM scratch: embedding @ W_ih^T + b_ih
    H = h0_ref.shape[-1]
    T = out_ref.shape[0]

    # Hoisted input projection: one well-shaped bf16 MXU matmul for the whole
    # vocabulary; the recurrence below never touches the x-side weights again.
    # TODO(synk): for realistic vocabularies (>~10k tokens) precompute only the
    # sequence's (T, 3H) rows instead of a whole-vocab table (VMEM budget,
    # especially on v7x with 64 MiB physical VMEM).
    gi_ref[...] = (
        jnp.dot(emb_ref[...], w_ih_ref[...], preferred_element_type=jnp.float32)
        + b_ih_ref[...])

    b_hh = b_hh_ref[...]                       # (1, 3H) f32, hoisted out of loop
    h0 = h0_ref[...].astype(jnp.float32)

    def step(t, h):
        tok = tok_ref[t]                                   # SMEM scalar read
        gi = gi_ref[pl.ds(tok, 1), :]                      # (1, 3H) gi-row gather
        # Recurrent projection: native bf16 MXU path, f32 accumulation. The
        # hidden state itself stays f32 across steps; only the MXU operand is
        # rounded to bf16 (valid on v5e/v6e/v7x alike).
        gh = jnp.dot(h.astype(jnp.bfloat16), w_hh_ref[...],
                     preferred_element_type=jnp.float32) + b_hh
        r = jax.nn.sigmoid(gi[:, 0:H] + gh[:, 0:H])
        z = jax.nn.sigmoid(gi[:, H:2 * H] + gh[:, H:2 * H])
        n = jnp.tanh(gi[:, 2 * H:] + r * gh[:, 2 * H:])    # torch GRU n-gate
        h_new = (1.0 - z) * n + z * h
        out_ref[pl.ds(t, 1), :] = h_new.astype(out_ref.dtype)
        return h_new

    # Unrolled so the LLO scheduler can overlap the next step's gi-row load and
    # the previous step's row store with the current step's EUP (sigmoid/tanh).
    jax.lax.fori_loop(0, T, step, h0, unroll=True)


def encoder_rnn_forward(tokens, hidden, params):
    """tokens: int32 (T,); hidden: (1, 1, H) initial state.

    Returns (outputs, hidden_final):
      outputs      (T, 1, H) -- GRU output at every step (embedding -> GRU)
      hidden_final (1, 1, H) -- hidden state after the last token
    For T == 1 this is exactly EncoderRNN.forward(input, hidden).
    """
    H = hidden.shape[-1]
    T = tokens.shape[0]
    V = params["embedding"].shape[0]
    h0 = hidden.reshape(1, H).astype(jnp.float32)

    grid_spec = pltpu.PrefetchScalarGridSpec(
        num_scalar_prefetch=1,          # token ids -> SMEM
        grid=(1,),                      # single invocation; the T loop is in-kernel
        in_specs=[
            pl.BlockSpec((V, H), lambda i, tok: (0, 0)),          # embedding (bf16)
            pl.BlockSpec((H, 3 * H), lambda i, tok: (0, 0)),      # W_ih^T   (bf16)
            pl.BlockSpec((1, 3 * H), lambda i, tok: (0, 0)),      # b_ih     (f32)
            pl.BlockSpec((H, 3 * H), lambda i, tok: (0, 0)),      # W_hh^T   (bf16)
            pl.BlockSpec((1, 3 * H), lambda i, tok: (0, 0)),      # b_hh     (f32)
            pl.BlockSpec((1, H), lambda i, tok: (0, 0)),          # h0       (f32)
        ],
        # Single lane-dense, sublane-aligned (T, H) output block; flushed once.
        out_specs=pl.BlockSpec((T, H), lambda i, tok: (0, 0)),
        scratch_shapes=[pltpu.VMEM((V, 3 * H), jnp.float32)],     # gi table
    )

    outputs = pl.pallas_call(
        encoder_gru_kernel,
        grid_spec=grid_spec,
        out_shape=jax.ShapeDtypeStruct((T, H), jnp.float32),
        compiler_params=pltpu.CompilerParams(
            dimension_semantics=("arbitrary",),
        ),
    )(tokens, params["embedding"], params["w_ih_t"], params["b_ih"],
      params["w_hh_t"], params["b_hh"], h0)

    hidden_final = outputs[T - 1].reshape(1, 1, H)
    return outputs.reshape(T, 1, H), hidden_final


def init_params(key, vocab, hidden):
    k_emb, k_wih, k_whh, k_bih, k_bhh = jax.random.split(key, 5)
    bound = 1.0 / jnp.sqrt(jnp.float32(hidden))
    embedding = jax.random.normal(k_emb, (vocab, hidden), jnp.float32)
    # torch.nn.GRU layout: (3H, H) rows ordered [r; z; n].
    w_ih = jax.random.uniform(k_wih, (3 * hidden, hidden), jnp.float32, -bound, bound)
    w_hh = jax.random.uniform(k_whh, (3 * hidden, hidden), jnp.float32, -bound, bound)
    b_ih = jax.random.uniform(k_bih, (3 * hidden,), jnp.float32, -bound, bound)
    b_hh = jax.random.uniform(k_bhh, (3 * hidden,), jnp.float32, -bound, bound)
    return {
        # MXU operands stored bf16 on every TPU generation; biases stay f32.
        "embedding": embedding.astype(jnp.bfloat16),     # (V, H)
        "w_ih_t": w_ih.T.astype(jnp.bfloat16),           # (H, 3H)
        "w_hh_t": w_hh.T.astype(jnp.bfloat16),           # (H, 3H)
        "b_ih": b_ih.reshape(1, -1),                     # (1, 3H) f32
        "b_hh": b_hh.reshape(1, -1),                     # (1, 3H) f32
    }


def reference_forward(tokens, hidden, params):
    """Pure-JAX unrolled reference with torch single-layer GRU gate math, using
    the same precision policy as the kernel (bf16-stored weights, f32 gate/state
    math, bf16-rounded hidden as the recurrent-matmul operand)."""
    H = hidden.shape[-1]
    h = hidden.reshape(1, H).astype(jnp.float32)
    emb = params["embedding"].astype(jnp.float32)
    w_ih_t = params["w_ih_t"].astype(jnp.float32)
    w_hh_t = params["w_hh_t"].astype(jnp.float32)
    b_ih = params["b_ih"]
    b_hh = params["b_hh"]

    outs = []
    for t in range(tokens.shape[0]):
        x = emb[tokens[t]].reshape(1, H)
        gi = x @ w_ih_t + b_ih
        gh = h.astype(jnp.bfloat16).astype(jnp.float32) @ w_hh_t + b_hh
        r = jax.nn.sigmoid(gi[:, :H] + gh[:, :H])
        z = jax.nn.sigmoid(gi[:, H:2 * H] + gh[:, H:2 * H])
        n = jnp.tanh(gi[:, 2 * H:] + r * gh[:, 2 * H:])
        h = (1.0 - z) * n + z * h
        outs.append(h)
    outputs = jnp.stack(outs, axis=0)                     # (T, 1, H)
    return outputs, h.reshape(1, 1, H)


if __name__ == "__main__":
    root = jax.random.PRNGKey(0)
    k_params, k_tokens = jax.random.split(root, 2)
    params = init_params(k_params, VOCAB, HIDDEN)

    tokens = jax.random.randint(k_tokens, (SEQ_LEN,), 0, VOCAB, dtype=jnp.int32)
    hidden0 = jnp.zeros((1, 1, HIDDEN), jnp.float32)      # EncoderRNN.initHidden()

    outputs, hidden_final = encoder_rnn_forward(tokens, hidden0, params)
    jax.block_until_ready((outputs, hidden_final))

    ref_out, ref_hid = reference_forward(tokens, hidden0, params)
    assert outputs.shape == (SEQ_LEN, 1, HIDDEN)
    assert hidden_final.shape == (1, 1, HIDDEN)
    max_err = float(jnp.max(jnp.abs(outputs - ref_out)))
    assert jnp.allclose(outputs, ref_out, atol=2e-4, rtol=2e-4), max_err
    assert jnp.allclose(hidden_final, ref_hid, atol=2e-4, rtol=2e-4)

    print("KERNEL_OK")
</pallas_src>

<mosaic_0001>
module attributes {stable_mosaic.version = 11 : i64} {
  func.func @encoder_gru_kernel(%arg0: i32, %arg1: memref<8xi32, #tpu.memory_space<smem>>, %arg2: memref<128x256xbf16, #tpu.memory_space<vmem>>, %arg3: memref<256x768xbf16, #tpu.memory_space<vmem>>, %arg4: memref<1x768xf32, #tpu.memory_space<vmem>>, %arg5: memref<256x768xbf16, #tpu.memory_space<vmem>>, %arg6: memref<1x768xf32, #tpu.memory_space<vmem>>, %arg7: memref<1x256xf32, #tpu.memory_space<vmem>>, %arg8: memref<8x256xf32, #tpu.memory_space<vmem>>, %arg9: memref<128x768xf32, #tpu.memory_space<vmem>>) attributes {dimension_semantics = [#tpu.dimension_semantics<arbitrary>], iteration_bounds = array<i64: 1>, scalar_prefetch = 1 : i64, scratch_operands = 1 : i64, tpu.core_type = #tpu.core_type<tc>, window_params = [{pipeline_mode = #tpu.pipeline_mode<synchronous>, transform_indices = @transform_0, window_bounds = array<i64: 128, 256>}, {pipeline_mode = #tpu.pipeline_mode<synchronous>, transform_indices = @transform_1, window_bounds = array<i64: 256, 768>}, {pipeline_mode = #tpu.pipeline_mode<synchronous>, transform_indices = @transform_2, window_bounds = array<i64: 1, 768>}, {pipeline_mode = #tpu.pipeline_mode<synchronous>, transform_indices = @transform_3, window_bounds = array<i64: 256, 768>}, {pipeline_mode = #tpu.pipeline_mode<synchronous>, transform_indices = @transform_4, window_bounds = array<i64: 1, 768>}, {pipeline_mode = #tpu.pipeline_mode<synchronous>, transform_indices = @transform_5, window_bounds = array<i64: 1, 256>}, {pipeline_mode = #tpu.pipeline_mode<synchronous>, transform_indices = @transform_6, window_bounds = array<i64: 8, 256>}]} {
    %c0 = arith.constant 0 : index
    %c0_0 = arith.constant 0 : index
    %0 = vector.load %arg2[%c0, %c0_0] : memref<128x256xbf16, #tpu.memory_space<vmem>>, vector<128x256xbf16>
    %c0_1 = arith.constant 0 : index
    %c0_2 = arith.constant 0 : index
    %1 = vector.load %arg3[%c0_1, %c0_2] : memref<256x768xbf16, #tpu.memory_space<vmem>>, vector<256x768xbf16>
    %cst = arith.constant dense<0.000000e+00> : vector<128x768xf32>
    %2 = tpu.matmul %0, %1, %cst {dimension_numbers = #tpu.dot_dimension_numbers<[1], [0], [0], [1], [0, 0, 1, 1], [], []>} : vector<128x256xbf16>, vector<256x768xbf16>, vector<128x768xf32> -> vector<128x768xf32>
    %c0_3 = arith.constant 0 : index
    %c0_4 = arith.constant 0 : index
    %3 = vector.load %arg4[%c0_3, %c0_4] : memref<1x768xf32, #tpu.memory_space<vmem>>, vector<1x768xf32>
    %4 = vector.broadcast %3 : vector<1x768xf32> to vector<128x768xf32>
    %5 = arith.addf %2, %4 : vector<128x768xf32>
    %c0_5 = arith.constant 0 : index
    %c0_6 = arith.constant 0 : index
    %6 = vector.load %arg9[%c0_5, %c0_6] : memref<128x768xf32, #tpu.memory_space<vmem>>, vector<128x768xf32>
    tpu.vector_store %arg9[%c0_5, %c0_6], %5 {strides = array<i32>} : memref<128x768xf32, #tpu.memory_space<vmem>>, vector<128x768xf32>,
    %c0_7 = arith.constant 0 : index
    %c0_8 = arith.constant 0 : index
    %7 = vector.load %arg6[%c0_7, %c0_8] : memref<1x768xf32, #tpu.memory_space<vmem>>, vector<1x768xf32>
    %c0_9 = arith.constant 0 : index
    %c0_10 = arith.constant 0 : index
    %8 = vector.load %arg7[%c0_9, %c0_10] : memref<1x256xf32, #tpu.memory_space<vmem>>, vector<1x256xf32>
    %c0_i32 = arith.constant 0 : i32
    %9 = arith.index_cast %c0_i32 : i32 to index
    %10 = memref.load %arg1[%9] : memref<8xi32, #tpu.memory_space<smem>>
    %11 = arith.index_cast %10 : i32 to index
    %c0_11 = arith.constant 0 : index
    %12 = vector.load %arg9[%11, %c0_11] : memref<128x768xf32, #tpu.memory_space<vmem>>, vector<1x768xf32>
    %13 = arith.truncf %8 : vector<1x256xf32> to vector<1x256xbf16>
    %c0_12 = arith.constant 0 : index
    %c0_13 = arith.constant 0 : index
    %14 = vector.load %arg5[%c0_12, %c0_13] : memref<256x768xbf16, #tpu.memory_space<vmem>>, vector<256x768xbf16>
    %cst_14 = arith.constant dense<0.000000e+00> : vector<1x768xf32>
    %15 = tpu.matmul %13, %14, %cst_14 {dimension_numbers = #tpu.dot_dimension_numbers<[1], [0], [0], [1], [0, 0, 1, 1], [], []>} : vector<1x256xbf16>, vector<256x768xbf16>, vector<1x768xf32> -> vector<1x768xf32>
    %16 = arith.addf %15, %7 : vector<1x768xf32>
    %17 = vector.extract_strided_slice %12 {offsets = [0, 0], sizes = [1, 256], strides = [1, 1]} : vector<1x768xf32> to vector<1x256xf32>
    %18 = vector.extract_strided_slice %16 {offsets = [0, 0], sizes = [1, 256], strides = [1, 1]} : vector<1x768xf32> to vector<1x256xf32>
    %19 = arith.addf %17, %18 : vector<1x256xf32>
    %20 = arith.negf %19 : vector<1x256xf32>
    %21 = math.exp %20 : vector<1x256xf32>
    %cst_15 = arith.constant 1.000000e+00 : f32
    %22 = vector.broadcast %cst_15 : f32 to vector<1x256xf32>
    %23 = arith.addf %22, %21 : vector<1x256xf32>
    %24 = arith.divf %22, %23 : vector<1x256xf32>
    %25 = vector.extract_strided_slice %12 {offsets = [0, 256], sizes = [1, 256], strides = [1, 1]} : vector<1x768xf32> to vector<1x256xf32>
    %26 = vector.extract_strided_slice %16 {offsets = [0, 256], sizes = [1, 256], strides = [1, 1]} : vector<1x768xf32> to vector<1x256xf32>
    %27 = arith.addf %25, %26 : vector<1x256xf32>
    %28 = arith.negf %27 : vector<1x256xf32>
    %29 = math.exp %28 : vector<1x256xf32>
    %cst_16 = arith.constant 1.000000e+00 : f32
    %30 = vector.broadcast %cst_16 : f32 to vector<1x256xf32>
    %31 = arith.addf %30, %29 : vector<1x256xf32>
    %32 = arith.divf %30, %31 : vector<1x256xf32>
    %33 = vector.extract_strided_slice %12 {offsets = [0, 512], sizes = [1, 256], strides = [1, 1]} : vector<1x768xf32> to vector<1x256xf32>
    %34 = vector.extract_strided_slice %16 {offsets = [0, 512], sizes = [1, 256], strides = [1, 1]} : vector<1x768xf32> to vector<1x256xf32>
    %35 = arith.mulf %24, %34 : vector<1x256xf32>
    %36 = arith.addf %33, %35 : vector<1x256xf32>
    %37 = math.tanh %36 : vector<1x256xf32>
    %cst_17 = arith.constant 1.000000e+00 : f32
    %38 = vector.broadcast %cst_17 : f32 to vector<1x256xf32>
    %39 = arith.subf %38, %32 : vector<1x256xf32>
    %40 = arith.mulf %39, %37 : vector<1x256xf32>
    %41 = arith.mulf %32, %8 : vector<1x256xf32>
    %42 = arith.addf %40, %41 : vector<1x256xf32>
    %43 = arith.index_cast %c0_i32 : i32 to index
    %c0_18 = arith.constant 0 : index
    %44 = vector.load %arg8[%43, %c0_18] : memref<8x256xf32, #tpu.memory_space<vmem>>, vector<1x256xf32>
    tpu.vector_store %arg8[%43, %c0_18], %42 {strides = array<i32>} : memref<8x256xf32, #tpu.memory_space<vmem>>, vector<1x256xf32>,
    %c1_i32 = arith.constant 1 : i32
    %45 = arith.index_cast %c1_i32 : i32 to index
    %46 = memref.load %arg1[%45] : memref<8xi32, #tpu.memory_space<smem>>
    %47 = arith.index_cast %46 : i32 to index
    %c0_19 = arith.constant 0 : index
    %48 = vector.load %arg9[%47, %c0_19] : memref<128x768xf32, #tpu.memory_space<vmem>>, vector<1x768xf32>
    %49 = arith.truncf %42 : vector<1x256xf32> to vector<1x256xbf16>
    %c0_20 = arith.constant 0 : index
    %c0_21 = arith.constant 0 : index
    %50 = vector.load %arg5[%c0_20, %c0_21] : memref<256x768xbf16, #tpu.memory_space<vmem>>, vector<256x768xbf16>
    %cst_22 = arith.constant dense<0.000000e+00> : vector<1x768xf32>
    %51 = tpu.matmul %49, %50, %cst_22 {dimension_numbers = #tpu.dot_dimension_numbers<[1], [0], [0], [1], [0, 0, 1, 1], [], []>} : vector<1x256xbf16>, vector<256x768xbf16>, vector<1x768xf32> -> vector<1x768xf32>
    %52 = arith.addf %51, %7 : vector<1x768xf32>
    %53 = vector.extract_strided_slice %48 {offsets = [0, 0], sizes = [1, 256], strides = [1, 1]} : vector<1x768xf32> to vector<1x256xf32>
    %54 = vector.extract_strided_slice %52 {offsets = [0, 0], sizes = [1, 256], strides = [1, 1]} : vector<1x768xf32> to vector<1x256xf32>
    %55 = arith.addf %53, %54 : vector<1x256xf32>
    %56 = arith.negf %55 : vector<1x256xf32>
    %57 = math.exp %56 : vector<1x256xf32>
    %cst_23 = arith.constant 1.000000e+00 : f32
    %58 = vector.broadcast %cst_23 : f32 to vector<1x256xf32>
    %59 = arith.addf %58, %57 : vector<1x256xf32>
    %60 = arith.divf %58, %59 : vector<1x256xf32>
    %61 = vector.extract_strided_slice %48 {offsets = [0, 256], sizes = [1, 256], strides = [1, 1]} : vector<1x768xf32> to vector<1x256xf32>
    %62 = vector.extract_strided_slice %52 {offsets = [0, 256], sizes = [1, 256], strides = [1, 1]} : vector<1x768xf32> to vector<1x256xf32>
    %63 = arith.addf %61, %62 : vector<1x256xf32>
    %64 = arith.negf %63 : vector<1x256xf32>
    %65 = math.exp %64 : vector<1x256xf32>
    %cst_24 = arith.constant 1.000000e+00 : f32
    %66 = vector.broadcast %cst_24 : f32 to vector<1x256xf32>
    %67 = arith.addf %66, %65 : vector<1x256xf32>
    %68 = arith.divf %66, %67 : vector<1x256xf32>
    %69 = vector.extract_strided_slice %48 {offsets = [0, 512], sizes = [1, 256], strides = [1, 1]} : vector<1x768xf32> to vector<1x256xf32>
    %70 = vector.extract_strided_slice %52 {offsets = [0, 512], sizes = [1, 256], strides = [1, 1]} : vector<1x768xf32> to vector<1x256xf32>
    %71 = arith.mulf %60, %70 : vector<1x256xf32>
    %72 = arith.addf %69, %71 : vector<1x256xf32>
    %73 = math.tanh %72 : vector<1x256xf32>
    %cst_25 = arith.constant 1.000000e+00 : f32
    %74 = vector.broadcast %cst_25 : f32 to vector<1x256xf32>
    %75 = arith.subf %74, %68 : vector<1x256xf32>
    %76 = arith.mulf %75, %73 : vector<1x256xf32>
    %77 = arith.mulf %68, %42 : vector<1x256xf32>
    %78 = arith.addf %76, %77 : vector<1x256xf32>
    %79 = arith.index_cast %c1_i32 : i32 to index
    %c0_26 = arith.constant 0 : index
    %80 = vector.load %arg8[%79, %c0_26] : memref<8x256xf32, #tpu.memory_space<vmem>>, vector<1x256xf32>
    tpu.vector_store %arg8[%79, %c0_26], %78 {strides = array<i32>} : memref<8x256xf32, #tpu.memory_space<vmem>>, vector<1x256xf32>,
    %c2_i32 = arith.constant 2 : i32
    %81 = arith.index_cast %c2_i32 : i32 to index
    %82 = memref.load %arg1[%81] : memref<8xi32, #tpu.memory_space<smem>>
    %83 = arith.index_cast %82 : i32 to index
    %c0_27 = arith.constant 0 : index
    %84 = vector.load %arg9[%83, %c0_27] : memref<128x768xf32, #tpu.memory_space<vmem>>, vector<1x768xf32>
    %85 = arith.truncf %78 : vector<1x256xf32> to vector<1x256xbf16>
    %c0_28 = arith.constant 0 : index
    %c0_29 = arith.constant 0 : index
    %86 = vector.load %arg5[%c0_28, %c0_29] : memref<256x768xbf16, #tpu.memory_space<vmem>>, vector<256x768xbf16>
    %cst_30 = arith.constant dense<0.000000e+00> : vector<1x768xf32>
    %87 = tpu.matmul %85, %86, %cst_30 {dimension_numbers = #tpu.dot_dimension_numbers<[1], [0], [0], [1], [0, 0, 1, 1], [], []>} : vector<1x256xbf16>, vector<256x768xbf16>, vector<1x768xf32> -> vector<1x768xf32>
    %88 = arith.addf %87, %7 : vector<1x768xf32>
    %89 = vector.extract_strided_slice %84 {offsets = [0, 0], sizes = [1, 256], strides = [1, 1]} : vector<1x768xf32> to vector<1x256xf32>
    %90 = vector.extract_strided_slice %88 {offsets = [0, 0], sizes = [1, 256], strides = [1, 1]} : vector<1x768xf32> to vector<1x256xf32>
    %91 = arith.addf %89, %90 : vector<1x256xf32>
    %92 = arith.negf %91 : vector<1x256xf32>
    %93 = math.exp %92 : vector<1x256xf32>
    %cst_31 = arith.constant 1.000000e+00 : f32
    %94 = vector.broadcast %cst_31 : f32 to vector<1x256xf32>
    %95 = arith.addf %94, %93 : vector<1x256xf32>
    %96 = arith.divf %94, %95 : vector<1x256xf32>
    %97 = vector.extract_strided_slice %84 {offsets = [0, 256], sizes = [1, 256], strides = [1, 1]} : vector<1x768xf32> to vector<1x256xf32>
    %98 = vector.extract_strided_slice %88 {offsets = [0, 256], sizes = [1, 256], strides = [1, 1]} : vector<1x768xf32> to vector<1x256xf32>
    %99 = arith.addf %97, %98 : vector<1x256xf32>
    %100 = arith.negf %99 : vector<1x256xf32>
    %101 = math.exp %100 : vector<1x256xf32>
    %cst_32 = arith.constant 1.000000e+00 : f32
    %102 = vector.broadcast %cst_32 : f32 to vector<1x256xf32>
    %103 = arith.addf %102, %101 : vector<1x256xf32>
    %104 = arith.divf %102, %103 : vector<1x256xf32>
    %105 = vector.extract_strided_slice %84 {offsets = [0, 512], sizes = [1, 256], strides = [1, 1]} : vector<1x768xf32> to vector<1x256xf32>
    %106 = vector.extract_strided_slice %88 {offsets = [0, 512], sizes = [1, 256], strides = [1, 1]} : vector<1x768xf32> to vector<1x256xf32>
    %107 = arith.mulf %96, %106 : vector<1x256xf32>
    %108 = arith.addf %105, %107 : vector<1x256xf32>
    %109 = math.tanh %108 : vector<1x256xf32>
    %cst_33 = arith.constant 1.000000e+00 : f32
    %110 = vector.broadcast %cst_33 : f32 to vector<1x256xf32>
    %111 = arith.subf %110, %104 : vector<1x256xf32>
    %112 = arith.mulf %111, %109 : vector<1x256xf32>
    %113 = arith.mulf %104, %78 : vector<1x256xf32>
    %114 = arith.addf %112, %113 : vector<1x256xf32>
    %115 = arith.index_cast %c2_i32 : i32 to index
    %c0_34 = arith.constant 0 : index
    %116 = vector.load %arg8[%115, %c0_34] : memref<8x256xf32, #tpu.memory_space<vmem>>, vector<1x256xf32>
    tpu.vector_store %arg8[%115, %c0_34], %114 {strides = array<i32>} : memref<8x256xf32, #tpu.memory_space<vmem>>, vector<1x256xf32>,
    %c3_i32 = arith.constant 3 : i32
    %117 = arith.index_cast %c3_i32 : i32 to index
    %118 = memref.load %arg1[%117] : memref<8xi32, #tpu.memory_space<smem>>
    %119 = arith.index_cast %118 : i32 to index
    %c0_35 = arith.constant 0 : index
    %120 = vector.load %arg9[%119, %c0_35] : memref<128x768xf32, #tpu.memory_space<vmem>>, vector<1x768xf32>
    %121 = arith.truncf %114 : vector<1x256xf32> to vector<1x256xbf16>
    %c0_36 = arith.constant 0 : index
    %c0_37 = arith.constant 0 : index
    %122 = vector.load %arg5[%c0_36, %c0_37] : memref<256x768xbf16, #tpu.memory_space<vmem>>, vector<256x768xbf16>
    %cst_38 = arith.constant dense<0.000000e+00> : vector<1x768xf32>
    %123 = tpu.matmul %121, %122, %cst_38 {dimension_numbers = #tpu.dot_dimension_numbers<[1], [0], [0], [1], [0, 0, 1, 1], [], []>} : vector<1x256xbf16>, vector<256x768xbf16>, vector<1x768xf32> -> vector<1x768xf32>
    %124 = arith.addf %123, %7 : vector<1x768xf32>
    %125 = vector.extract_strided_slice %120 {offsets = [0, 0], sizes = [1, 256], strides = [1, 1]} : vector<1x768xf32> to vector<1x256xf32>
    %126 = vector.extract_strided_slice %124 {offsets = [0, 0], sizes = [1, 256], strides = [1, 1]} : vector<1x768xf32> to vector<1x256xf32>
    %127 = arith.addf %125, %126 : vector<1x256xf32>
    %128 = arith.negf %127 : vector<1x256xf32>
    %129 = math.exp %128 : vector<1x256xf32>
    %cst_39 = arith.constant 1.000000e+00 : f32
    %130 = vector.broadcast %cst_39 : f32 to vector<1x256xf32>
    %131 = arith.addf %130, %129 : vector<1x256xf32>
    %132 = arith.divf %130, %131 : vector<1x256xf32>
    %133 = vector.extract_strided_slice %120 {offsets = [0, 256], sizes = [1, 256], strides = [1, 1]} : vector<1x768xf32> to vector<1x256xf32>
    %134 = vector.extract_strided_slice %124 {offsets = [0, 256], sizes = [1, 256], strides = [1, 1]} : vector<1x768xf32> to vector<1x256xf32>
    %135 = arith.addf %133, %134 : vector<1x256xf32>
    %136 = arith.negf %135 : vector<1x256xf32>
    %137 = math.exp %136 : vector<1x256xf32>
    %cst_40 = arith.constant 1.000000e+00 : f32
    %138 = vector.broadcast %cst_40 : f32 to vector<1x256xf32>
    %139 = arith.addf %138, %137 : vector<1x256xf32>
    %140 = arith.divf %138, %139 : vector<1x256xf32>
    %141 = vector.extract_strided_slice %120 {offsets = [0, 512], sizes = [1, 256], strides = [1, 1]} : vector<1x768xf32> to vector<1x256xf32>
    %142 = vector.extract_strided_slice %124 {offsets = [0, 512], sizes = [1, 256], strides = [1, 1]} : vector<1x768xf32> to vector<1x256xf32>
    %143 = arith.mulf %132, %142 : vector<1x256xf32>
    %144 = arith.addf %141, %143 : vector<1x256xf32>
    %145 = math.tanh %144 : vector<1x256xf32>
    %cst_41 = arith.constant 1.000000e+00 : f32
    %146 = vector.broadcast %cst_41 : f32 to vector<1x256xf32>
    %147 = arith.subf %146, %140 : vector<1x256xf32>
    %148 = arith.mulf %147, %145 : vector<1x256xf32>
    %149 = arith.mulf %140, %114 : vector<1x256xf32>
    %150 = arith.addf %148, %149 : vector<1x256xf32>
    %151 = arith.index_cast %c3_i32 : i32 to index
    %c0_42 = arith.constant 0 : index
    %152 = vector.load %arg8[%151, %c0_42] : memref<8x256xf32, #tpu.memory_space<vmem>>, vector<1x256xf32>
    tpu.vector_store %arg8[%151, %c0_42], %150 {strides = array<i32>} : memref<8x256xf32, #tpu.memory_space<vmem>>, vector<1x256xf32>,
    %c4_i32 = arith.constant 4 : i32
    %153 = arith.index_cast %c4_i32 : i32 to index
    %154 = memref.load %arg1[%153] : memref<8xi32, #tpu.memory_space<smem>>
    %155 = arith.index_cast %154 : i32 to index
    %c0_43 = arith.constant 0 : index
    %156 = vector.load %arg9[%155, %c0_43] : memref<128x768xf32, #tpu.memory_space<vmem>>, vector<1x768xf32>
    %157 = arith.truncf %150 : vector<1x256xf32> to vector<1x256xbf16>
    %c0_44 = arith.constant 0 : index
    %c0_45 = arith.constant 0 : index
    %158 = vector.load %arg5[%c0_44, %c0_45] : memref<256x768xbf16, #tpu.memory_space<vmem>>, vector<256x768xbf16>
    %cst_46 = arith.constant dense<0.000000e+00> : vector<1x768xf32>
    %159 = tpu.matmul %157, %158, %cst_46 {dimension_numbers = #tpu.dot_dimension_numbers<[1], [0], [0], [1], [0, 0, 1, 1], [], []>} : vector<1x256xbf16>, vector<256x768xbf16>, vector<1x768xf32> -> vector<1x768xf32>
    %160 = arith.addf %159, %7 : vector<1x768xf32>
    %161 = vector.extract_strided_slice %156 {offsets = [0, 0], sizes = [1, 256], strides = [1, 1]} : vector<1x768xf32> to vector<1x256xf32>
    %162 = vector.extract_strided_slice %160 {offsets = [0, 0], sizes = [1, 256], strides = [1, 1]} : vector<1x768xf32> to vector<1x256xf32>
    %163 = arith.addf %161, %162 : vector<1x256xf32>
    %164 = arith.negf %163 : vector<1x256xf32>
    %165 = math.exp %164 : vector<1x256xf32>
    %cst_47 = arith.constant 1.000000e+00 : f32
    %166 = vector.broadcast %cst_47 : f32 to vector<1x256xf32>
    %167 = arith.addf %166, %165 : vector<1x256xf32>
    %168 = arith.divf %166, %167 : vector<1x256xf32>
    %169 = vector.extract_strided_slice %156 {offsets = [0, 256], sizes = [1, 256], strides = [1, 1]} : vector<1x768xf32> to vector<1x256xf32>
    %170 = vector.extract_strided_slice %160 {offsets = [0, 256], sizes = [1, 256], strides = [1, 1]} : vector<1x768xf32> to vector<1x256xf32>
    %171 = arith.addf %169, %170 : vector<1x256xf32>
    %172 = arith.negf %171 : vector<1x256xf32>
    %173 = math.exp %172 : vector<1x256xf32>
    %cst_48 = arith.constant 1.000000e+00 : f32
    %174 = vector.broadcast %cst_48 : f32 to vector<1x256xf32>
    %175 = arith.addf %174, %173 : vector<1x256xf32>
    %176 = arith.divf %174, %175 : vector<1x256xf32>
    %177 = vector.extract_strided_slice %156 {offsets = [0, 512], sizes = [1, 256], strides = [1, 1]} : vector<1x768xf32> to vector<1x256xf32>
    %178 = vector.extract_strided_slice %160 {offsets = [0, 512], sizes = [1, 256], strides = [1, 1]} : vector<1x768xf32> to vector<1x256xf32>
    %179 = arith.mulf %168, %178 : vector<1x256xf32>
    %180 = arith.addf %177, %179 : vector<1x256xf32>
    %181 = math.tanh %180 : vector<1x256xf32>
    %cst_49 = arith.constant 1.000000e+00 : f32
    %182 = vector.broadcast %cst_49 : f32 to vector<1x256xf32>
    %183 = arith.subf %182, %176 : vector<1x256xf32>
    %184 = arith.mulf %183, %181 : vector<1x256xf32>
    %185 = arith.mulf %176, %150 : vector<1x256xf32>
    %186 = arith.addf %184, %185 : vector<1x256xf32>
    %187 = arith.index_cast %c4_i32 : i32 to index
    %c0_50 = arith.constant 0 : index
    %188 = vector.load %arg8[%187, %c0_50] : memref<8x256xf32, #tpu.memory_space<vmem>>, vector<1x256xf32>
    tpu.vector_store %arg8[%187, %c0_50], %186 {strides = array<i32>} : memref<8x256xf32, #tpu.memory_space<vmem>>, vector<1x256xf32>,
    %c5_i32 = arith.constant 5 : i32
    %189 = arith.index_cast %c5_i32 : i32 to index
    %190 = memref.load %arg1[%189] : memref<8xi32, #tpu.memory_space<smem>>
    %191 = arith.index_cast %190 : i32 to index
    %c0_51 = arith.constant 0 : index
    %192 = vector.load %arg9[%191, %c0_51] : memref<128x768xf32, #tpu.memory_space<vmem>>, vector<1x768xf32>
    %193 = arith.truncf %186 : vector<1x256xf32> to vector<1x256xbf16>
    %c0_52 = arith.constant 0 : index
    %c0_53 = arith.constant 0 : index
    %194 = vector.load %arg5[%c0_52, %c0_53] : memref<256x768xbf16, #tpu.memory_space<vmem>>, vector<256x768xbf16>
    %cst_54 = arith.constant dense<0.000000e+00> : vector<1x768xf32>
    %195 = tpu.matmul %193, %194, %cst_54 {dimension_numbers = #tpu.dot_dimension_numbers<[1], [0], [0], [1], [0, 0, 1, 1], [], []>} : vector<1x256xbf16>, vector<256x768xbf16>, vector<1x768xf32> -> vector<1x768xf32>
    %196 = arith.addf %195, %7 : vector<1x768xf32>
    %197 = vector.extract_strided_slice %192 {offsets = [0, 0], sizes = [1, 256], strides = [1, 1]} : vector<1x768xf32> to vector<1x256xf32>
    %198 = vector.extract_strided_slice %196 {offsets = [0, 0], sizes = [1, 256], strides = [1, 1]} : vector<1x768xf32> to vector<1x256xf32>
    %199 = arith.addf %197, %198 : vector<1x256xf32>
    %200 = arith.negf %199 : vector<1x256xf32>
    %201 = math.exp %200 : vector<1x256xf32>
    %cst_55 = arith.constant 1.000000e+00 : f32
    %202 = vector.broadcast %cst_55 : f32 to vector<1x256xf32>
    %203 = arith.addf %202, %201 : vector<1x256xf32>
    %204 = arith.divf %202, %203 : vector<1x256xf32>
    %205 = vector.extract_strided_slice %192 {offsets = [0, 256], sizes = [1, 256], strides = [1, 1]} : vector<1x768xf32> to vector<1x256xf32>
    %206 = vector.extract_strided_slice %196 {offsets = [0, 256], sizes = [1, 256], strides = [1, 1]} : vector<1x768xf32> to vector<1x256xf32>
    %207 = arith.addf %205, %206 : vector<1x256xf32>
    %208 = arith.negf %207 : vector<1x256xf32>
    %209 = math.exp %208 : vector<1x256xf32>
    %cst_56 = arith.constant 1.000000e+00 : f32
    %210 = vector.broadcast %cst_56 : f32 to vector<1x256xf32>
    %211 = arith.addf %210, %209 : vector<1x256xf32>
    %212 = arith.divf %210, %211 : vector<1x256xf32>
    %213 = vector.extract_strided_slice %192 {offsets = [0, 512], sizes = [1, 256], strides = [1, 1]} : vector<1x768xf32> to vector<1x256xf32>
    %214 = vector.extract_strided_slice %196 {offsets = [0, 512], sizes = [1, 256], strides = [1, 1]} : vector<1x768xf32> to vector<1x256xf32>
    %215 = arith.mulf %204, %214 : vector<1x256xf32>
    %216 = arith.addf %213, %215 : vector<1x256xf32>
    %217 = math.tanh %216 : vector<1x256xf32>
    %cst_57 = arith.constant 1.000000e+00 : f32
    %218 = vector.broadcast %cst_57 : f32 to vector<1x256xf32>
    %219 = arith.subf %218, %212 : vector<1x256xf32>
    %220 = arith.mulf %219, %217 : vector<1x256xf32>
    %221 = arith.mulf %212, %186 : vector<1x256xf32>
    %222 = arith.addf %220, %221 : vector<1x256xf32>
    %223 = arith.index_cast %c5_i32 : i32 to index
    %c0_58 = arith.constant 0 : index
    %224 = vector.load %arg8[%223, %c0_58] : memref<8x256xf32, #tpu.memory_space<vmem>>, vector<1x256xf32>
    tpu.vector_store %arg8[%223, %c0_58], %222 {strides = array<i32>} : memref<8x256xf32, #tpu.memory_space<vmem>>, vector<1x256xf32>,
    %c6_i32 = arith.constant 6 : i32
    %225 = arith.index_cast %c6_i32 : i32 to index
    %226 = memref.load %arg1[%225] : memref<8xi32, #tpu.memory_space<smem>>
    %227 = arith.index_cast %226 : i32 to index
    %c0_59 = arith.constant 0 : index
    %228 = vector.load %arg9[%227, %c0_59] : memref<128x768xf32, #tpu.memory_space<vmem>>, vector<1x768xf32>
    %229 = arith.truncf %222 : vector<1x256xf32> to vector<1x256xbf16>
    %c0_60 = arith.constant 0 : index
    %c0_61 = arith.constant 0 : index
    %230 = vector.load %arg5[%c0_60, %c0_61] : memref<256x768xbf16, #tpu.memory_space<vmem>>, vector<256x768xbf16>
    %cst_62 = arith.constant dense<0.000000e+00> : vector<1x768xf32>
    %231 = tpu.matmul %229, %230, %cst_62 {dimension_numbers = #tpu.dot_dimension_numbers<[1], [0], [0], [1], [0, 0, 1, 1], [], []>} : vector<1x256xbf16>, vector<256x768xbf16>, vector<1x768xf32> -> vector<1x768xf32>
    %232 = arith.addf %231, %7 : vector<1x768xf32>
    %233 = vector.extract_strided_slice %228 {offsets = [0, 0], sizes = [1, 256], strides = [1, 1]} : vector<1x768xf32> to vector<1x256xf32>
    %234 = vector.extract_strided_slice %232 {offsets = [0, 0], sizes = [1, 256], strides = [1, 1]} : vector<1x768xf32> to vector<1x256xf32>
    %235 = arith.addf %233, %234 : vector<1x256xf32>
    %236 = arith.negf %235 : vector<1x256xf32>
    %237 = math.exp %236 : vector<1x256xf32>
    %cst_63 = arith.constant 1.000000e+00 : f32
    %238 = vector.broadcast %cst_63 : f32 to vector<1x256xf32>
    %239 = arith.addf %238, %237 : vector<1x256xf32>
    %240 = arith.divf %238, %239 : vector<1x256xf32>
    %241 = vector.extract_strided_slice %228 {offsets = [0, 256], sizes = [1, 256], strides = [1, 1]} : vector<1x768xf32> to vector<1x256xf32>
    %242 = vector.extract_strided_slice %232 {offsets = [0, 256], sizes = [1, 256], strides = [1, 1]} : vector<1x768xf32> to vector<1x256xf32>
    %243 = arith.addf %241, %242 : vector<1x256xf32>
    %244 = arith.negf %243 : vector<1x256xf32>
    %245 = math.exp %244 : vector<1x256xf32>
    %cst_64 = arith.constant 1.000000e+00 : f32
    %246 = vector.broadcast %cst_64 : f32 to vector<1x256xf32>
    %247 = arith.addf %246, %245 : vector<1x256xf32>
    %248 = arith.divf %246, %247 : vector<1x256xf32>
    %249 = vector.extract_strided_slice %228 {offsets = [0, 512], sizes = [1, 256], strides = [1, 1]} : vector<1x768xf32> to vector<1x256xf32>
    %250 = vector.extract_strided_slice %232 {offsets = [0, 512], sizes = [1, 256], strides = [1, 1]} : vector<1x768xf32> to vector<1x256xf32>
    %251 = arith.mulf %240, %250 : vector<1x256xf32>
    %252 = arith.addf %249, %251 : vector<1x256xf32>
    %253 = math.tanh %252 : vector<1x256xf32>
    %cst_65 = arith.constant 1.000000e+00 : f32
    %254 = vector.broadcast %cst_65 : f32 to vector<1x256xf32>
    %255 = arith.subf %254, %248 : vector<1x256xf32>
    %256 = arith.mulf %255, %253 : vector<1x256xf32>
    %257 = arith.mulf %248, %222 : vector<1x256xf32>
    %258 = arith.addf %256, %257 : vector<1x256xf32>
    %259 = arith.index_cast %c6_i32 : i32 to index
    %c0_66 = arith.constant 0 : index
    %260 = vector.load %arg8[%259, %c0_66] : memref<8x256xf32, #tpu.memory_space<vmem>>, vector<1x256xf32>
    tpu.vector_store %arg8[%259, %c0_66], %258 {strides = array<i32>} : memref<8x256xf32, #tpu.memory_space<vmem>>, vector<1x256xf32>,
    %c7_i32 = arith.constant 7 : i32
    %261 = arith.index_cast %c7_i32 : i32 to index
    %262 = memref.load %arg1[%261] : memref<8xi32, #tpu.memory_space<smem>>
    %263 = arith.index_cast %262 : i32 to index
    %c0_67 = arith.constant 0 : index
    %264 = vector.load %arg9[%263, %c0_67] : memref<128x768xf32, #tpu.memory_space<vmem>>, vector<1x768xf32>
    %265 = arith.truncf %258 : vector<1x256xf32> to vector<1x256xbf16>
    %c0_68 = arith.constant 0 : index
    %c0_69 = arith.constant 0 : index
    %266 = vector.load %arg5[%c0_68, %c0_69] : memref<256x768xbf16, #tpu.memory_space<vmem>>, vector<256x768xbf16>
    %cst_70 = arith.constant dense<0.000000e+00> : vector<1x768xf32>
    %267 = tpu.matmul %265, %266, %cst_70 {dimension_numbers = #tpu.dot_dimension_numbers<[1], [0], [0], [1], [0, 0, 1, 1], [], []>} : vector<1x256xbf16>, vector<256x768xbf16>, vector<1x768xf32> -> vector<1x768xf32>
    %268 = arith.addf %267, %7 : vector<1x768xf32>
    %269 = vector.extract_strided_slice %264 {offsets = [0, 0], sizes = [1, 256], strides = [1, 1]} : vector<1x768xf32> to vector<1x256xf32>
    %270 = vector.extract_strided_slice %268 {offsets = [0, 0], sizes = [1, 256], strides = [1, 1]} : vector<1x768xf32> to vector<1x256xf32>
    %271 = arith.addf %269, %270 : vector<1x256xf32>
    %272 = arith.negf %271 : vector<1x256xf32>
    %273 = math.exp %272 : vector<1x256xf32>
    %cst_71 = arith.constant 1.000000e+00 : f32
    %274 = vector.broadcast %cst_71 : f32 to vector<1x256xf32>
    %275 = arith.addf %274, %273 : vector<1x256xf32>
    %276 = arith.divf %274, %275 : vector<1x256xf32>
    %277 = vector.extract_strided_slice %264 {offsets = [0, 256], sizes = [1, 256], strides = [1, 1]} : vector<1x768xf32> to vector<1x256xf32>
    %278 = vector.extract_strided_slice %268 {offsets = [0, 256], sizes = [1, 256], strides = [1, 1]} : vector<1x768xf32> to vector<1x256xf32>
    %279 = arith.addf %277, %278 : vector<1x256xf32>
    %280 = arith.negf %279 : vector<1x256xf32>
    %281 = math.exp %280 : vector<1x256xf32>
    %cst_72 = arith.constant 1.000000e+00 : f32
    %282 = vector.broadcast %cst_72 : f32 to vector<1x256xf32>
    %283 = arith.addf %282, %281 : vector<1x256xf32>
    %284 = arith.divf %282, %283 : vector<1x256xf32>
    %285 = vector.extract_strided_slice %264 {offsets = [0, 512], sizes = [1, 256], strides = [1, 1]} : vector<1x768xf32> to vector<1x256xf32>
    %286 = vector.extract_strided_slice %268 {offsets = [0, 512], sizes = [1, 256], strides = [1, 1]} : vector<1x768xf32> to vector<1x256xf32>
    %287 = arith.mulf %276, %286 : vector<1x256xf32>
    %288 = arith.addf %285, %287 : vector<1x256xf32>
    %289 = math.tanh %288 : vector<1x256xf32>
    %cst_73 = arith.constant 1.000000e+00 : f32
    %290 = vector.broadcast %cst_73 : f32 to vector<1x256xf32>
    %291 = arith.subf %290, %284 : vector<1x256xf32>
    %292 = arith.mulf %291, %289 : vector<1x256xf32>
    %293 = arith.mulf %284, %258 : vector<1x256xf32>
    %294 = arith.addf %292, %293 : vector<1x256xf32>
    %295 = arith.index_cast %c7_i32 : i32 to index
    %c0_74 = arith.constant 0 : index
    %296 = vector.load %arg8[%295, %c0_74] : memref<8x256xf32, #tpu.memory_space<vmem>>, vector<1x256xf32>
    tpu.vector_store %arg8[%295, %c0_74], %294 {strides = array<i32>} : memref<8x256xf32, #tpu.memory_space<vmem>>, vector<1x256xf32>,
    %c8_i32 = arith.constant 8 : i32
    return
  }
  func.func @transform_0(%arg0: i32, %arg1: memref<8xi32, #tpu.memory_space<smem>>) -> (i32, i32) {
    %c0_i32 = arith.constant 0 : i32
    %c0_i32_0 = arith.constant 0 : i32
    %c0_i32_1 = arith.constant 0 : i32
    return %c0_i32, %c0_i32_0 : i32, i32
  }
  func.func @transform_1(%arg0: i32, %arg1: memref<8xi32, #tpu.memory_space<smem>>) -> (i32, i32) {
    %c0_i32 = arith.constant 0 : i32
    %c0_i32_0 = arith.constant 0 : i32
    %c0_i32_1 = arith.constant 0 : i32
    return %c0_i32, %c0_i32_0 : i32, i32
  }
  func.func @transform_2(%arg0: i32, %arg1: memref<8xi32, #tpu.memory_space<smem>>) -> (i32, i32) {
    %c0_i32 = arith.constant 0 : i32
    %c0_i32_0 = arith.constant 0 : i32
    %c0_i32_1 = arith.constant 0 : i32
    return %c0_i32, %c0_i32_0 : i32, i32
  }
  func.func @transform_3(%arg0: i32, %arg1: memref<8xi32, #tpu.memory_space<smem>>) -> (i32, i32) {
    %c0_i32 = arith.constant 0 : i32
    %c0_i32_0 = arith.constant 0 : i32
    %c0_i32_1 = arith.constant 0 : i32
    return %c0_i32, %c0_i32_0 : i32, i32
  }
  func.func @transform_4(%arg0: i32, %arg1: memref<8xi32, #tpu.memory_space<smem>>) -> (i32, i32) {
    %c0_i32 = arith.constant 0 : i32
    %c0_i32_0 = arith.constant 0 : i32
    %c0_i32_1 = arith.constant 0 : i32
    return %c0_i32, %c0_i32_0 : i32, i32
  }
  func.func @transform_5(%arg0: i32, %arg1: memref<8xi32, #tpu.memory_space<smem>>) -> (i32, i32) {
    %c0_i32 = arith.constant 0 : i32
    %c0_i32_0 = arith.constant 0 : i32
    %c0_i32_1 = arith.constant 0 : i32
    return %c0_i32, %c0_i32_0 : i32, i32
  }
  func.func @transform_6(%arg0: i32, %arg1: memref<8xi32, #tpu.memory_space<smem>>) -> (i32, i32) {
    %c0_i32 = arith.constant 0 : i32
    %c0_i32_0 = arith.constant 0 : i32
    %c0_i32_1 = arith.constant 0 : i32
    return %c0_i32, %c0_i32_0 : i32, i32
  }
}

</mosaic_0001>

<bundles_post_ra>
// kernel: tpu_custom_call.1
= control target key start
LH: loop header
LB: loop body
LE: loop exit
PB: predicated region body
PF: predicated region fallthrough
CT: control target
= control target key end

     0   :  { %s9774_s24 = smov [#allocation4]   ;;  %s11425_s0 = inlined_call_operand.hbm [shape: s32[8], index: 0, kind: input, shape index: {}]   ;;  %s11426_s1 = inlined_call_operand.hbm [shape: bf16[128,256], index: 1, kind: input, shape index: {}]   ;;  %s11427_s2 = inlined_call_operand.hbm [shape: bf16[256,768], index: 2, kind: input, shape index: {}]   ;;  %s11428_s3 = inlined_call_operand.hbm [shape: f32[1,768], index: 3, kind: input, shape index: {}]   ;;  %s11429_s4 = inlined_call_operand.hbm [shape: bf16[256,768], index: 4, kind: input, shape index: {}]   ;;  %s11430_s5 = inlined_call_operand.vmem [shape: f32[1,768], index: 5, kind: input, shape index: {}]   ;;  %s11431_s6 = inlined_call_operand.vmem [shape: f32[1,256], index: 6, kind: input, shape index: {}]   ;;  %s11432_s7 = inlined_call_operand.hbm [shape: f32[8,256], index: 7, kind: output, shape index: {}]  }
   0x1   :  { %13 = dma.hbm_to_smem %s11425_s0, 16, %s9774_s24, [#allocation3] }
   0x2   :  { %9764 = dma.done.wait [#allocation3], 16 }
   0x3   :  { %9765 = vsyncadd [#allocation3], 4294967280 }
   0x4   :  { %15 = sfence }
   0x5   :  { %16 = vsyncpa [#allocation6], 0 }
   0x6   :  { %17 = vsyncpa [#allocation9], 0 }
   0x7   :  { %18 = vsyncpa [#allocation12], 0 }
   0x8   :  { %19 = vsyncpa [#allocation7], 0  ;;  %s9775_s27 = smov [#allocation8]  }
   0x9   :  { %s37_s28 = sshll.u32 %s9775_s27, 4  ;;  %s38_s28 = int_to_ptr.vmem [resolvable:$true] %s37_s28 }
   0xa   :  { %s9672_s29 = scalar_lea.vmem %s38_s28, 12288  ;;  %p9677_p1 = scmp.lt.s32.totalorder %s38_s28, %s38_s28 }
   0xb   :  { %p9673_p0 = scmp.ne.s32.totalorder %s38_s28, %s9672_s29  ;;  %p9678_p2 = scmp.lt.s32.totalorder %s9672_s29, %s9672_s29 }
   0xd   :  { %p9679_p3 = por %p9678_p2, %p9677_p1 }
   0xf   :  { %p9680_p4 = pnand %p9679_p3, %p9673_p0 }
  0x11   :  { %9683 = shalt.err (!%p9680_p4)
}
  0x12   :  { %s9776_s30 = smov 384   ;;  %s9777_s8 = smov 24  }
  0x13   :  { %43 = dma.hbm_to_vmem [thread:$0]  %s11427_s2, 12288, %s38_s28, [#allocation9], %s9776_s30, %s9776_s30, %s9777_s8  }
  0x14   :  { %s9778_s10 = smov [#allocation5]  }
  0x15   :  { %s25_s11 = sshll.u32 %s9778_s10, 4  ;;  %s26_s11 = int_to_ptr.vmem [resolvable:$true] %s25_s11 }
  0x16   :  { %s9692_s12 = scalar_lea.vmem %s26_s11, 2048  ;;  %p9697_p6 = scmp.lt.s32.totalorder %s26_s11, %s26_s11 }
  0x17   :  { %p9693_p5 = scmp.ne.s32.totalorder %s26_s11, %s9692_s12  ;;  %p9698_p7 = scmp.lt.s32.totalorder %s9692_s12, %s9692_s12 }
  0x19   :  { %p9699_p8 = por %p9698_p7, %p9697_p6 }
  0x1b   :  { %p9700_p9 = pnand %p9699_p8, %p9693_p5 }
  0x1d   :  { %9703 = shalt.err (!%p9700_p9)
}
  0x1e   :  { %s9779_s13 = smov 128   ;;  %s9780_s14 = smov 8  }
  0x1f   :  { %31 = dma.hbm_to_vmem [thread:$0]  %s11426_s1, 2048, %s26_s11, [#allocation6], %s9779_s13, %s9779_s13, %s9780_s14  }
  0x20   :  { %s9781_s17 = smov [#allocation10]   ;;  %s9782_s19 = smov [#allocation11]  }
  0x21   :  { %s50_s18 = sshll.u32 %s9781_s17, 4  ;;  %s59_s2 = sshll.u32 %s9782_s19, 4  ;;  %s51_s18 = int_to_ptr.vmem [resolvable:$true] %s50_s18  ;;  %s60_s2 = int_to_ptr.vmem [resolvable:$true] %s59_s2 }
  0x22   :  { %s9712_s20 = scalar_lea.vmem %s51_s18, 96  ;;  %p9717_p11 = scmp.lt.s32.totalorder %s51_s18, %s51_s18 }
  0x23   :  { %p9713_p10 = scmp.ne.s32.totalorder %s51_s18, %s9712_s20  ;;  %p9718_p12 = scmp.lt.s32.totalorder %s9712_s20, %s9712_s20 }
  0x25   :  { %p9719_p13 = por %p9718_p12, %p9717_p11 }
  0x27   :  { %p9720_p0 = pnand %p9719_p13, %p9713_p10 }
  0x29   :  { %9723 = shalt.err (!%p9720_p0)
}
  0x2a   :  { %53 = dma.hbm_to_vmem [thread:$0]  %s11428_s3, 96, %s51_s18, [#allocation9]  }
  0x2b   :  { %s9732_s23 = scalar_lea.vmem %s60_s2, 12288  ;;  %p9737_p2 = scmp.lt.s32.totalorder %s60_s2, %s60_s2 }
  0x2c   :  { %p9733_p1 = scmp.ne.s32.totalorder %s60_s2, %s9732_s23  ;;  %p9738_p3 = scmp.lt.s32.totalorder %s9732_s23, %s9732_s23 }
  0x2e   :  { %p9739_p4 = por %p9738_p3, %p9737_p2 }
  0x30   :  { %p9740_p5 = pnand %p9739_p4, %p9733_p1 }
  0x32   :  { %9743 = shalt.err (!%p9740_p5)
}
  0x33   :  { %65 = dma.hbm_to_vmem [thread:$0]  %s11429_s4, 12288, %s60_s2, [#allocation12], %s9776_s30, %s9776_s30, %s9777_s8  }
  0x34   :  { %9766 = dma.done.wait [#allocation6], 2048  }
  0x35   :  { %9767 = vsyncadd [#allocation6], 4294965248 }
  0x36   :  { %9768 = dma.done.wait [#allocation9], 12384  }
  0x37   :  { %9769 = vsyncadd [#allocation9], 4294954912 }
  0x38   :  { %9770 = dma.done.wait [#allocation12], 12288  }
  0x39   :  { %9771 = vsyncadd [#allocation12], 4294955008  ;;  %v8676_v0 = vld [vmem:[#allocation8 + $0x154] ss:$24 sps:$4 sm:$0xff]   ;;  %v8678_v1 = vld [vmem:[#allocation8 + $0x150] ss:$24 sps:$4 sm:$0xff]  }
  0x3a   :  { %786 = vmatprep.subr.bf16.mxu0 %v8676_v0  ;;  %v8679_v2 = vld [vmem:[#allocation8 + $0x124] ss:$24 sps:$4 sm:$0xff]   ;;  %v8681_v3 = vld [vmem:[#allocation8 + $0x120] ss:$24 sps:$4 sm:$0xff]   ;;  %v8682_v4 = vld [vmem:[#allocation8 + $0xf4] ss:$24 sps:$4 sm:$0xff]  }
  0x3b   :  { %787 = vmatpush1.bf16.msra.mxu0 %v8678_v1  ;;  %v8684_v5 = vld [vmem:[#allocation8 + $0xf0] ss:$24 sps:$4 sm:$0xff]   ;;  %v8685_v6 = vld [vmem:[#allocation8 + $0xc4] ss:$24 sps:$4 sm:$0xff]   ;;  %v8687_v7 = vld [vmem:[#allocation8 + $0xc0] ss:$24 sps:$4 sm:$0xff]  }
  0x3c   :  { %788 = vmatprep.subr.bf16.mxu0 %v8679_v2  ;;  %v8700_v8 = vld [vmem:[#allocation8 + $0x15c] ss:$24 sps:$4 sm:$0xff]   ;;  %v8702_v9 = vld [vmem:[#allocation8 + $0x158] ss:$24 sps:$4 sm:$0xff]   ;;  %v8706_v11 = vld [vmem:[#allocation8 + $0x12c] ss:$24 sps:$4 sm:$0xff]  }
  0x3d   :  { %v8688_v10 = vld [vmem:[#allocation8 + $0x94] ss:$24 sps:$4 sm:$0xff]   ;;  %899 = vmatprep.subr.bf16.mxu1 %v8700_v8  ;;  %v8708_v12 = vld [vmem:[#allocation8 + $0x128] ss:$24 sps:$4 sm:$0xff]   ;;  %v8691_v14 = vld [vmem:[#allocation8 + $0x64] ss:$24 sps:$4 sm:$0xff]  }
  0x3e   :  { %900 = vmatpush1.bf16.msra.mxu1 %v8702_v9  ;;  %v8690_v13 = vld [vmem:[#allocation8 + $0x90] ss:$24 sps:$4 sm:$0xff]   ;;  %v8712_v15 = vld [vmem:[#allocation8 + $0xfc] ss:$24 sps:$4 sm:$0xff]   ;;  %v8693_v17 = vld [vmem:[#allocation8 + $0x60] ss:$24 sps:$4 sm:$0xff]  }
  0x3f   :  { %789 = vmatpush1.bf16.msra.mxu0 %v8681_v3  ;;  %901 = vmatprep.subr.bf16.mxu1 %v8706_v11  ;;  %v8714_v16 = vld [vmem:[#allocation8 + $0xf8] ss:$24 sps:$4 sm:$0xff]   ;;  %v8718_v18 = vld [vmem:[#allocation8 + $0xcc] ss:$24 sps:$4 sm:$0xff]   ;;  %v8720_v20 = vld [vmem:[#allocation8 + $0xc8] ss:$24 sps:$4 sm:$0xff]  }
  0x40   :  { %790 = vmatprep.subr.bf16.mxu0 %v8682_v4  ;;  %v8694_v19 = vld [vmem:[#allocation8 + $0x34] ss:$24 sps:$4 sm:$0xff]   ;;  %v8696_v21 = vld [vmem:[#allocation8 + $0x30] ss:$24 sps:$4 sm:$0xff]   ;;  %v8697_v23 = vld [vmem:[#allocation8 + $0x4] ss:$24 sps:$4 sm:$0xff]  }
  0x41   :  { %v8724_v22 = vld [vmem:[#allocation8 + $0x9c] ss:$24 sps:$4 sm:$0xff]   ;;  %v8726_v24 = vld [vmem:[#allocation8 + $0x98] ss:$24 sps:$4 sm:$0xff]   ;;  %v8730_v26 = vld [vmem:[#allocation8 + $0x6c] ss:$24 sps:$4 sm:$0xff]  }
  0x42   :  { %902 = vmatpush1.bf16.msra.mxu1 %v8708_v12  ;;  %v8699_v25 = vld [vmem:[#allocation8] ss:$24 sps:$4 sm:$0xff]   ;;  %v8703_v27 = vld [vmem:[#allocation8 + $0x2d4] ss:$24 sps:$4 sm:$0xff]   ;;  %v8705_v29 = vld [vmem:[#allocation8 + $0x2d0] ss:$24 sps:$4 sm:$0xff]  }
  0x43   :  { %791 = vmatpush1.bf16.msra.mxu0 %v8684_v5  ;;  %903 = vmatprep.subr.bf16.mxu1 %v8712_v15  ;;  %v8732_v28 = vld [vmem:[#allocation8 + $0x68] ss:$24 sps:$4 sm:$0xff]   ;;  %v8736_v30 = vld [vmem:[#allocation8 + $0x3c] ss:$24 sps:$4 sm:$0xff]   ;;  %v8738_v32 = vld [vmem:[#allocation8 + $0x38] ss:$24 sps:$4 sm:$0xff]  }
  0x44   :  { %792 = vmatprep.subr.bf16.mxu0 %v8685_v6  ;;  %v8709_v31 = vld [vmem:[#allocation8 + $0x2a4] ss:$24 sps:$4 sm:$0xff]   ;;  %v8711_v34 = vld [vmem:[#allocation8 + $0x2a0] ss:$24 sps:$4 sm:$0xff]   ;;  %v8715_v36 = vld [vmem:[#allocation8 + $0x274] ss:$24 sps:$4 sm:$0xff]  }
  0x45   :  { %v9846_v33 = vld [vmem:[#allocation5 + $0x4] ss:$8 sps:$4 sm:$0xff]   ;;  %v8744_v37 = vld [vmem:[#allocation8 + $0x8] ss:$24 sps:$4 sm:$0xff]   ;;  %v8748_v39 = vld [vmem:[#allocation8 + $0x2dc] ss:$24 sps:$4 sm:$0xff]  }
  0x46   :  { %904 = vmatpush1.bf16.msra.mxu1 %v8714_v16  ;;  %v8742_v35 = vld [vmem:[#allocation8 + $0xc] ss:$24 sps:$4 sm:$0xff]   ;;  %818 = vmatprep.mubr.bf16.mxu0 %v9846_v33  ;;  %v8717_v38 = vld [vmem:[#allocation8 + $0x270] ss:$24 sps:$4 sm:$0xff]   ;;  %v8723_v42 = vld [vmem:[#allocation8 + $0x240] ss:$24 sps:$4 sm:$0xff]  }
  0x47   :  { %793 = vmatpush1.bf16.msra.mxu0 %v8687_v7  ;;  %905 = vmatprep.subr.bf16.mxu1 %v8718_v18  ;;  %v8721_v40 = vld [vmem:[#allocation8 + $0x244] ss:$24 sps:$4 sm:$0xff]   ;;  %v8750_v41 = vld [vmem:[#allocation8 + $0x2d8] ss:$24 sps:$4 sm:$0xff]   ;;  %v8727_v44 = vld [vmem:[#allocation8 + $0x214] ss:$24 sps:$4 sm:$0xff]  }
  0x48   :  { %794 = vmatprep.subr.bf16.mxu0 %v8688_v10  ;;  %931 = vmatprep.mubr.bf16.mxu1 %v9846_v33  ;;  %v8757_v43 = vld [vmem:[#allocation8 + $0x2ac] ss:$24 sps:$4 sm:$0xff]   ;;  %v8759_v45 = vld [vmem:[#allocation8 + $0x2a8] ss:$24 sps:$4 sm:$0xff]   ;;  %v8763_v47 = vld [vmem:[#allocation8 + $0x27c] ss:$24 sps:$4 sm:$0xff]  }
  0x49   :  { %v8729_v46 = vld [vmem:[#allocation8 + $0x210] ss:$24 sps:$4 sm:$0xff]   ;;  %v8733_v48 = vld [vmem:[#allocation8 + $0x1e4] ss:$24 sps:$4 sm:$0xff]   ;;  %v8735_v50 = vld [vmem:[#allocation8 + $0x1e0] ss:$24 sps:$4 sm:$0xff]  }
  0x4a   :  { %906 = vmatpush1.bf16.msra.mxu1 %v8720_v20  ;;  %v8765_v49 = vld [vmem:[#allocation8 + $0x278] ss:$24 sps:$4 sm:$0xff]   ;;  %v8772_v51 = vld [vmem:[#allocation8 + $0x24c] ss:$24 sps:$4 sm:$0xff]   ;;  %v8774_v53 = vld [vmem:[#allocation8 + $0x248] ss:$24 sps:$4 sm:$0xff]  }
  0x4b   :  { %795 = vmatpush1.bf16.msra.mxu0 %v8690_v13  ;;  %907 = vmatprep.subr.bf16.mxu1 %v8724_v22  ;;  %v8739_v52 = vld [vmem:[#allocation8 + $0x1b4] ss:$24 sps:$4 sm:$0xff]   ;;  %v8741_v54 = vld [vmem:[#allocation8 + $0x1b0] ss:$24 sps:$4 sm:$0xff]   ;;  %v8745_v56 = vld [vmem:[#allocation8 + $0x184] ss:$24 sps:$4 sm:$0xff]  }
  0x4c   :  { %796 = vmatprep.subr.bf16.mxu0 %v8691_v14  ;;  %v8778_v55 = vld [vmem:[#allocation8 + $0x21c] ss:$24 sps:$4 sm:$0xff]   ;;  %v8780_v57 = vld [vmem:[#allocation8 + $0x218] ss:$24 sps:$4 sm:$0xff]   ;;  %v8787_v59 = vld [vmem:[#allocation8 + $0x1ec] ss:$24 sps:$4 sm:$0xff]  }
  0x4d   :  { %v8747_v58 = vld [vmem:[#allocation8 + $0x180] ss:$24 sps:$4 sm:$0xff]   ;;  %v8756_v60 = vld [vmem:[#allocation8 + $0x164] ss:$24 sps:$4 sm:$0xff]   ;;  %v8762_v0 = vld [vmem:[#allocation8 + $0x134] ss:$24 sps:$4 sm:$0xff]  }
  0x4e   :  { %908 = vmatpush1.bf16.msra.mxu1 %v8726_v24  ;;  %v9850_v61 = vld [vmem:[#allocation5] ss:$8 sps:$4 sm:$0xff]   ;;  %v9852_v1 = vld [vmem:[#allocation5 + $0x14] ss:$8 sps:$4 sm:$0xff]   ;;  %v8795_v3 = vld [vmem:[#allocation8 + $0x1b8] ss:$24 sps:$4 sm:$0xff]  }
  0x4f   :  { %797 = vmatpush1.bf16.msra.mxu0 %v8693_v17  ;;  %909 = vmatprep.subr.bf16.mxu1 %v8730_v26  ;;  %v8754_v62 = vld [vmem:[#allocation8 + $0x160] ss:$24 sps:$4 sm:$0xff]   ;;  %v8793_v2 = vld [vmem:[#allocation8 + $0x1bc] ss:$24 sps:$4 sm:$0xff]   ;;  %v8760_v4 = vld [vmem:[#allocation8 + $0x130] ss:$24 sps:$4 sm:$0xff]  }
  0x50   :  { %798 = vmatprep.subr.bf16.mxu0 %v8694_v19  ;;  %v8789_v63 = vld [vmem:[#allocation8 + $0x1e8] ss:$24 sps:$4 sm:$0xff]   ;;  %v8802_v5 = vld [vmem:[#allocation8 + $0x18c] ss:$24 sps:$4 sm:$0xff]   ;;  %v9856_v7 = vld [vmem:[#allocation5 + $0x10] ss:$8 sps:$4 sm:$0xff]  }
  0x51   :  { %v8771_v6 = vld [vmem:[#allocation8 + $0x104] ss:$24 sps:$4 sm:$0xff]   ;;  %v8769_v8 = vld [vmem:[#allocation8 + $0x100] ss:$24 sps:$4 sm:$0xff]   ;;  %v8777_v10 = vld [vmem:[#allocation8 + $0xd4] ss:$24 sps:$4 sm:$0xff]  }
  0x52   :  { %910 = vmatpush1.bf16.msra.mxu1 %v8732_v28  ;;  %v8804_v9 = vld [vmem:[#allocation8 + $0x188] ss:$24 sps:$4 sm:$0xff]   ;;  %v9858_v11 = vld [vmem:[#allocation5 + $0x24] ss:$8 sps:$4 sm:$0xff]   ;;  %v8810_v12 = vld [vmem:[#allocation11 + $0x154] ss:$24 sps:$4 sm:$0xff]  }
  0x53   :  { %799 = vmatpush1.bf16.msra.mxu0 %v8696_v21  ;;  %911 = vmatprep.subr.bf16.mxu1 %v8736_v30  ;;  %v8808_v13 = vld [vmem:[#allocation11 + $0x150] ss:$24 sps:$4 sm:$0xff]   ;;  %v8819_v15 = vld [vmem:[#allocation11 + $0x124] ss:$24 sps:$4 sm:$0xff]   ;;  %v8817_v19 = vld [vmem:[#allocation11 + $0x120] ss:$24 sps:$4 sm:$0xff]  }
  0x54   :  { %800 = vmatprep.subr.bf16.mxu0 %v8697_v23  ;;  %v8775_v14 = vld [vmem:[#allocation8 + $0xd0] ss:$24 sps:$4 sm:$0xff]   ;;  %v8786_v16 = vld [vmem:[#allocation8 + $0xa4] ss:$24 sps:$4 sm:$0xff]   ;;  %v8784_v18 = vld [vmem:[#allocation8 + $0xa0] ss:$24 sps:$4 sm:$0xff]  }
  0x55   :  { %v9862_v17 = vld [vmem:[#allocation5 + $0x20] ss:$8 sps:$4 sm:$0xff]   ;;  %v8792_v20 = vld [vmem:[#allocation8 + $0x74] ss:$24 sps:$4 sm:$0xff]   ;;  %v8801_v26 = vld [vmem:[#allocation8 + $0x44] ss:$24 sps:$4 sm:$0xff]  }
  0x56   :  { %912 = vmatpush1.bf16.msra.mxu1 %v8738_v32  ;;  %v9866_v21 = vld [vmem:[#allocation5 + $0x34] ss:$8 sps:$4 sm:$0xff]   ;;  %v8790_v24 = vld [vmem:[#allocation8 + $0x70] ss:$24 sps:$4 sm:$0xff]   ;;  %v8799_v28 = vld [vmem:[#allocation8 + $0x40] ss:$24 sps:$4 sm:$0xff]  }
  0x57   :  { %801 = vmatpush1.bf16.msra.mxu0 %v8699_v25  ;;  %913 = vmatprep.subr.bf16.mxu1 %v8742_v35  ;;  %v8825_v22 = vld [vmem:[#allocation11 + $0xf4] ss:$24 sps:$4 sm:$0xff]   ;;  %v8823_v23 = vld [vmem:[#allocation11 + $0xf0] ss:$24 sps:$4 sm:$0xff]   ;;  %v8834_v25 = vld [vmem:[#allocation11 + $0xc4] ss:$24 sps:$4 sm:$0xff]  }
  0x58   :  { %802 = vmatprep.subr.bf16.mxu0 %v8703_v27  ;;  %v9870_v27 = vld [vmem:[#allocation5 + $0x30] ss:$8 sps:$4 sm:$0xff]   ;;  %v8807_v30 = vld [vmem:[#allocation8 + $0x14] ss:$24 sps:$4 sm:$0xff]   ;;  %s10241_s25 = sld [smem:[#allocation4]] }
  0x59   :  { %v8840_v32 = vld [vmem:[#allocation11 + $0x94] ss:$24 sps:$4 sm:$0xff]   ;;  %s8065_s15 = sld [smem:[#allocation4 + $0x2]] }
  0x5a   :  { %914 = vmatpush1.bf16.msra.mxu1 %v8744_v37  ;;  %v8805_v35 = vld [vmem:[#allocation8 + $0x10] ss:$24 sps:$4 sm:$0xff]   ;;  %v8816_v37 = vld [vmem:[#allocation8 + $0x2e4] ss:$24 sps:$4 sm:$0xff]   ;;  %s8165_s20 = sld [smem:[#allocation4 + $0x3]] }
  0x5b   :  { %803 = vmatpush2.bf16.msra.mxu0 %v8705_v29  ;;  %915 = vmatprep.subr.bf16.mxu1 %v8748_v39  ;;  %v8832_v29 = vld [vmem:[#allocation11 + $0xc0] ss:$24 sps:$4 sm:$0xff]   ;;  %s8265_s3 = sld [smem:[#allocation4 + $0x4]] }
  0x5c   :  { %804 = vmatprep.subr.bf16.mxu0 %v8709_v31  ;;  %v9874_v31 = vld [vmem:[#allocation5 + $0x44] ss:$8 sps:$4 sm:$0xff]   ;;  %v8814_v39 = vld [vmem:[#allocation8 + $0x2e0] ss:$24 sps:$4 sm:$0xff]  }
  0x5e   :  { %916 = vmatpush2.bf16.msra.mxu1 %v8750_v41  ;;  %v8822_v41 = vld [vmem:[#allocation8 + $0x2b4] ss:$24 sps:$4 sm:$0xff]   ;;  %s1227_s29 = sand.u32 7, %s10241_s25 }
  0x5f   :  { %805 = vmatpush2.bf16.msra.mxu0 %v8711_v34  ;;  %917 = vmatprep.subr.bf16.mxu1 %v8757_v43  ;;  %v8838_v34 = vld [vmem:[#allocation11 + $0x90] ss:$24 sps:$4 sm:$0xff]   ;;  %v8855_v43 = vld [vmem:[#allocation11 + $0x34] ss:$24 sps:$4 sm:$0xff]   ;;  %s2872_s16 = sshra.s32 %s8065_s15, 3  ;;  %s2875_s18 = sand.u32 7, %s8065_s15 }
  0x60   :  { %806 = vmatprep.subr.bf16.mxu0 %v8715_v36  ;;  %v8849_v36 = vld [vmem:[#allocation11 + $0x64] ss:$24 sps:$4 sm:$0xff]   ;;  %s8066_s17 = smul.u32 48, %s2872_s16  ;;  %s3679_s21 = sshra.s32 %s8165_s20, 3 }
  0x61   :  { %s8166_s22 = smul.u32 48, %s3679_s21  ;;  %s3682_s23 = sand.u32 7, %s8165_s20 }
  0x62   :  { %918 = vmatpush2.bf16.msra.mxu1 %v8759_v45  ;;  %v8820_v45 = vld [vmem:[#allocation8 + $0x2b0] ss:$24 sps:$4 sm:$0xff]   ;;  %s2878_s19 = sadd.s32 %s8066_s17, %s2875_s18  ;;  %s4486_s4 = sshra.s32 %s8265_s3, 3 }
  0x63   :  { %807 = vmatpush2.bf16.msra.mxu0 %v8717_v38  ;;  %919 = vmatprep.subr.bf16.mxu1 %v8763_v47  ;;  %v9878_v38 = vld [vmem:[#allocation5 + $0x40] ss:$8 sps:$4 sm:$0xff]   ;;  %v8831_v47 = vld [vmem:[#allocation8 + $0x284] ss:$24 sps:$4 sm:$0xff]   ;;  %s2879_s2 = scalar_lea.vmem [#allocation2], %s2878_s19  ;;  %s3685_s1 = sadd.s32 %s8166_s22, %s3682_s23 }
  0x64   :  { %808 = vmatprep.subr.bf16.mxu0 %v8721_v40  ;;  %v8847_v40 = vld [vmem:[#allocation11 + $0x60] ss:$24 sps:$4 sm:$0xff]   ;;  %s3686_s24 = scalar_lea.vmem [#allocation2], %s3685_s1  ;;  %s4489_s26 = sand.u32 7, %s8265_s3 }
  0x65   :  { %s8565_s15 = sld [smem:[#allocation4 + $0x7]]  ;;  %s9784_s20 = smov [#allocation13]  }
  0x66   :  { %920 = vmatpush2.bf16.msra.mxu1 %v8765_v49  ;;  %v8829_v49 = vld [vmem:[#allocation8 + $0x280] ss:$24 sps:$4 sm:$0xff]   ;;  %s7719_s21 = sshll.u32 %s9784_s20, 4  ;;  %s7720_s21 = int_to_ptr.vmem [resolvable:$true] %s7719_s21 }
  0x67   :  { %809 = vmatpush2.bf16.msra.mxu0 %v8723_v42  ;;  %921 = vmatprep.subr.bf16.mxu1 %v8772_v51  ;;  %v9882_v42 = vld [vmem:[#allocation5 + $0x54] ss:$8 sps:$4 sm:$0xff]   ;;  %s9744_s22 = scalar_lea.vmem %s7720_s21, 256  ;;  %p9749_p7 = scmp.lt.s32.totalorder %s7720_s21, %s7720_s21 }
  0x68   :  { %810 = vmatprep.subr.bf16.mxu0 %v8727_v44  ;;  %v8853_v44 = vld [vmem:[#allocation11 + $0x30] ss:$24 sps:$4 sm:$0xff]   ;;  %p9745_p6 = scmp.ne.s32.totalorder %s7720_s21, %s9744_s22  ;;  %p9750_p8 = scmp.lt.s32.totalorder %s9744_s22, %s9744_s22 }
  0x69   :  { %v8837_v51 = vld [vmem:[#allocation8 + $0x254] ss:$24 sps:$4 sm:$0xff]  }
  0x6a   :  { %922 = vmatpush2.bf16.msra.mxu1 %v8774_v53  ;;  %v8870_v53 = vld [vmem:[#allocation11 + $0x2d4] ss:$24 sps:$4 sm:$0xff]   ;;  %p9751_p9 = por %p9750_p8, %p9749_p7 }
  0x6b   :  { %811 = vmatpush2.bf16.msra.mxu0 %v8729_v46  ;;  %923 = vmatprep.subr.bf16.mxu1 %v8778_v55  ;;  %v8864_v46 = vld [vmem:[#allocation11 + $0x4] ss:$24 sps:$4 sm:$0xff]   ;;  %v8868_v55 = vld [vmem:[#allocation11 + $0x2d0] ss:$24 sps:$4 sm:$0xff]   ;;  %s6907_s16 = sshra.s32 %s8565_s15, 3  ;;  %s6910_s18 = sand.u32 7, %s8565_s15 }
  0x6c   :  { %812 = vmatprep.subr.bf16.mxu0 %v8733_v48  ;;  %v9886_v48 = vld [vmem:[#allocation5 + $0x50] ss:$8 sps:$4 sm:$0xff]   ;;  %s8566_s17 = smul.u32 48, %s6907_s16  ;;  %p9752_p10 = pnand %p9751_p9, %p9745_p6 }
  0x6e   :  { %924 = vmatpush2.bf16.msra.mxu1 %v8780_v57  ;;  %v8846_v57 = vld [vmem:[#allocation8 + $0x224] ss:$24 sps:$4 sm:$0xff]   ;;  %s6913_s19 = sadd.s32 %s8566_s17, %s6910_s18 }
  0x6f   :  { %813 = vmatpush2.bf16.msra.mxu0 %v8735_v50  ;;  %925 = vmatprep.subr.bf16.mxu1 %v8787_v59  ;;  %v8862_v50 = vld [vmem:[#allocation11] ss:$24 sps:$4 sm:$0xff]  }
  0x70   :  { %814 = vmatprep.subr.bf16.mxu0 %v8739_v52  ;;  %v9890_v52 = vld [vmem:[#allocation5 + $0x64] ss:$8 sps:$4 sm:$0xff]   ;;  %v8844_v59 = vld [vmem:[#allocation8 + $0x220] ss:$24 sps:$4 sm:$0xff]  }
  0x72   :  { %926 = vmatpush2.bf16.msra.mxu1 %v8789_v63  ;;  %v8852_v63 = vld [vmem:[#allocation8 + $0x1f4] ss:$24 sps:$4 sm:$0xff]  }
  0x73   :  { %815 = vmatpush2.bf16.msra.mxu0 %v8741_v54  ;;  %927 = vmatprep.subr.bf16.mxu1 %v8793_v2  ;;  %v8835_v54 = vld [vmem:[#allocation8 + $0x250] ss:$24 sps:$4 sm:$0xff]  }
  0x74   :  { %816 = vmatprep.subr.bf16.mxu0 %v8745_v56  ;;  %v8873_v56 = vld [vmem:[#allocation11 + $0x2a4] ss:$24 sps:$4 sm:$0xff]  }
  0x75   :  { %v8850_v2 = vld [vmem:[#allocation8 + $0x1f0] ss:$24 sps:$4 sm:$0xff]  }
  0x76   :  { %928 = vmatpush2.bf16.msra.mxu1 %v8795_v3  ;;  %v8877_v3 = vld [vmem:[#allocation11 + $0x270] ss:$24 sps:$4 sm:$0xff]  }
  0x77   :  { %817 = vmatpush2.bf16.msra.mxu0 %v8747_v58  ;;  %929 = vmatprep.subr.bf16.mxu1 %v8802_v5  ;;  %v9894_v58 = vld [vmem:[#allocation5 + $0x60] ss:$8 sps:$4 sm:$0xff]  }
  0x78   :  { %1012 = vmatprep.subr.bf16.mxu0 %v8756_v60  ;;  %v8871_v60 = vld [vmem:[#allocation11 + $0x2a0] ss:$24 sps:$4 sm:$0xff]   ;;  %v8885_v5 = vld [vmem:[#allocation11 + $0x244] ss:$24 sps:$4 sm:$0xff]  }
  0x7a   :  { %819 = vmatmul.mubr.bf16.vlgmr.msra.gmra.mxu0 %v9850_v61  ;;  %930 = vmatpush2.bf16.msra.mxu1 %v8804_v9  ;;  %v8883_v9 = vld [vmem:[#allocation11 + $0x240] ss:$24 sps:$4 sm:$0xff]  }
  0x7b   :  { %1013 = vmatpush1.bf16.msra.mxu0 %v8754_v62  ;;  %828 = vmatprep.mubr.bf16.mxu0 %v9852_v1  ;;  %v9898_v62 = vld [vmem:[#allocation5 + $0x74] ss:$8 sps:$4 sm:$0xff]  }
  0x7c   :  { %1014 = vmatprep.subr.bf16.mxu0 %v8762_v0  ;;  %1855 = vmatprep.subr.bf16.mxu1 %v8810_v12  ;;  %v8879_v0 = vld [vmem:[#allocation11 + $0x274] ss:$24 sps:$4 sm:$0xff]  }
  0x7d   :  { %932 = vmatmul.mubr.bf16.vlgmr.msra.gmra.mxu1 %v9850_v61  ;;  %v8859_v12 = vld [vmem:[#allocation8 + $0x1c0] ss:$24 sps:$4 sm:$0xff]  }
  0x7e   :  { %1856 = vmatpush1.bf16.msra.mxu1 %v8808_v13  ;;  %941 = vmatprep.mubr.bf16.mxu1 %v9852_v1  ;;  %v8867_v13 = vld [vmem:[#allocation8 + $0x194] ss:$24 sps:$4 sm:$0xff]  }
  0x7f   :  { %1015 = vmatpush1.bf16.msra.mxu0 %v8760_v4  ;;  %1857 = vmatprep.subr.bf16.mxu1 %v8819_v15  ;;  %v11433_v4 = vlaneseq  ;;  %v8865_v15 = vld [vmem:[#allocation8 + $0x190] ss:$24 sps:$4 sm:$0xff]  }
  0x80   :  { %1016 = vmatprep.subr.bf16.mxu0 %v8771_v6  ;;  %v8861_v6 = vld [vmem:[#allocation8 + $0x1c4] ss:$24 sps:$4 sm:$0xff]  }
  0x82   :  { %829 = vmatmul.mubr.bf16.gmra.mxu0 %v9856_v7  ;;  %1858 = vmatpush1.bf16.msra.mxu1 %v8817_v19 }
  0x83   :  { %1017 = vmatpush1.bf16.msra.mxu0 %v8769_v8  ;;  %838 = vmatprep.mubr.bf16.mxu0 %v9858_v11  ;;  %v9902_v8 = vld [vmem:[#allocation5 + $0x70] ss:$8 sps:$4 sm:$0xff]  }
  0x84   :  { %1018 = vmatprep.subr.bf16.mxu0 %v8777_v10  ;;  %1859 = vmatprep.subr.bf16.mxu1 %v8825_v22  ;;  %v9907_v10 = vshrl.u32 %v11433_v4, 7  ;;  %v8876_v22 = vld [vmem:[#allocation11 + $0x15c] ss:$24 sps:$4 sm:$0xff]  }
  0x85   :  { %942 = vmatmul.mubr.bf16.gmra.mxu1 %v9856_v7 }
  0x86   :  { %1860 = vmatpush1.bf16.msra.mxu1 %v8823_v23  ;;  %951 = vmatprep.mubr.bf16.mxu1 %v9858_v11  ;;  %v9911_v19 = vsub.s32 1, %v9907_v10  ;;  %v8895_v23 = vld [vmem:[#allocation11 + $0x1e0] ss:$24 sps:$4 sm:$0xff]  }
  0x87   :  { %1019 = vmatpush1.bf16.msra.mxu0 %v8775_v14  ;;  %1861 = vmatprep.subr.bf16.mxu1 %v8834_v25  ;;  %v8891_v14 = vld [vmem:[#allocation11 + $0x214] ss:$24 sps:$4 sm:$0xff]   ;;  %v8874_v25 = vld [vmem:[#allocation11 + $0x158] ss:$24 sps:$4 sm:$0xff]  }
  0x88   :  { %1020 = vmatprep.subr.bf16.mxu0 %v8786_v16  ;;  %v8889_v16 = vld [vmem:[#allocation11 + $0x210] ss:$24 sps:$4 sm:$0xff]  }
  0x8a   :  { %839 = vmatmul.mubr.bf16.gmra.mxu0 %v9862_v17  ;;  %1862 = vmatpush1.bf16.msra.mxu1 %v8832_v29  ;;  %v9921_v29 = vsub.s32 0, %v9907_v10 }
  0x8b   :  { %1021 = vmatpush1.bf16.msra.mxu0 %v8784_v18  ;;  %848 = vmatprep.mubr.bf16.mxu0 %v9866_v21  ;;  %v8897_v18 = vld [vmem:[#allocation11 + $0x1e4] ss:$24 sps:$4 sm:$0xff]  }
  0x8c   :  { %1022 = vmatprep.subr.bf16.mxu0 %v8792_v20  ;;  %1863 = vmatprep.subr.bf16.mxu1 %v8840_v32  ;;  %v1222_v20 = vld [vmem:[%s11431_s6] sm:$0x3] }
  0x8d   :  { %952 = vmatmul.mubr.bf16.gmra.mxu1 %v9862_v17 }
  0x8e   :  { %1864 = vmatpush1.bf16.msra.mxu1 %v8838_v34  ;;  %961 = vmatprep.mubr.bf16.mxu1 %v9866_v21  ;;  %v8909_v34 = vld [vmem:[#allocation11 + $0x184] ss:$24 sps:$4 sm:$0xff]  }
  0x8f   :  { %1023 = vmatpush1.bf16.msra.mxu0 %v8790_v24  ;;  %1865 = vmatprep.subr.bf16.mxu1 %v8849_v36  ;;  %v1243_v24 = vrot.slane %v1222_v20, %v9911_v19  ;;  %v1239_v36 = vrot.slane %v1222_v20, %v9921_v29  ;;  %v8946_v20 = vld [vmem:[#allocation11 + $0x218] ss:$24 sps:$4 sm:$0xff]  }
  0x90   :  { %1024 = vmatprep.subr.bf16.mxu0 %v8801_v26  ;;  %v8903_v26 = vld [vmem:[#allocation11 + $0x1b4] ss:$24 sps:$4 sm:$0xff]  }
  0x91   :  { %v9924_v32 = vpack.c.bf16 %v1243_v24, %v1243_v24  ;;  %v8970_v24 = vld [vmem:[#allocation11 + $0x280] ss:$24 sps:$4 sm:$0xff]  }
  0x92   :  { %849 = vmatmul.mubr.bf16.gmra.mxu0 %v9870_v27  ;;  %1866 = vmatpush1.bf16.msra.mxu1 %v8847_v40  ;;  %v8915_v40 = vld [vmem:[#allocation11 + $0x164] ss:$24 sps:$4 sm:$0xff]  }
  0x93   :  { %1025 = vmatpush1.bf16.msra.mxu0 %v8799_v28  ;;  %858 = vmatprep.mubr.bf16.mxu0 %v9874_v31  ;;  %v8880_v28 = vld [vmem:[#allocation11 + $0x128] ss:$24 sps:$4 sm:$0xff]  }
  0x94   :  { %1026 = vmatprep.subr.bf16.mxu0 %v8807_v30  ;;  %1867 = vmatprep.subr.bf16.mxu1 %v8855_v43  ;;  %v8901_v30 = vld [vmem:[#allocation11 + $0x1b0] ss:$24 sps:$4 sm:$0xff]   ;;  %v8900_v43 = vld [vmem:[#allocation11 + $0x9c] ss:$24 sps:$4 sm:$0xff]  }
  0x95   :  { %962 = vmatmul.mubr.bf16.gmra.mxu1 %v9870_v27 }
  0x96   :  { %1868 = vmatpush1.bf16.msra.mxu1 %v8853_v44  ;;  %971 = vmatprep.mubr.bf16.mxu1 %v9874_v31  ;;  %v8913_v44 = vld [vmem:[#allocation11 + $0x160] ss:$24 sps:$4 sm:$0xff]  }
  0x97   :  { %1027 = vmatpush1.bf16.msra.mxu0 %v8805_v35  ;;  %1869 = vmatprep.subr.bf16.mxu1 %v8864_v46  ;;  %v8888_v35 = vld [vmem:[#allocation11 + $0xfc] ss:$24 sps:$4 sm:$0xff]   ;;  %v8919_v46 = vld [vmem:[#allocation11 + $0x130] ss:$24 sps:$4 sm:$0xff]  }
  0x98   :  { %1028 = vmatprep.subr.bf16.mxu0 %v8816_v37  ;;  %v8907_v37 = vld [vmem:[#allocation11 + $0x180] ss:$24 sps:$4 sm:$0xff]  }
  0x9a   :  { %859 = vmatmul.mubr.bf16.gmra.mxu0 %v9878_v38  ;;  %1870 = vmatpush1.bf16.msra.mxu1 %v8862_v50  ;;  %v8927_v50 = vld [vmem:[#allocation11 + $0x104] ss:$24 sps:$4 sm:$0xff]  }
  0x9b   :  { %1029 = vmatpush2.bf16.msra.mxu0 %v8814_v39  ;;  %868 = vmatprep.mubr.bf16.mxu0 %v9882_v42  ;;  %v8894_v39 = vld [vmem:[#allocation11 + $0xcc] ss:$24 sps:$4 sm:$0xff]  }
  0x9c   :  { %1030 = vmatprep.subr.bf16.mxu0 %v8822_v41  ;;  %1871 = vmatprep.subr.bf16.mxu1 %v8870_v53  ;;  %v8892_v41 = vld [vmem:[#allocation11 + $0xc8] ss:$24 sps:$4 sm:$0xff]   ;;  %v8933_v53 = vld [vmem:[#allocation11 + $0xd4] ss:$24 sps:$4 sm:$0xff]  }
  0x9d   :  { %972 = vmatmul.mubr.bf16.gmra.mxu1 %v9878_v38 }
  0x9e   :  { %1872 = vmatpush2.bf16.msra.mxu1 %v8868_v55  ;;  %981 = vmatprep.mubr.bf16.mxu1 %v9882_v42  ;;  %v8910_v55 = vld [vmem:[#allocation11 + $0x38] ss:$24 sps:$4 sm:$0xff]  }
  0x9f   :  { %1031 = vmatpush2.bf16.msra.mxu0 %v8820_v45  ;;  %1873 = vmatprep.subr.bf16.mxu1 %v8873_v56  ;;  %v8921_v45 = vld [vmem:[#allocation11 + $0x134] ss:$24 sps:$4 sm:$0xff]  }
  0xa0   :  { %1032 = vmatprep.subr.bf16.mxu0 %v8831_v47  ;;  %v8898_v47 = vld [vmem:[#allocation11 + $0x98] ss:$24 sps:$4 sm:$0xff]   ;;  %v8918_v56 = vld [vmem:[#allocation11 + $0xc] ss:$24 sps:$4 sm:$0xff]  }
  0xa2   :  { %869 = vmatmul.mubr.bf16.gmra.mxu0 %v9886_v48  ;;  %1874 = vmatpush2.bf16.msra.mxu1 %v8871_v60  ;;  %v8916_v60 = vld [vmem:[#allocation11 + $0x8] ss:$24 sps:$4 sm:$0xff]  }
  0xa3   :  { %1033 = vmatpush2.bf16.msra.mxu0 %v8829_v49  ;;  %878 = vmatprep.mubr.bf16.mxu0 %v9890_v52  ;;  %v8906_v49 = vld [vmem:[#allocation11 + $0x6c] ss:$24 sps:$4 sm:$0xff]  }
  0xa4   :  { %1034 = vmatprep.subr.bf16.mxu0 %v8837_v51  ;;  %1875 = vmatprep.subr.bf16.mxu1 %v8879_v0  ;;  %v8904_v51 = vld [vmem:[#allocation11 + $0x68] ss:$24 sps:$4 sm:$0xff]   ;;  %v8922_v0 = vld [vmem:[#allocation11 + $0x2d8] ss:$24 sps:$4 sm:$0xff]  }
  0xa5   :  { %982 = vmatmul.mubr.bf16.gmra.mxu1 %v9886_v48 }
  0xa6   :  { %1876 = vmatpush2.bf16.msra.mxu1 %v8877_v3  ;;  %991 = vmatprep.mubr.bf16.mxu1 %v9890_v52  ;;  %v8951_v3 = vld [vmem:[#allocation11 + $0x44] ss:$24 sps:$4 sm:$0xff]  }
  0xa7   :  { %1035 = vmatpush2.bf16.msra.mxu0 %v8835_v54  ;;  %1877 = vmatprep.subr.bf16.mxu1 %v8885_v5  ;;  %v8931_v54 = vld [vmem:[#allocation11 + $0xd0] ss:$24 sps:$4 sm:$0xff]   ;;  %v8949_v5 = vld [vmem:[#allocation11 + $0x40] ss:$24 sps:$4 sm:$0xff]  }
  0xa8   :  { %1036 = vmatprep.subr.bf16.mxu0 %v8846_v57  ;;  %v8939_v57 = vld [vmem:[#allocation11 + $0xa4] ss:$24 sps:$4 sm:$0xff]  }
  0xaa   :  { %879 = vmatmul.mubr.bf16.gmra.mxu0 %v9894_v58  ;;  %1878 = vmatpush2.bf16.msra.mxu1 %v8883_v9  ;;  %v8957_v9 = vld [vmem:[#allocation11 + $0x14] ss:$24 sps:$4 sm:$0xff]  }
  0xab   :  { %1037 = vmatpush2.bf16.msra.mxu0 %v8844_v59  ;;  %888 = vmatprep.mubr.bf16.mxu0 %v9898_v62  ;;  %v8937_v59 = vld [vmem:[#allocation11 + $0xa0] ss:$24 sps:$4 sm:$0xff]  }
  0xac   :  { %1038 = vmatprep.subr.bf16.mxu0 %v8852_v63  ;;  %1879 = vmatprep.subr.bf16.mxu1 %v8891_v14  ;;  %v8945_v63 = vld [vmem:[#allocation11 + $0x74] ss:$24 sps:$4 sm:$0xff]   ;;  %v8963_v14 = vld [vmem:[#allocation11 + $0x2e4] ss:$24 sps:$4 sm:$0xff]  }
  0xad   :  { %992 = vmatmul.mubr.bf16.gmra.mxu1 %v9894_v58 }
  0xae   :  { %1880 = vmatpush2.bf16.msra.mxu1 %v8889_v16  ;;  %1001 = vmatprep.mubr.bf16.mxu1 %v9898_v62  ;;  %v8940_v16 = vld [vmem:[#allocation11 + $0x248] ss:$24 sps:$4 sm:$0xff]  }
  0xaf   :  { %1039 = vmatpush2.bf16.msra.mxu0 %v8850_v2  ;;  %1881 = vmatprep.subr.bf16.mxu1 %v8897_v18  ;;  %v8930_v2 = vld [vmem:[#allocation11 + $0x2ac] ss:$24 sps:$4 sm:$0xff]  }
  0xb0   :  { %1040 = vmatprep.subr.bf16.mxu0 %v8861_v6  ;;  %v8928_v6 = vld [vmem:[#allocation11 + $0x2a8] ss:$24 sps:$4 sm:$0xff]   ;;  %v8969_v18 = vld [vmem:[#allocation11 + $0x2b4] ss:$24 sps:$4 sm:$0xff]  }
  0xb2   :  { %889 = vmatmul.mubr.bf16.gmra.mxu0 %v9902_v8  ;;  %1882 = vmatpush2.bf16.msra.mxu1 %v8895_v23  ;;  %v8972_v23 = vld [vmem:[#allocation11 + $0x284] ss:$24 sps:$4 sm:$0xff]  }
  0xb3   :  { %1041 = vmatpush2.bf16.msra.mxu0 %v8859_v12  ;;  %1044 = vmatprep.mubr.bf16.mxu0 %v9846_v33  ;;  %v8882_v33 = vld [vmem:[#allocation11 + $0x12c] ss:$24 sps:$4 sm:$0xff]   ;;  %v8934_v12 = vld [vmem:[#allocation11 + $0x278] ss:$24 sps:$4 sm:$0xff]  }
  0xb4   :  { %1042 = vmatprep.subr.bf16.mxu0 %v8867_v13  ;;  %1883 = vmatprep.subr.bf16.mxu1 %v8903_v26  ;;  %v8942_v13 = vld [vmem:[#allocation11 + $0x24c] ss:$24 sps:$4 sm:$0xff]   ;;  %v8958_v26 = vld [vmem:[#allocation11 + $0x1b8] ss:$24 sps:$4 sm:$0xff]  }
  0xb5   :  { %1002 = vmatmul.mubr.bf16.gmra.mxu1 %v9902_v8 }
  0xb6   :  { %1884 = vmatpush2.bf16.msra.mxu1 %v8901_v30  ;;  %1887 = vmatprep.mubr.bf16.mxu1 %v9924_v32  ;;  %v8978_v30 = vld [vmem:[#allocation11 + $0x224] ss:$24 sps:$4 sm:$0xff]  }
  0xb7   :  { %1043 = vmatpush2.bf16.msra.mxu0 %v8865_v15  ;;  %1885 = vmatprep.subr.bf16.mxu1 %v8909_v34  ;;  %v8961_v15 = vld [vmem:[#allocation11 + $0x2e0] ss:$24 sps:$4 sm:$0xff]  }
  0xb8   :  { %1896 = vmatprep.subr.bf16.mxu0 %v8876_v22  ;;  %v8954_v22 = vld [vmem:[#allocation11 + $0x1ec] ss:$24 sps:$4 sm:$0xff]   ;;  %v8976_v34 = vld [vmem:[#allocation11 + $0x220] ss:$24 sps:$4 sm:$0xff]  }
  0xba   :  { %1045 = vmatmul.mubr.bf16.vlgmr.msra.gmra.mxu0 %v9850_v61  ;;  %v8886_v61 = vld [vmem:[#allocation11 + $0xf8] ss:$24 sps:$4 sm:$0xff]   ;;  %1886 = vmatpush2.bf16.msra.mxu1 %v8907_v37 }
  0xbb   :  { %1897 = vmatpush1.bf16.msra.mxu0 %v8874_v25  ;;  %1054 = vmatprep.mubr.bf16.mxu0 %v9852_v1  ;;  %v9930_v1 = vpack.c.bf16 %v1239_v36, %v1239_v36  ;;  %v8952_v25 = vld [vmem:[#allocation11 + $0x1e8] ss:$24 sps:$4 sm:$0xff]   ;;  %v8981_v36 = vld [vmem:[#allocation11 + $0x1f4] ss:$24 sps:$4 sm:$0xff]  }
  0xbc   :  { %1898 = vmatprep.subr.bf16.mxu0 %v8882_v33  ;;  %1937 = vmatprep.subr.bf16.mxu1 %v8915_v40  ;;  %v8975_v33 = vld [vmem:[#allocation11 + $0x254] ss:$24 sps:$4 sm:$0xff]   ;;  %v8982_v37 = vld [vmem:[#allocation11 + $0x1c0] ss:$24 sps:$4 sm:$0xff]  }
  0xbd   :  { %1888 = vmatmul.mubr.bf16.vlgmr.msra.gmra.mxu1 %v9930_v1 }
  0xbe   :  { %1938 = vmatpush1.bf16.msra.mxu1 %v8913_v44  ;;  %1969 = vmatprep.mubr.bf16.mxu1 %v9924_v32 }
  0xbf   :  { %1899 = vmatpush1.bf16.msra.mxu0 %v8880_v28  ;;  %1939 = vmatprep.subr.bf16.mxu1 %v8921_v45  ;;  %v8966_v28 = vld [vmem:[#allocation11 + $0x18c] ss:$24 sps:$4 sm:$0xff]  }
  0xc0   :  { %1900 = vmatprep.subr.bf16.mxu0 %v8888_v35  ;;  %v8964_v35 = vld [vmem:[#allocation11 + $0x188] ss:$24 sps:$4 sm:$0xff]  }
  0xc2   :  { %1055 = vmatmul.mubr.bf16.gmra.mxu0 %v9856_v7  ;;  %v8925_v7 = vld [vmem:[#allocation11 + $0x100] ss:$24 sps:$4 sm:$0xff]   ;;  %1940 = vmatpush1.bf16.msra.mxu1 %v8919_v46 }
  0xc3   :  { %1901 = vmatpush1.bf16.msra.mxu0 %v8886_v61  ;;  %1064 = vmatprep.mubr.bf16.mxu0 %v9858_v11  ;;  %v8912_v11 = vld [vmem:[#allocation11 + $0x3c] ss:$24 sps:$4 sm:$0xff]  }
  0xc4   :  { %1902 = vmatprep.subr.bf16.mxu0 %v8894_v39  ;;  %1941 = vmatprep.subr.bf16.mxu1 %v8927_v50  ;;  %v8987_v61 = vld [vmem:[#allocation11 + $0x194] ss:$24 sps:$4 sm:$0xff]   ;;  %v8985_v39 = vld [vmem:[#allocation11 + $0x190] ss:$24 sps:$4 sm:$0xff]  }
  0xc6   :  { %1942 = vmatpush1.bf16.msra.mxu1 %v8925_v7  ;;  %v11434_v7 = vsub.s32 3, %v9907_v10 }
  0xc7   :  { %1903 = vmatpush1.bf16.msra.mxu0 %v8892_v41  ;;  %1943 = vmatprep.subr.bf16.mxu1 %v8933_v53  ;;  %v8993_v53 = vld [vmem:[#allocation11 + $0x15c] ss:$24 sps:$4 sm:$0xff]  }
  0xc8   :  { %1904 = vmatprep.subr.bf16.mxu0 %v8900_v43 }
  0xca   :  { %1065 = vmatmul.mubr.bf16.gmra.mxu0 %v9862_v17  ;;  %v8924_v17 = vld [vmem:[#allocation11 + $0x2dc] ss:$24 sps:$4 sm:$0xff]   ;;  %1944 = vmatpush1.bf16.msra.mxu1 %v8931_v54  ;;  %v8991_v54 = vld [vmem:[#allocation11 + $0x158] ss:$24 sps:$4 sm:$0xff]  }
  0xcb   :  { %1905 = vmatpush1.bf16.msra.mxu0 %v8898_v47  ;;  %1074 = vmatprep.mubr.bf16.mxu0 %v9866_v21  ;;  %v8943_v21 = vld [vmem:[#allocation11 + $0x70] ss:$24 sps:$4 sm:$0xff]  }
  0xcc   :  { %1906 = vmatprep.subr.bf16.mxu0 %v8906_v49  ;;  %1945 = vmatprep.subr.bf16.mxu1 %v8939_v57  ;;  %v9964_v49 = vld [vmem:[#allocation11 + $0x154] ss:$24 sps:$4 sm:$0xff]  }
  0xce   :  { %1946 = vmatpush1.bf16.msra.mxu1 %v8937_v59  ;;  %v9975_v59 = vld [vmem:[#allocation11 + $0x124] ss:$24 sps:$4 sm:$0xff]  }
  0xcf   :  { %1907 = vmatpush1.bf16.msra.mxu0 %v8904_v51  ;;  %1947 = vmatprep.subr.bf16.mxu1 %v8945_v63  ;;  %v8988_v51 = vld [vmem:[#allocation11 + $0x150] ss:$24 sps:$4 sm:$0xff]  }
  0xd0   :  { %1908 = vmatprep.subr.bf16.mxu0 %v8912_v11 }
  0xd2   :  { %1075 = vmatmul.mubr.bf16.gmra.mxu0 %v9870_v27  ;;  %v8936_v27 = vld [vmem:[#allocation11 + $0x27c] ss:$24 sps:$4 sm:$0xff]   ;;  %1948 = vmatpush1.bf16.msra.mxu1 %v8943_v21  ;;  %v8999_v21 = vld [vmem:[#allocation11 + $0x12c] ss:$24 sps:$4 sm:$0xff]  }
  0xd3   :  { %1909 = vmatpush1.bf16.msra.mxu0 %v8910_v55  ;;  %1084 = vmatprep.mubr.bf16.mxu0 %v9874_v31  ;;  %v8955_v31 = vld [vmem:[#allocation11 + $0x10] ss:$24 sps:$4 sm:$0xff]  }
  0xd4   :  { %1910 = vmatprep.subr.bf16.mxu0 %v8918_v56  ;;  %1949 = vmatprep.subr.bf16.mxu1 %v8951_v3  ;;  %v8997_v3 = vld [vmem:[#allocation11 + $0x128] ss:$24 sps:$4 sm:$0xff]  }
  0xd6   :  { %1950 = vmatpush1.bf16.msra.mxu1 %v8949_v5 }
  0xd7   :  { %1911 = vmatpush1.bf16.msra.mxu0 %v8916_v60  ;;  %1951 = vmatprep.subr.bf16.mxu1 %v8957_v9 }
  0xd8   :  { %1912 = vmatprep.subr.bf16.mxu0 %v8924_v17  ;;  %v9982_v17 = vld [vmem:[#allocation11 + $0x120] ss:$24 sps:$4 sm:$0xff]  }
  0xda   :  { %1085 = vmatmul.mubr.bf16.gmra.mxu0 %v9878_v38  ;;  %v8948_v38 = vld [vmem:[#allocation11 + $0x21c] ss:$24 sps:$4 sm:$0xff]   ;;  %1952 = vmatpush1.bf16.msra.mxu1 %v8955_v31 }
  0xdb   :  { %1913 = vmatpush2.bf16.msra.mxu0 %v8922_v0  ;;  %1094 = vmatprep.mubr.bf16.mxu0 %v9882_v42  ;;  %v8967_v42 = vld [vmem:[#allocation11 + $0x2b0] ss:$24 sps:$4 sm:$0xff]   ;;  %v9989_v31 = vld [vmem:[#allocation11 + $0xf4] ss:$24 sps:$4 sm:$0xff]  }
  0xdc   :  { %1914 = vmatprep.subr.bf16.mxu0 %v8930_v2  ;;  %1953 = vmatprep.subr.bf16.mxu1 %v8963_v14  ;;  %v9992_v14 = vld [vmem:[#allocation11 + $0xf0] ss:$24 sps:$4 sm:$0xff]  }
  0xde   :  { %1954 = vmatpush2.bf16.msra.mxu1 %v8961_v15  ;;  %v9005_v15 = vld [vmem:[#allocation11 + $0xfc] ss:$24 sps:$4 sm:$0xff]  }
  0xdf   :  { %1915 = vmatpush2.bf16.msra.mxu0 %v8928_v6  ;;  %1955 = vmatprep.subr.bf16.mxu1 %v8969_v18 }
  0xe0   :  { %1916 = vmatprep.subr.bf16.mxu0 %v8936_v27 }
  0xe2   :  { %1095 = vmatmul.mubr.bf16.gmra.mxu0 %v9886_v48  ;;  %v8960_v48 = vld [vmem:[#allocation11 + $0x1bc] ss:$24 sps:$4 sm:$0xff]   ;;  %1956 = vmatpush2.bf16.msra.mxu1 %v8967_v42 }
  0xe3   :  { %1917 = vmatpush2.bf16.msra.mxu0 %v8934_v12  ;;  %1104 = vmatprep.mubr.bf16.mxu0 %v9890_v52  ;;  %v8973_v52 = vld [vmem:[#allocation11 + $0x250] ss:$24 sps:$4 sm:$0xff]  }
  0xe4   :  { %1918 = vmatprep.subr.bf16.mxu0 %v8942_v13  ;;  %1957 = vmatprep.subr.bf16.mxu1 %v8972_v23 }
  0xe6   :  { %1958 = vmatpush2.bf16.msra.mxu1 %v8970_v24  ;;  %v9999_v24 = vld [vmem:[#allocation11 + $0xc4] ss:$24 sps:$4 sm:$0xff]  }
  0xe7   :  { %1919 = vmatpush2.bf16.msra.mxu0 %v8940_v16  ;;  %1959 = vmatprep.subr.bf16.mxu1 %v8975_v33 }
  0xe8   :  { %1920 = vmatprep.subr.bf16.mxu0 %v8948_v38  ;;  %v9003_v38 = vld [vmem:[#allocation11 + $0xf8] ss:$24 sps:$4 sm:$0xff]  }
  0xea   :  { %1105 = vmatmul.mubr.bf16.gmra.mxu0 %v9894_v58  ;;  %1960 = vmatpush2.bf16.msra.mxu1 %v8973_v52  ;;  %v8979_v58 = vld [vmem:[#allocation11 + $0x1f0] ss:$24 sps:$4 sm:$0xff]   ;;  %v9011_v52 = vld [vmem:[#allocation11 + $0xcc] ss:$24 sps:$4 sm:$0xff]  }
  0xeb   :  { %1921 = vmatpush2.bf16.msra.mxu0 %v8946_v20  ;;  %1114 = vmatprep.mubr.bf16.mxu0 %v9898_v62  ;;  %v8984_v62 = vld [vmem:[#allocation11 + $0x1c4] ss:$24 sps:$4 sm:$0xff]  }
  0xec   :  { %1922 = vmatprep.subr.bf16.mxu0 %v8954_v22  ;;  %1961 = vmatprep.subr.bf16.mxu1 %v8978_v30  ;;  %v9009_v30 = vld [vmem:[#allocation11 + $0xc8] ss:$24 sps:$4 sm:$0xff]  }
  0xee   :  { %1962 = vmatpush2.bf16.msra.mxu1 %v8976_v34 }
  0xef   :  { %1923 = vmatpush2.bf16.msra.mxu0 %v8952_v25  ;;  %1963 = vmatprep.subr.bf16.mxu1 %v8981_v36 }
  0xf0   :  { %1924 = vmatprep.subr.bf16.mxu0 %v8960_v48  ;;  %v10002_v48 = vld [vmem:[#allocation11 + $0xc0] ss:$24 sps:$4 sm:$0xff]  }
  0xf2   :  { %1115 = vmatmul.mubr.bf16.gmra.mxu0 %v9902_v8  ;;  %1964 = vmatpush2.bf16.msra.mxu1 %v8979_v58  ;;  %v9950_v8 = vld [vmem:[#allocation10] sm:$0x3f] }
  0xf3   :  { %1925 = vmatpush2.bf16.msra.mxu0 %v8958_v26  ;;  %1928 = vmatprep.mubr.bf16.mxu0 %v9924_v32  ;;  %v9954_v32 = vrot.slane %v9950_v8, %v9921_v29  ;;  %v9958_v40 = vrot.slane %v9950_v8, %v9911_v19  ;;  %v9980_v63 = vrot.slane %v9950_v8, %v11434_v7 }
  0xf4   :  { %1926 = vmatprep.subr.bf16.mxu0 %v8966_v28  ;;  %1965 = vmatprep.subr.bf16.mxu1 %v8984_v62  ;;  %v10009_v62 = vld [vmem:[#allocation11 + $0x94] ss:$24 sps:$4 sm:$0xff]  }
  0xf6   :  { %1966 = vmatpush2.bf16.msra.mxu1 %v8982_v37 }
  0xf7   :  { %1927 = vmatpush2.bf16.msra.mxu0 %v8964_v35  ;;  %1967 = vmatprep.subr.bf16.mxu1 %v8987_v61 }
  0xf8   :  { %2665 = vmatprep.subr.bf16.mxu0 %v9964_v49 }
  0xfa   :  { %1929 = vmatmul.mubr.bf16.vlgmr.msra.gmra.mxu0 %v9930_v1  ;;  %1968 = vmatpush2.bf16.msra.mxu1 %v8985_v39  ;;  %v10012_v39 = vld [vmem:[#allocation11 + $0x90] ss:$24 sps:$4 sm:$0xff]  }
  0xfb   :  { %2666 = vmatpush1.bf16.msra.mxu0 %v8988_v51  ;;  %2706 = vmatprep.subr.bf16.mxu1 %v8993_v53  ;;  %v10019_v53 = vld [vmem:[#allocation11 + $0x64] ss:$24 sps:$4 sm:$0xff]  }
  0xfc   :  { %2667 = vmatprep.subr.bf16.mxu0 %v9975_v59 }
  0xfd   :  { %1970 = vmatmul.mubr.bf16.vlgmr.msra.gmra.mxu1 %v9930_v1  ;;  %v11435_v1 = vsub.s32 2, %v9907_v10 }
  0xfe   :  { %2707 = vmatpush1.bf16.msra.mxu1 %v8991_v54 }
  0xff   :  { %v9972_v56 = vrot.slane %v9950_v8, %v11435_v1  ;;  %2668 = vmatpush1.bf16.msra.mxu0 %v9982_v17  ;;  %2708 = vmatprep.subr.bf16.mxu1 %v8999_v21 }
 0x100   :  { %2669 = vmatprep.subr.bf16.mxu0 %v9989_v31 }
 0x102   :  { %2709 = vmatpush1.bf16.msra.mxu1 %v8997_v3 }
 0x103   :  { %2670 = vmatpush1.bf16.msra.mxu0 %v9992_v14  ;;  %2710 = vmatprep.subr.bf16.mxu1 %v9005_v15  ;;  %v10040_v15 = vld [vmem:[#allocation11 + $0x3c] ss:$24 sps:$4 sm:$0xff]  }
 0x104   :  { %2671 = vmatprep.subr.bf16.mxu0 %v9999_v24 }
 0x106   :  { %2711 = vmatpush1.bf16.msra.mxu1 %v9003_v38  ;;  %v10044_v38 = vld [vmem:[#allocation11 + $0x38] ss:$24 sps:$4 sm:$0xff]  }
 0x107   :  { %2672 = vmatpush1.bf16.msra.mxu0 %v10002_v48  ;;  %2712 = vmatprep.subr.bf16.mxu1 %v9011_v52 }
 0x108   :  { %2673 = vmatprep.subr.bf16.mxu0 %v10009_v62 }
 0x10a   :  { %2713 = vmatpush1.bf16.msra.mxu1 %v9009_v30 }
 0x10b   :  { %2674 = vmatpush1.bf16.msra.mxu0 %v10012_v39 }
 0x10c   :  { %2675 = vmatprep.subr.bf16.mxu0 %v10019_v53 }
 0x13a   :  { %v820_v41 = vpop.f32.mrf.mxu0 }
 0x13b   :  { %v821_v43 = vadd.f32 %v820_v41, %v9954_v32  ;;  %v9017_v41 = vld [vmem:[#allocation11 + $0x9c] ss:$24 sps:$4 sm:$0xff]  }
 0x13c   :  { %v822_v44 = vpop.f32.mrf.mxu0  ;;  %2714 = vmatprep.subr.bf16.mxu1 %v9017_v41  ;;  %v10067_v41 = vld [vmem:[#allocation11 + $0x2d4] ss:$24 sps:$4 sm:$0xff]  }
 0x13d   :  { %1125 = vst [vmem:[#allocation2] sm:$0xff] %v821_v43  ;;  %v823_v45 = vadd.f32 %v822_v44, %v9958_v40  ;;  %v933_v2 = vpop.f32.mrf.mxu1 }
 0x13e   :  { %v824_v46 = vpop.f32.mrf.mxu0  ;;  %v934_v6 = vadd.f32 %v933_v2, %v9972_v56 }
 0x13f   :  { %1126 = vst [vmem:[#allocation2 + $0x8] sm:$0xff] %v823_v45  ;;  %v825_v47 = vadd.f32 %v824_v46, %v9954_v32  ;;  %v935_v27 = vpop.f32.mrf.mxu1  ;;  %v9015_v45 = vld [vmem:[#allocation11 + $0x98] ss:$24 sps:$4 sm:$0xff]  }
 0x140   :  { %v826_v50 = vpop.f32.mrf.mxu0  ;;  %1127 = vst [vmem:[#allocation2 + $0x10] sm:$0xff] %v934_v6  ;;  %v936_v13 = vadd.f32 %v935_v27, %v9980_v63  ;;  %2715 = vmatpush1.bf16.msra.mxu1 %v9015_v45  ;;  %v10070_v45 = vld [vmem:[#allocation11 + $0x2d0] ss:$24 sps:$4 sm:$0xff]  }
 0x141   :  { %1131 = vst [vmem:[#allocation2 + $0x30] sm:$0xff] %v825_v47  ;;  %v827_v11 = vadd.f32 %v826_v50, %v9958_v40  ;;  %v937_v18 = vpop.f32.mrf.mxu1 }
 0x142   :  { %v830_v55 = vpop.f32.mrf.mxu0  ;;  %1128 = vst [vmem:[#allocation2 + $0x18] sm:$0xff] %v936_v13  ;;  %v938_v20 = vadd.f32 %v937_v18, %v9972_v56  ;;  %v10038_v13 = vld [vmem:[#allocation11 + $0x30] ss:$24 sps:$4 sm:$0xff]  }
 0x143   :  { %1132 = vst [vmem:[#allocation2 + $0x38] sm:$0xff] %v827_v11  ;;  %v831_v57 = vadd.f32 %v830_v55, %v9954_v32  ;;  %v939_v23 = vpop.f32.mrf.mxu1  ;;  %v10022_v55 = vld [vmem:[#allocation11 + $0x60] ss:$24 sps:$4 sm:$0xff]  }
 0x144   :  { %v832_v60 = vpop.f32.mrf.mxu0  ;;  %1133 = vst [vmem:[#allocation2 + $0x40] sm:$0xff] %v938_v20  ;;  %v940_v33 = vadd.f32 %v939_v23, %v9980_v63  ;;  %2676 = vmatpush1.bf16.msra.mxu0 %v10022_v55 }
 0x145   :  { %1137 = vst [vmem:[#allocation2 + $0x60] sm:$0xff] %v831_v57  ;;  %v833_v0 = vadd.f32 %v832_v60, %v9958_v40  ;;  %v943_v28 = vpop.f32.mrf.mxu1  ;;  %v10024_v57 = vld [vmem:[#allocation11 + $0x6c] ss:$24 sps:$4 sm:$0xff]  }
 0x146   :  { %v834_v5 = vpop.f32.mrf.mxu0  ;;  %1134 = vst [vmem:[#allocation2 + $0x48] sm:$0xff] %v940_v33  ;;  %v944_v35 = vadd.f32 %v943_v28, %v9972_v56  ;;  %2716 = vmatprep.subr.bf16.mxu1 %v10024_v57  ;;  %v10056_v28 = vld [vmem:[#allocation11 + $0xc] ss:$24 sps:$4 sm:$0xff]  }
 0x147   :  { %1138 = vst [vmem:[#allocation2 + $0x68] sm:$0xff] %v833_v0  ;;  %v835_v9 = vadd.f32 %v834_v5, %v9954_v32  ;;  %v945_v58 = vpop.f32.mrf.mxu1  ;;  %v10028_v0 = vld [vmem:[#allocation11 + $0x68] ss:$24 sps:$4 sm:$0xff]  }
 0x148   :  { %v836_v12 = vpop.f32.mrf.mxu0  ;;  %1139 = vst [vmem:[#allocation2 + $0x70] sm:$0xff] %v944_v35  ;;  %v946_v61 = vadd.f32 %v945_v58, %v9980_v63  ;;  %2717 = vmatpush1.bf16.msra.mxu1 %v10028_v0  ;;  %v10060_v35 = vld [vmem:[#allocation11 + $0x8] ss:$24 sps:$4 sm:$0xff]  }
 0x149   :  { %1143 = vst [vmem:[#allocation2 + $0x90] sm:$0xff] %v835_v9  ;;  %v837_v16 = vadd.f32 %v836_v12, %v9958_v40  ;;  %v947_v44 = vpop.f32.mrf.mxu1  ;;  %v10035_v9 = vld [vmem:[#allocation11 + $0x34] ss:$24 sps:$4 sm:$0xff]   ;;  %2718 = vmatprep.subr.bf16.mxu1 %v10040_v15 }
 0x14a   :  { %v840_v42 = vpop.f32.mrf.mxu0  ;;  %1140 = vst [vmem:[#allocation2 + $0x78] sm:$0xff] %v946_v61  ;;  %v948_v47 = vadd.f32 %v947_v44, %v9972_v56  ;;  %2677 = vmatprep.subr.bf16.mxu0 %v10035_v9 }
 0x14b   :  { %1144 = vst [vmem:[#allocation2 + $0x98] sm:$0xff] %v837_v16  ;;  %v841_v22 = vadd.f32 %v840_v42, %v9954_v32  ;;  %v949_v51 = vpop.f32.mrf.mxu1  ;;  %2678 = vmatpush1.bf16.msra.mxu0 %v10038_v13 }
 0x14c   :  { %v842_v25 = vpop.f32.mrf.mxu0  ;;  %1145 = vst [vmem:[#allocation2 + $0xa0] sm:$0xff] %v948_v47  ;;  %v950_v54 = vadd.f32 %v949_v51, %v9980_v63  ;;  %2719 = vmatpush1.bf16.msra.mxu1 %v10044_v38  ;;  %v10076_v51 = vld [vmem:[#allocation11 + $0x2d8] ss:$24 sps:$4 sm:$0xff]  }
 0x14d   :  { %1149 = vst [vmem:[#allocation2 + $0xc0] sm:$0xff] %v841_v22  ;;  %v843_v26 = vadd.f32 %v842_v25, %v9958_v40  ;;  %v953_v21 = vpop.f32.mrf.mxu1  ;;  %v10051_v25 = vld [vmem:[#allocation11 + $0x4] ss:$24 sps:$4 sm:$0xff]   ;;  %2720 = vmatprep.subr.bf16.mxu1 %v10056_v28 }
 0x14e   :  { %v844_v34 = vpop.f32.mrf.mxu0  ;;  %1146 = vst [vmem:[#allocation2 + $0xa8] sm:$0xff] %v950_v54  ;;  %v954_v3 = vadd.f32 %v953_v21, %v9972_v56  ;;  %2679 = vmatprep.subr.bf16.mxu0 %v10051_v25 }
 0x14f   :  { %1150 = vst [vmem:[#allocation2 + $0xc8] sm:$0xff] %v843_v26  ;;  %v845_v36 = vadd.f32 %v844_v34, %v9954_v32  ;;  %v955_v6 = vpop.f32.mrf.mxu1  ;;  %v10054_v26 = vld [vmem:[#allocation11] ss:$24 sps:$4 sm:$0xff]  }
 0x150   :  { %v846_v37 = vpop.f32.mrf.mxu0  ;;  %1151 = vst [vmem:[#allocation2 + $0xd0] sm:$0xff] %v954_v3  ;;  %v956_v12 = vadd.f32 %v955_v6, %v9980_v63  ;;  %2680 = vmatpush1.bf16.msra.mxu0 %v10054_v26  ;;  %2721 = vmatpush1.bf16.msra.mxu1 %v10060_v35  ;;  %v10086_v6 = vld [vmem:[#allocation11 + $0x2a0] ss:$24 sps:$4 sm:$0xff]  }
 0x151   :  { %1155 = vst [vmem:[#allocation2 + $0xf0] sm:$0xff] %v845_v36  ;;  %v847_v43 = vadd.f32 %v846_v37, %v9958_v40  ;;  %v957_v18 = vpop.f32.mrf.mxu1  ;;  %2681 = vmatprep.subr.bf16.mxu0 %v10067_v41 }
 0x152   :  { %v850_v46 = vpop.f32.mrf.mxu0  ;;  %1152 = vst [vmem:[#allocation2 + $0xd8] sm:$0xff] %v956_v12  ;;  %v958_v20 = vadd.f32 %v957_v18, %v9972_v56  ;;  %v10092_v18 = vld [vmem:[#allocation11 + $0x2a8] ss:$24 sps:$4 sm:$0xff]  }
 0x153   :  { %1156 = vst [vmem:[#allocation2 + $0xf8] sm:$0xff] %v847_v43  ;;  %v851_v50 = vadd.f32 %v850_v46, %v9954_v32  ;;  %v959_v23 = vpop.f32.mrf.mxu1  ;;  %v10072_v46 = vld [vmem:[#allocation11 + $0x2dc] ss:$24 sps:$4 sm:$0xff]   ;;  %11517 = vst [vmem:[#allocation19_spill] sm:$0xff] %v10092_v18 }
 0x154   :  { %v852_v11 = vpop.f32.mrf.mxu0  ;;  %1157 = vst [vmem:[#allocation2 + $0x100] sm:$0xff] %v958_v20  ;;  %v960_v52 = vadd.f32 %v959_v23, %v9980_v63  ;;  %2682 = vmatpush2.bf16.msra.mxu0 %v10070_v45  ;;  %2722 = vmatprep.subr.bf16.mxu1 %v10072_v46 }
 0x155   :  { %1161 = vst [vmem:[#allocation2 + $0x120] sm:$0xff] %v851_v50  ;;  %v853_v60 = vadd.f32 %v852_v11, %v9958_v40  ;;  %v963_v34 = vpop.f32.mrf.mxu1  ;;  %2723 = vmatpush2.bf16.msra.mxu1 %v10076_v51 }
 0x156   :  { %v854_v2 = vpop.f32.mrf.mxu0  ;;  %1158 = vst [vmem:[#allocation2 + $0x108] sm:$0xff] %v960_v52  ;;  %v964_v58 = vadd.f32 %v963_v34, %v9972_v56  ;;  %v10102_v34 = vld [vmem:[#allocation11 + $0x270] ss:$24 sps:$4 sm:$0xff]  }
 0x157   :  { %1162 = vst [vmem:[#allocation2 + $0x128] sm:$0xff] %v853_v60  ;;  %v855_v5 = vadd.f32 %v854_v2, %v9954_v32  ;;  %v965_v61 = vpop.f32.mrf.mxu1  ;;  %v10083_v2 = vld [vmem:[#allocation11 + $0x2a4] ss:$24 sps:$4 sm:$0xff]  }
 0x158   :  { %v856_v27 = vpop.f32.mrf.mxu0  ;;  %1163 = vst [vmem:[#allocation2 + $0x130] sm:$0xff] %v964_v58  ;;  %v966_v44 = vadd.f32 %v965_v61, %v9980_v63  ;;  %2683 = vmatprep.subr.bf16.mxu0 %v10083_v2  ;;  %v10108_v61 = vld [vmem:[#allocation11 + $0x278] ss:$24 sps:$4 sm:$0xff]  }
 0x159   :  { %1167 = vst [vmem:[#allocation2 + $0x150] sm:$0xff] %v855_v5  ;;  %v857_v16 = vadd.f32 %v856_v27, %v9958_v40  ;;  %v967_v50 = vpop.f32.mrf.mxu1  ;;  %v10088_v27 = vld [vmem:[#allocation11 + $0x2ac] ss:$24 sps:$4 sm:$0xff]   ;;  %2684 = vmatpush2.bf16.msra.mxu0 %v10086_v6  ;;  %11519 = vst [vmem:[#allocation21_spill] sm:$0xff] %v10108_v61 }
 0x15a   :  { %v860_v42 = vpop.f32.mrf.mxu0  ;;  %1164 = vst [vmem:[#allocation2 + $0x138] sm:$0xff] %v966_v44  ;;  %v968_v54 = vadd.f32 %v967_v50, %v9972_v56  ;;  %2724 = vmatprep.subr.bf16.mxu1 %v10088_v27 }
 0x15b   :  { %1168 = vst [vmem:[#allocation2 + $0x158] sm:$0xff] %v857_v16  ;;  %v861_v22 = vadd.f32 %v860_v42, %v9954_v32  ;;  %v969_v21 = vpop.f32.mrf.mxu1  ;;  %2725 = vmatpush2.bf16.msra.mxu1 %v10092_v18 }
 0x15c   :  { %v862_v33 = vpop.f32.mrf.mxu0  ;;  %1169 = vst [vmem:[#allocation2 + $0x160] sm:$0xff] %v968_v54  ;;  %v970_v5 = vadd.f32 %v969_v21, %v9980_v63  ;;  %v10117_v54 = vld [vmem:[#allocation11 + $0x244] ss:$24 sps:$4 sm:$0xff]  }
 0x15d   :  { %1173 = vst [vmem:[#allocation2 + $0x180] sm:$0xff] %v861_v22  ;;  %v863_v30 = vadd.f32 %v862_v33, %v9958_v40  ;;  %v973_v16 = vpop.f32.mrf.mxu1  ;;  %v10099_v33 = vld [vmem:[#allocation11 + $0x274] ss:$24 sps:$4 sm:$0xff]  }
 0x15e   :  { %v864_v36 = vpop.f32.mrf.mxu0  ;;  %1170 = vst [vmem:[#allocation2 + $0x168] sm:$0xff] %v970_v5  ;;  %v974_v20 = vadd.f32 %v973_v16, %v9972_v56  ;;  %2685 = vmatprep.subr.bf16.mxu0 %v10099_v33  ;;  %v10122_v5 = vld [vmem:[#allocation11 + $0x24c] ss:$24 sps:$4 sm:$0xff]  }
 0x15f   :  { %1174 = vst [vmem:[#allocation2 + $0x188] sm:$0xff] %v863_v30  ;;  %v865_v37 = vadd.f32 %v864_v36, %v9954_v32  ;;  %v975_v23 = vpop.f32.mrf.mxu1  ;;  %v10104_v36 = vld [vmem:[#allocation11 + $0x27c] ss:$24 sps:$4 sm:$0xff]   ;;  %2686 = vmatpush2.bf16.msra.mxu0 %v10102_v34  ;;  %11521 = vst [vmem:[#allocation23_spill] sm:$0xff] %v10122_v5 }
 0x160   :  { %v866_v43 = vpop.f32.mrf.mxu0  ;;  %1175 = vst [vmem:[#allocation2 + $0x190] sm:$0xff] %v974_v20  ;;  %v976_v30 = vadd.f32 %v975_v23, %v9980_v63  ;;  %11518 = vst [vmem:[#allocation20_spill] sm:$0xff] %v10104_v36  ;;  %2726 = vmatprep.subr.bf16.mxu1 %v10104_v36  ;;  %2687 = vmatprep.subr.bf16.mxu0 %v10117_v54  ;;  %v10128_v20 = vld [vmem:[#allocation11 + $0x21c] ss:$24 sps:$4 sm:$0xff]  }
 0x161   :  { %1179 = vst [vmem:[#allocation2 + $0x1b0] sm:$0xff] %v865_v37  ;;  %v867_v47 = vadd.f32 %v866_v43, %v9958_v40  ;;  %v977_v37 = vpop.f32.mrf.mxu1  ;;  %2727 = vmatpush2.bf16.msra.mxu1 %v10108_v61  ;;  %11522 = vst [vmem:[#allocation24_spill] sm:$0xff] %v10128_v20 }
 0x162   :  { %v870_v11 = vpop.f32.mrf.mxu0  ;;  %1176 = vst [vmem:[#allocation2 + $0x198] sm:$0xff] %v976_v30  ;;  %v978_v44 = vadd.f32 %v977_v37, %v9972_v56  ;;  %2728 = vmatprep.subr.bf16.mxu1 %v10122_v5  ;;  %v10138_v37 = vld [vmem:[#allocation11 + $0x218] ss:$24 sps:$4 sm:$0xff]  }
 0x163   :  { %1180 = vst [vmem:[#allocation2 + $0x1b8] sm:$0xff] %v867_v47  ;;  %v871_v60 = vadd.f32 %v870_v11, %v9954_v32  ;;  %v979_v50 = vpop.f32.mrf.mxu1  ;;  %v10115_v11 = vld [vmem:[#allocation11 + $0x240] ss:$24 sps:$4 sm:$0xff]   ;;  %11523 = vst [vmem:[#allocation25_spill] sm:$0xff] %v10138_v37 }
 0x164   :  { %v872_v3 = vpop.f32.mrf.mxu0  ;;  %1181 = vst [vmem:[#allocation2 + $0x1c0] sm:$0xff] %v978_v44  ;;  %2688 = vmatpush2.bf16.msra.mxu0 %v10115_v11 }
 0x165   :  { %1185 = vst [vmem:[#allocation2 + $0x1e0] sm:$0xff] %v871_v60  ;;  %v873_v12 = vadd.f32 %v872_v3, %v9958_v40  ;;  %v10119_v60 = vld [vmem:[#allocation11 + $0x248] ss:$24 sps:$4 sm:$0xff]   ;;  %v980_v3 = vadd.f32 %v979_v50, %v9980_v63  ;;  %v10144_v50 = vld [vmem:[#allocation11 + $0x1ec] ss:$24 sps:$4 sm:$0xff]  }
 0x166   :  { %v874_v42 = vpop.f32.mrf.mxu0  ;;  %11520 = vst [vmem:[#allocation22_spill] sm:$0xff] %v10119_v60  ;;  %2729 = vmatpush2.bf16.msra.mxu1 %v10119_v60  ;;  %11524 = vst [vmem:[#allocation26_spill] sm:$0xff] %v10144_v50 }
 0x167   :  { %1186 = vst [vmem:[#allocation2 + $0x1e8] sm:$0xff] %v873_v12  ;;  %v875_v22 = vadd.f32 %v874_v42, %v9954_v32  ;;  %v10124_v12 = vld [vmem:[#allocation11 + $0x214] ss:$24 sps:$4 sm:$0xff]   ;;  %v983_v42 = vpop.f32.mrf.mxu1  ;;  %1182 = vst [vmem:[#allocation2 + $0x1c8] sm:$0xff] %v980_v3  ;;  %2730 = vmatprep.subr.bf16.mxu1 %v10128_v20  ;;  %v10167_v20 = vld [vmem:[#allocation11 + $0x1b0] ss:$24 sps:$4 sm:$0xff]  }
 0x168   :  { %v876_v52 = vpop.f32.mrf.mxu0  ;;  %v984_v23 = vadd.f32 %v983_v42, %v9972_v56  ;;  %2689 = vmatprep.subr.bf16.mxu0 %v10124_v12 }
 0x169   :  { %1191 = vst [vmem:[#allocation2 + $0x210] sm:$0xff] %v875_v22  ;;  %v877_v58 = vadd.f32 %v876_v52, %v9958_v40  ;;  %v10133_v52 = vld [vmem:[#allocation11 + $0x210] ss:$24 sps:$4 sm:$0xff]  }
 0x16a   :  { %v880_v43 = vpop.f32.mrf.mxu0  ;;  %1187 = vst [vmem:[#allocation2 + $0x1f0] sm:$0xff] %v984_v23  ;;  %2690 = vmatpush2.bf16.msra.mxu0 %v10133_v52  ;;  %2731 = vmatpush2.bf16.msra.mxu1 %v10138_v37 }
 0x16b   :  { %1192 = vst [vmem:[#allocation2 + $0x218] sm:$0xff] %v877_v58  ;;  %v881_v47 = vadd.f32 %v880_v43, %v9954_v32  ;;  %v985_v58 = vpop.f32.mrf.mxu1  ;;  %v10140_v43 = vld [vmem:[#allocation11 + $0x1e4] ss:$24 sps:$4 sm:$0xff]   ;;  %2732 = vmatprep.subr.bf16.mxu1 %v10144_v50 }
 0x16c   :  { %v882_v21 = vpop.f32.mrf.mxu0  ;;  %2691 = vmatprep.subr.bf16.mxu0 %v10140_v43 }
 0x16d   :  { %1197 = vst [vmem:[#allocation2 + $0x240] sm:$0xff] %v881_v47  ;;  %v883_v16 = vadd.f32 %v882_v21, %v9958_v40  ;;  %v986_v47 = vadd.f32 %v985_v58, %v9980_v63  ;;  %v987_v3 = vpop.f32.mrf.mxu1 }
 0x16e   :  { %v884_v22 = vpop.f32.mrf.mxu0  ;;  %v988_v42 = vadd.f32 %v987_v3, %v9972_v56 }
 0x16f   :  { %1198 = vst [vmem:[#allocation2 + $0x248] sm:$0xff] %v883_v16  ;;  %v885_v30 = vadd.f32 %v884_v22, %v9954_v32  ;;  %1188 = vst [vmem:[#allocation2 + $0x1f8] sm:$0xff] %v986_v47  ;;  %v10149_v22 = vld [vmem:[#allocation11 + $0x1e0] ss:$24 sps:$4 sm:$0xff]   ;;  %v989_v4 = vpop.f32.mrf.mxu1 }
 0x170   :  { %v886_v44 = vpop.f32.mrf.mxu0  ;;  %1193 = vst [vmem:[#allocation2 + $0x220] sm:$0xff] %v988_v42  ;;  %v990_v3 = vadd.f32 %v989_v4, %v9980_v63  ;;  %2692 = vmatpush2.bf16.msra.mxu0 %v10149_v22  ;;  %v11527_v42 = vsub.s32 4, %v9907_v10 }
 0x171   :  { %1203 = vst [vmem:[#allocation2 + $0x270] sm:$0xff] %v885_v30  ;;  %v887_v21 = vadd.f32 %v886_v44, %v9958_v40  ;;  %v10155_v30 = vld [vmem:[#allocation11 + $0x1e8] ss:$24 sps:$4 sm:$0xff]   ;;  %v10157_v44 = vld [vmem:[#allocation11 + $0x1b4] ss:$24 sps:$4 sm:$0xff]   ;;  %v993_v1 = vpop.f32.mrf.mxu1 }
 0x172   :  { %v890_v16 = vpop.f32.mrf.mxu0  ;;  %11525 = vst [vmem:[#allocation27_spill] sm:$0xff] %v10155_v30  ;;  %1194 = vst [vmem:[#allocation2 + $0x228] sm:$0xff] %v990_v3  ;;  %v994_v37 = vadd.f32 %v993_v1, %v9972_v56  ;;  %2733 = vmatpush2.bf16.msra.mxu1 %v10155_v30  ;;  %2693 = vmatprep.subr.bf16.mxu0 %v10157_v44  ;;  %v10177_v3 = vld [vmem:[#allocation11 + $0x1b8] ss:$24 sps:$4 sm:$0xff]   ;;  %v10179_v1 = vld [vmem:[#allocation11 + $0x184] ss:$24 sps:$4 sm:$0xff]  }
 0x173   :  { %1204 = vst [vmem:[#allocation2 + $0x278] sm:$0xff] %v887_v21  ;;  %v891_v23 = vadd.f32 %v890_v16, %v9954_v32  ;;  %v10161_v21 = vld [vmem:[#allocation11 + $0x1bc] ss:$24 sps:$4 sm:$0xff]   ;;  %11528 = vst [vmem:[#allocation29_spill] sm:$0xff] %v10177_v3 }
 0x174   :  { %v892_v47 = vpop.f32.mrf.mxu0  ;;  %11526 = vst [vmem:[#allocation28_spill] sm:$0xff] %v10161_v21  ;;  %1199 = vst [vmem:[#allocation2 + $0x250] sm:$0xff] %v994_v37  ;;  %2734 = vmatprep.subr.bf16.mxu1 %v10161_v21  ;;  %2694 = vmatpush2.bf16.msra.mxu0 %v10167_v20  ;;  %v10193_v37 = vld [vmem:[#allocation11 + $0x180] ss:$24 sps:$4 sm:$0xff]  }
 0x175   :  { %1209 = vst [vmem:[#allocation2 + $0x2a0] sm:$0xff] %v891_v23  ;;  %v893_v16 = vadd.f32 %v892_v47, %v9958_v40  ;;  %v10173_v23 = vrot.slane %v9950_v8, %v11527_v42  ;;  %v995_v47 = vpop.f32.mrf.mxu1  ;;  %v11530_v42 = vsub.s32 5, %v9907_v10  ;;  %2695 = vmatprep.subr.bf16.mxu0 %v10179_v1 }
 0x176   :  { %v894_v58 = vpop.f32.mrf.mxu0  ;;  %2735 = vmatpush2.bf16.msra.mxu1 %v10177_v3 }
 0x177   :  { %1210 = vst [vmem:[#allocation2 + $0x2a8] sm:$0xff] %v893_v16  ;;  %v895_v4 = vadd.f32 %v894_v58, %v9954_v32  ;;  %v996_v16 = vadd.f32 %v995_v47, %v9980_v63  ;;  %v10183_v32 = vld [vmem:[#allocation11 + $0x18c] ss:$24 sps:$4 sm:$0xff]   ;;  %v10189_v30 = vrot.slane %v9950_v8, %v11530_v42  ;;  %v997_v50 = vpop.f32.mrf.mxu1 }
 0x178   :  { %v896_v7 = vpop.f32.mrf.mxu0  ;;  %11529 = vst [vmem:[#allocation30_spill] sm:$0xff] %v10183_v32  ;;  %v998_v5 = vadd.f32 %v997_v50, %v9972_v56  ;;  %2736 = vmatprep.subr.bf16.mxu1 %v10183_v32  ;;  %2696 = vmatpush2.bf16.msra.mxu0 %v10193_v37 }
 0x179   :  { %1215 = vst [vmem:[#allocation2 + $0x2d0] sm:$0xff] %v895_v4  ;;  %v897_v58 = vadd.f32 %v896_v7, %v9958_v40  ;;  %1200 = vst [vmem:[#allocation2 + $0x258] sm:$0xff] %v996_v16  ;;  %v999_v4 = vpop.f32.mrf.mxu1  ;;  %v10198_v40 = vld [vmem:[#allocation11 + $0x188] ss:$24 sps:$4 sm:$0xff]  }
 0x17a   :  { %v1046_v60 = vpop.f32.mrf.mxu0  ;;  %11531 = vst [vmem:[#allocation31_spill] sm:$0xff] %v10198_v40  ;;  %1205 = vst [vmem:[#allocation2 + $0x280] sm:$0xff] %v998_v5  ;;  %v1000_v7 = vadd.f32 %v999_v4, %v9980_v63  ;;  %2737 = vmatpush2.bf16.msra.mxu1 %v10198_v40  ;;  %v10207_v5 = vld [vmem:[#allocation11 + $0x164] ss:$24 sps:$4 sm:$0xff]  }
 0x17b   :  { %1216 = vst [vmem:[#allocation2 + $0x2d8] sm:$0xff] %v897_v58  ;;  %v1047_v47 = vadd.f32 %v1046_v60, %v10173_v23  ;;  %v1003_v16 = vpop.f32.mrf.mxu1  ;;  %3472 = vmatprep.subr.bf16.mxu1 %v9964_v49  ;;  %2747 = vmatprep.subr.bf16.mxu0 %v10207_v5 }
 0x17c   :  { %v1048_v8 = vpop.f32.mrf.mxu0  ;;  %1206 = vst [vmem:[#allocation2 + $0x288] sm:$0xff] %v1000_v7  ;;  %v1004_v60 = vadd.f32 %v1003_v16, %v9972_v56 }
 0x17d   :  { %1129 = vst [vmem:[#allocation2 + $0x20] sm:$0xff] %v1047_v47  ;;  %v1049_v50 = vadd.f32 %v1048_v8, %v10189_v30  ;;  %v1005_v3 = vpop.f32.mrf.mxu1 }
 0x17e   :  { %v1050_v58 = vpop.f32.mrf.mxu0  ;;  %1211 = vst [vmem:[#allocation2 + $0x2b0] sm:$0xff] %v1004_v60  ;;  %v1006_v47 = vadd.f32 %v1005_v3, %v9980_v63 }
 0x17f   :  { %1130 = vst [vmem:[#allocation2 + $0x28] sm:$0xff] %v1049_v50  ;;  %v1051_v42 = vadd.f32 %v1050_v58, %v10173_v23  ;;  %v1007_v7 = vpop.f32.mrf.mxu1 }
 0x180   :  { %v1052_v4 = vpop.f32.mrf.mxu0  ;;  %1212 = vst [vmem:[#allocation2 + $0x2b8] sm:$0xff] %v1006_v47  ;;  %v1008_v16 = vadd.f32 %v1007_v7, %v9972_v56 }
 0x181   :  { %1135 = vst [vmem:[#allocation2 + $0x50] sm:$0xff] %v1051_v42  ;;  %v1053_v8 = vadd.f32 %v1052_v4, %v10189_v30  ;;  %v1009_v40 = vpop.f32.mrf.mxu1 }
 0x182   :  { %v1056_v50 = vpop.f32.mrf.mxu0  ;;  %1217 = vst [vmem:[#allocation2 + $0x2e0] sm:$0xff] %v1008_v16  ;;  %v1010_v3 = vadd.f32 %v1009_v40, %v9980_v63 }
 0x183   :  { %1136 = vst [vmem:[#allocation2 + $0x58] sm:$0xff] %v1053_v8  ;;  %v1057_v58 = vadd.f32 %v1056_v50, %v10173_v23  ;;  %v10217_v60 = vpop.f32.mrf.mxu1 }
 0x184   :  { %v1058_v32 = vpop.f32.mrf.mxu0  ;;  %1218 = vst [vmem:[#allocation2 + $0x2e8] sm:$0xff] %v1010_v3 }
 0x185   :  { %1141 = vst [vmem:[#allocation2 + $0x80] sm:$0xff] %v1057_v58  ;;  %v1059_v49 = vadd.f32 %v1058_v32, %v10189_v30  ;;  %v10220_v47 = vpop.f32.mrf.mxu1 }
 0x186   :  { %v1060_v42 = vpop.f32.mrf.mxu0 }
 0x187   :  { %1142 = vst [vmem:[#allocation2 + $0x88] sm:$0xff] %v1059_v49  ;;  %v1061_v4 = vadd.f32 %v1060_v42, %v10173_v23  ;;  %v1893_v7 = vpop.f32.mrf.mxu1 }
 0x188   :  { %v1062_v56 = vpop.f32.mrf.mxu0 }
 0x189   :  { %1147 = vst [vmem:[#allocation2 + $0xb0] sm:$0xff] %v1061_v4  ;;  %v1063_v8 = vadd.f32 %v1062_v56, %v10189_v30  ;;  %v1894_v40 = vpop.f32.mrf.mxu1 }
 0x18a   :  { %v1066_v50 = vpop.f32.mrf.mxu0 }
 0x18b   :  { %1148 = vst [vmem:[#allocation2 + $0xb8] sm:$0xff] %v1063_v8  ;;  %v1067_v63 = vadd.f32 %v1066_v50, %v10173_v23 }
 0x18c   :  { %v1068_v32 = vpop.f32.mrf.mxu0 }
 0x18d   :  { %1153 = vst [vmem:[#allocation2 + $0xe0] sm:$0xff] %v1067_v63  ;;  %v1069_v16 = vadd.f32 %v1068_v32, %v10189_v30 }
 0x18e   :  { %v1070_v58 = vpop.f32.mrf.mxu0 }
 0x18f   :  { %1154 = vst [vmem:[#allocation2 + $0xe8] sm:$0xff] %v1069_v16  ;;  %v1071_v3 = vadd.f32 %v1070_v58, %v10173_v23 }
 0x190   :  { %v1072_v49 = vpop.f32.mrf.mxu0 }
 0x191   :  { %1159 = vst [vmem:[#allocation2 + $0x110] sm:$0xff] %v1071_v3  ;;  %v1073_v42 = vadd.f32 %v1072_v49, %v10189_v30 }
 0x192   :  { %v1076_v4 = vpop.f32.mrf.mxu0 }
 0x193   :  { %1160 = vst [vmem:[#allocation2 + $0x118] sm:$0xff] %v1073_v42  ;;  %v1077_v56 = vadd.f32 %v1076_v4, %v10173_v23 }
 0x194   :  { %v1078_v8 = vpop.f32.mrf.mxu0 }
 0x195   :  { %1165 = vst [vmem:[#allocation2 + $0x140] sm:$0xff] %v1077_v56  ;;  %v1079_v7 = vadd.f32 %v1078_v8, %v10189_v30 }
 0x196   :  { %v1080_v50 = vpop.f32.mrf.mxu0 }
 0x197   :  { %1166 = vst [vmem:[#allocation2 + $0x148] sm:$0xff] %v1079_v7  ;;  %v1081_v63 = vadd.f32 %v1080_v50, %v10173_v23 }
 0x198   :  { %v1082_v40 = vpop.f32.mrf.mxu0 }
 0x199   :  { %1171 = vst [vmem:[#allocation2 + $0x170] sm:$0xff] %v1081_v63  ;;  %v1083_v32 = vadd.f32 %v1082_v40, %v10189_v30 }
 0x19a   :  { %v1086_v16 = vpop.f32.mrf.mxu0 }
 0x19b   :  { %1172 = vst [vmem:[#allocation2 + $0x178] sm:$0xff] %v1083_v32  ;;  %v1087_v58 = vadd.f32 %v1086_v16, %v10173_v23 }
 0x19c   :  { %v1088_v3 = vpop.f32.mrf.mxu0 }
 0x19d   :  { %1177 = vst [vmem:[#allocation2 + $0x1a0] sm:$0xff] %v1087_v58  ;;  %v1089_v49 = vadd.f32 %v1088_v3, %v10189_v30 }
 0x19e   :  { %v1090_v42 = vpop.f32.mrf.mxu0 }
 0x19f   :  { %1178 = vst [vmem:[#allocation2 + $0x1a8] sm:$0xff] %v1089_v49  ;;  %v1091_v4 = vadd.f32 %v1090_v42, %v10173_v23 }
 0x1a0   :  { %v1092_v56 = vpop.f32.mrf.mxu0 }
 0x1a1   :  { %1183 = vst [vmem:[#allocation2 + $0x1d0] sm:$0xff] %v1091_v4  ;;  %v1093_v8 = vadd.f32 %v1092_v56, %v10189_v30 }
 0x1a2   :  { %v1096_v7 = vpop.f32.mrf.mxu0 }
 0x1a3   :  { %1184 = vst [vmem:[#allocation2 + $0x1d8] sm:$0xff] %v1093_v8  ;;  %v1097_v50 = vadd.f32 %v1096_v7, %v10173_v23 }
 0x1a4   :  { %v1098_v63 = vpop.f32.mrf.mxu0 }
 0x1a5   :  { %1189 = vst [vmem:[#allocation2 + $0x200] sm:$0xff] %v1097_v50  ;;  %v1099_v40 = vadd.f32 %v1098_v63, %v10189_v30  ;;  %v1221_v50 = vld [vmem:[%s11430_s5] sm:$0x3f]  ;;  %s1224_s5 = sshra.s32 %s10241_s25, 3  ;;  %s8266_s25 = smul.u32 48, %s4486_s4 }
 0x1a6   :  { %v1100_v32 = vpop.f32.mrf.mxu0  ;;  %s7866_s28 = smul.u32 48, %s1224_s5 }
 0x1a7   :  { %1190 = vst [vmem:[#allocation2 + $0x208] sm:$0xff] %v1099_v40  ;;  %v1101_v16 = vadd.f32 %v1100_v32, %v10173_v23  ;;  %v9783_v32 = vmov 1966171168   ;;  %s4492_s27 = sadd.s32 %s8266_s25, %s4489_s26 }
 0x1a8   :  { %v1102_v58 = vpop.f32.mrf.mxu0  ;;  %s1230_s30 = sadd.s32 %s7866_s28, %s1227_s29  ;;  %s4493_s5 = scalar_lea.vmem [#allocation2], %s4492_s27 }
 0x1a9   :  { %1195 = vst [vmem:[#allocation2 + $0x230] sm:$0xff] %v1101_v16  ;;  %v1103_v3 = vadd.f32 %v1102_v58, %v10189_v30  ;;  %v1982_v16 = vunpack.c.l.s4 %v9783_v32  ;;  %s1231_s8 = scalar_lea.vmem [#allocation2], %s1230_s30  ;;  %s8365_s28 = sld [smem:[#allocation4 + $0x5]] }
 0x1aa   :  { %v1106_v49 = vpop.f32.mrf.mxu0 }
 0x1ab   :  { %1196 = vst [vmem:[#allocation2 + $0x238] sm:$0xff] %v1103_v3  ;;  %v1107_v42 = vadd.f32 %v1106_v49, %v10173_v23  ;;  %v10249_v3 = vrot.slane %v1221_v50, %v9921_v29  ;;  %v10252_v49 = vrot.slane %v1221_v50, %v9911_v19 }
 0x1ac   :  { %v1108_v4 = vpop.f32.mrf.mxu0 }
 0x1ad   :  { %1201 = vst [vmem:[#allocation2 + $0x260] sm:$0xff] %v1107_v42  ;;  %v1109_v56 = vadd.f32 %v1108_v4, %v10189_v30  ;;  %11532 = vst [vmem:[#allocation32_spill] sm:$0xff] %v10249_v3  ;;  %v1892_v32 = vadd.f32 %v10220_v47, %v10252_v49 }
 0x1ae   :  { %v1110_v8 = vpop.f32.mrf.mxu0  ;;  %11533 = vst [vmem:[#allocation33_spill] sm:$0xff] %v10252_v49 }
 0x1af   :  { %1202 = vst [vmem:[#allocation2 + $0x268] sm:$0xff] %v1109_v56  ;;  %v1111_v7 = vadd.f32 %v1110_v8, %v10173_v23  ;;  %v1983_v8 = vunpack.c.0.s8 %v1982_v16  ;;  %v11536_v16 = vsub.s32 3, %v9907_v10  ;;  %s5293_s29 = sshra.s32 %s8365_s28, 3 }
 0x1b0   :  { %v1112_v63 = vpop.f32.mrf.mxu0  ;;  %s8366_s30 = smul.u32 48, %s5293_s29 }
 0x1b1   :  { %1207 = vst [vmem:[#allocation2 + $0x290] sm:$0xff] %v1111_v7  ;;  %v1113_v40 = vadd.f32 %v1112_v63, %v10189_v30  ;;  %v1890_v63 = vadd.f32 %v10217_v60, %v10249_v3  ;;  %v10273_v47 = vsub.s32 %v1983_v8, %v9907_v10 }
 0x1b2   :  { %v1116_v58 = vpop.f32.mrf.mxu0 }
 0x1b3   :  { %1208 = vst [vmem:[#allocation2 + $0x298] sm:$0xff] %v1113_v40  ;;  %v1117_v42 = vadd.f32 %v1116_v58, %v10173_v23  ;;  %v11534_v40 = vsub.s32 2, %v9907_v10  ;;  %v1980_v3 = vcombine.low %v1890_v63, %v1892_v32 }
 0x1b4   :  { %v1118_v4 = vpop.f32.mrf.mxu0 }
 0x1b5   :  { %1213 = vst [vmem:[#allocation2 + $0x2c0] sm:$0xff] %v1117_v42  ;;  %v1119_v56 = vadd.f32 %v1118_v4, %v10189_v30  ;;  %v10264_v58 = vrot.slane %v1221_v50, %v11534_v40  ;;  %v10270_v4 = vrot.slane %v1221_v50, %v11536_v16 }
 0x1b6   :  { %v1120_v7 = vpop.f32.mrf.mxu0 }
 0x1b7   :  { %1214 = vst [vmem:[#allocation2 + $0x2c8] sm:$0xff] %v1119_v56  ;;  %v1121_v21 = vadd.f32 %v1120_v7, %v10173_v23  ;;  %11535 = vst [vmem:[#allocation34_spill] sm:$0xff] %v10264_v58 }
 0x1b8   :  { %v1122_v61 = vpop.f32.mrf.mxu0  ;;  %11537 = vst [vmem:[#allocation35_spill] sm:$0xff] %v10270_v4 }
 0x1b9   :  { %1219 = vst [vmem:[#allocation2 + $0x2f0] sm:$0xff] %v1121_v21  ;;  %v1123_v42 = vadd.f32 %v1122_v61, %v10189_v30  ;;  %v1987_v61 = vrot.slane %v1980_v3, %v10273_v47 }
 0x1ba   :  { %v1930_v60 = vpop.f32.mrf.mxu0 }
 0x1bb   :  { %1220 = vst [vmem:[#allocation2 + $0x2f8] sm:$0xff] %v1123_v42  ;;  %v1931_v23 = vadd.f32 %v1930_v60, %v10264_v58  ;;  %v1994_v63 = vrot.slane %v1987_v61, %v10273_v47 }
 0x1bc   :  { %v1932_v56 = vpop.f32.mrf.mxu0 }
 0x1bd   :  { %v1933_v7 = vadd.f32 %v1932_v56, %v10270_v4  ;;  %v1971_v36 = vpop.f32.mrf.mxu1 }
 0x1be   :  { %v1934_v21 = vpop.f32.mrf.mxu0 }
 0x1bf   :  { %v2008_v30 = vcombine.low %v1931_v23, %v1933_v7  ;;  %v1973_v56 = vpop.f32.mrf.mxu1 }
 0x1c0   :  { %v1935_v40 = vpop.f32.mrf.mxu0 }
 0x1c1   :  { %v2015_v8 = vrot.slane %v2008_v30, %v10273_v47  ;;  %v1975_v21 = vpop.f32.mrf.mxu1  ;;  %v11538_v40 = vsub.s32 4, %v9907_v10 }
 0x1c2   :  { %v1232_v16 = vld [vmem:[%s1231_s8] ss:$8 sm:$0xf] }
 0x1c3   :  { %v1233_v49 = vld [vmem:[%s1231_s8] ss:$8 sm:$0x30]  ;;  %v2022_v18 = vrot.slane %v2015_v8, %v10273_v47  ;;  %v1976_v23 = vpop.f32.mrf.mxu1  ;;  %v10283_v4 = vrot.slane %v1221_v50, %v11538_v40  ;;  %s5296_s8 = sand.u32 7, %s8365_s28 }
 0x1c4   :  { %v1234_v32 = vor.u32 %v1233_v49, %v1232_v16  ;;  %v11539_v49 = vsub.s32 5, %v9907_v10  ;;  %s5299_s0 = sadd.s32 %s8366_s30, %s5296_s8 }
 0x1c5   :  { %s5300_s9 = scalar_lea.vmem [#allocation2], %s5299_s0 }
 0x1c6   :  { %v1996_v42 = vadd.f32 %v1994_v63, %v1234_v32  ;;  %v2004_v58 = vrot.slane %v1234_v32, 2  ;;  %v10287_v61 = vrot.slane %v1221_v50, %v11539_v49  ;;  %v1972_v63 = vadd.f32 %v1971_v36, %v10283_v4 }
 0x1c7   :  { %v2050_v10 = vrot.slane %v1234_v32, 4 }
 0x1c8   :  { %v7963_v60 = vmul.f32 -1.442695, %v1996_v42  ;;  %v2024_v3 = vadd.f32 %v2022_v18, %v2004_v58  ;;  %v1974_v8 = vadd.f32 %v1973_v56, %v10287_v61  ;;  %v9644_v56 = vld [vmem:[%s11431_s6] sm:$0x3]  ;;  %s7965_s6 = sld [smem:[#allocation4 + $0x1]] }
 0x1ca   :  { %9564 = vpow2.f32 %v7963_v60  ;;  %v7964_v7 = vmul.f32 -1.442695, %v2024_v3  ;;  %v2033_v42 = vcombine.low %v1972_v63, %v1974_v8 }
 0x1cc   :  { %9566 = vpow2.f32 %v7964_v7  ;;  %v2040_v58 = vrot.slane %v2033_v42, %v10273_v47 }
 0x1ce   :  { %v2047_v21 = vrot.slane %v2040_v58, %v10273_v47  ;;  %v10310_v58 = vld [vmem:[#allocation11 + $0x160] ss:$24 sps:$4 sm:$0xff]   ;;  %s2065_s10 = sshra.s32 %s7965_s6, 3  ;;  %s2068_s12 = sand.u32 7, %s7965_s6 }
 0x1cf   :  { %s7966_s11 = smul.u32 48, %s2065_s10  ;;  %s8465_s6 = sld [smem:[#allocation4 + $0x6]] }
 0x1d1   :  { %s2071_s13 = sadd.s32 %s7966_s11, %s2068_s12 }
 0x1d2   :  { %s2072_s14 = scalar_lea.vmem [#allocation2], %s2071_s13 }
 0x1d5   :  { %s6100_s10 = sshra.s32 %s8465_s6, 3  ;;  %s6103_s12 = sand.u32 7, %s8465_s6 }
 0x1d6   :  { %s8466_s11 = smul.u32 48, %s6100_s10 }
 0x1d7   :  { %v9565_v30 = vpop.eup %9564 }
 0x1d8   :  { %v2000_v16 = vadd.f32 1.0, %v9565_v30  ;;  %s6106_s13 = sadd.s32 %s8466_s11, %s6103_s12 }
 0x1d9   :  { %v9567_v18 = vpop.eup %9566 }
 0x1da   :  { %9568 = vrcp.f32 %v2000_v16  ;;  %v2028_v60 = vadd.f32 1.0, %v9567_v18  ;;  %v11540_v16 = vlaneseq }
 0x1dc   :  { %9570 = vrcp.f32 %v2028_v60  ;;  %vm10297_vm0 = vcmp.lt.s32.totalorder %v11540_v16, 256  ;;  %v11544_v16 = vld [vmem:[#allocation20_spill] sm:$0xff] }
 0x1e7   :  { %v9569_v3 = vpop.eup %9568 }
 0x1e8   :  { %v2049_v23 = vmul.f32 %v9569_v3, %v2047_v21  ;;  %v10314_v21 = vld [vmem:[#allocation11 + $0x134] ss:$24 sps:$4 sm:$0xff]   ;;  %v10319_v3 = vld [vmem:[#allocation11 + $0x130] ss:$24 sps:$4 sm:$0xff]  }
 0x1e9   :  { %v9571_v7 = vpop.eup %9570 }
 0x1ea   :  { %v2052_v50 = vadd.f32 %v2050_v10, %v2049_v23  ;;  %v2054_v40 = vsub.f32 1.0, %v9571_v7  ;;  %v2056_v30 = vmul.f32 %v9644_v56, %v9571_v7  ;;  %v10322_v23 = vld [vmem:[#allocation11 + $0x104] ss:$24 sps:$4 sm:$0xff]   ;;  %v9645_v10 = vld [vmem:[#allocation11 + $0x150] ss:$24 sps:$4 sm:$0xff]  }
 0x1eb   :  { %v10329_v7 = vld [vmem:[#allocation11 + $0xd4] ss:$24 sps:$4 sm:$0xff]   ;;  %v9653_v56 = vld [vmem:[#allocation11 + $0xc8] ss:$24 sps:$4 sm:$0xff]  }
 0x1ec   :  { %9572 = vtanh.f32 %v2052_v50  ;;  %v10326_v50 = vld [vmem:[#allocation11 + $0x100] ss:$24 sps:$4 sm:$0xff]  }
 0x1f9   :  { %v9573_v49 = vpop.eup %9572 }
 0x1fa   :  { %v2055_v36 = vmul.f32 %v9573_v49, %v2054_v40  ;;  %v10334_v40 = vld [vmem:[#allocation11 + $0xd0] ss:$24 sps:$4 sm:$0xff]   ;;  %v10337_v49 = vld [vmem:[#allocation11 + $0xa4] ss:$24 sps:$4 sm:$0xff]  }
 0x1fc   :  { %v10301_v8 = vadd.f32 %v2056_v30, %v2055_v36  ;;  %v9650_v36 = vld [vmem:[#allocation11 + $0xfc] ss:$24 sps:$4 sm:$0xff]  }
 0x1fd   :  { %v9654_v30 = vld [vmem:[#allocation11 + $0x9c] ss:$24 sps:$4 sm:$0xff]  }
 0x1fe   :  { %2062 = vst.msk [vmem:[#allocation13] ss:$8 sm:$0x3] %vm10297_vm0, %v10301_v8  ;;  %v2084_v32 = vrot.slane %v10301_v8, %v9911_v19  ;;  %v2080_v42 = vrot.slane %v10301_v8, %v9921_v29 }
 0x200   :  { %v2088_v18 = vpack.c.bf16 %v2084_v32, %v2084_v32  ;;  %v10312_v60 = vpack.c.bf16 %v2080_v42, %v2080_v42  ;;  %v11554_v32 = vld [vmem:[#allocation30_spill] sm:$0xff]  ;;  %v11555_v42 = vld [vmem:[#allocation31_spill] sm:$0xff] }
 0x202   :  { %2697 = vmatprep.mubr.bf16.mxu0 %v2088_v18  ;;  %2738 = vmatprep.mubr.bf16.mxu1 %v2088_v18 }
 0x203   :  { %2698 = vmatmul.mubr.bf16.vlgmr.msra.gmra.mxu0 %v10312_v60  ;;  %2739 = vmatmul.mubr.bf16.vlgmr.msra.gmra.mxu1 %v10312_v60 }
 0x204   :  { %2748 = vmatpush1.bf16.msra.mxu0 %v10310_v58  ;;  %2779 = vmatprep.mubr.bf16.mxu0 %v2088_v18 }
 0x205   :  { %2749 = vmatprep.subr.bf16.mxu0 %v10314_v21  ;;  %3473 = vmatpush1.bf16.msra.mxu1 %v9645_v10 }
 0x206   :  { %3474 = vmatprep.subr.bf16.mxu1 %v9975_v59  ;;  %v10342_v59 = vld [vmem:[#allocation11 + $0xa0] ss:$24 sps:$4 sm:$0xff]  }
 0x208   :  { %2750 = vmatpush1.bf16.msra.mxu0 %v10319_v3 }
 0x209   :  { %2751 = vmatprep.subr.bf16.mxu0 %v10322_v23  ;;  %3475 = vmatpush1.bf16.msra.mxu1 %v9982_v17  ;;  %v10345_v17 = vld [vmem:[#allocation11 + $0x74] ss:$24 sps:$4 sm:$0xff]  }
 0x20a   :  { %3476 = vmatprep.subr.bf16.mxu1 %v9989_v31  ;;  %v10350_v31 = vld [vmem:[#allocation11 + $0x70] ss:$24 sps:$4 sm:$0xff]  }
 0x20c   :  { %2752 = vmatpush1.bf16.msra.mxu0 %v10326_v50 }
 0x20d   :  { %2753 = vmatprep.subr.bf16.mxu0 %v10329_v7  ;;  %3477 = vmatpush1.bf16.msra.mxu1 %v9992_v14  ;;  %v10353_v14 = vld [vmem:[#allocation11 + $0x44] ss:$24 sps:$4 sm:$0xff]  }
 0x20e   :  { %3478 = vmatprep.subr.bf16.mxu1 %v9999_v24  ;;  %v10358_v24 = vld [vmem:[#allocation11 + $0x40] ss:$24 sps:$4 sm:$0xff]  }
 0x210   :  { %2754 = vmatpush1.bf16.msra.mxu0 %v10334_v40 }
 0x211   :  { %2755 = vmatprep.subr.bf16.mxu0 %v10337_v49  ;;  %3479 = vmatpush1.bf16.msra.mxu1 %v10002_v48  ;;  %v10361_v48 = vld [vmem:[#allocation11 + $0x14] ss:$24 sps:$4 sm:$0xff]  }
 0x212   :  { %3480 = vmatprep.subr.bf16.mxu1 %v10009_v62  ;;  %v10366_v62 = vld [vmem:[#allocation11 + $0x10] ss:$24 sps:$4 sm:$0xff]  }
 0x214   :  { %2756 = vmatpush1.bf16.msra.mxu0 %v10342_v59 }
 0x215   :  { %2757 = vmatprep.subr.bf16.mxu0 %v10345_v17  ;;  %3481 = vmatpush1.bf16.msra.mxu1 %v10012_v39  ;;  %v10369_v39 = vld [vmem:[#allocation11 + $0x2e4] ss:$24 sps:$4 sm:$0xff]  }
 0x216   :  { %3482 = vmatprep.subr.bf16.mxu1 %v10019_v53  ;;  %v10374_v53 = vld [vmem:[#allocation11 + $0x2e0] ss:$24 sps:$4 sm:$0xff]  }
 0x218   :  { %2758 = vmatpush1.bf16.msra.mxu0 %v10350_v31 }
 0x219   :  { %2759 = vmatprep.subr.bf16.mxu0 %v10353_v14  ;;  %3483 = vmatpush1.bf16.msra.mxu1 %v10022_v55  ;;  %v10377_v55 = vld [vmem:[#allocation11 + $0x2b4] ss:$24 sps:$4 sm:$0xff]  }
 0x21a   :  { %3484 = vmatprep.subr.bf16.mxu1 %v10035_v9  ;;  %v10382_v9 = vld [vmem:[#allocation11 + $0x2b0] ss:$24 sps:$4 sm:$0xff]  }
 0x21c   :  { %2760 = vmatpush1.bf16.msra.mxu0 %v10358_v24 }
 0x21d   :  { %2761 = vmatprep.subr.bf16.mxu0 %v10361_v48  ;;  %3485 = vmatpush1.bf16.msra.mxu1 %v10038_v13  ;;  %v10385_v13 = vld [vmem:[#allocation11 + $0x284] ss:$24 sps:$4 sm:$0xff]  }
 0x21e   :  { %3486 = vmatprep.subr.bf16.mxu1 %v10051_v25  ;;  %v10390_v25 = vld [vmem:[#allocation11 + $0x280] ss:$24 sps:$4 sm:$0xff]  }
 0x220   :  { %2762 = vmatpush1.bf16.msra.mxu0 %v10366_v62 }
 0x221   :  { %2763 = vmatprep.subr.bf16.mxu0 %v10369_v39  ;;  %3487 = vmatpush1.bf16.msra.mxu1 %v10054_v26  ;;  %v10393_v26 = vld [vmem:[#allocation11 + $0x254] ss:$24 sps:$4 sm:$0xff]  }
 0x222   :  { %3488 = vmatprep.subr.bf16.mxu1 %v10067_v41  ;;  %v10398_v41 = vld [vmem:[#allocation11 + $0x250] ss:$24 sps:$4 sm:$0xff]  }
 0x224   :  { %2764 = vmatpush2.bf16.msra.mxu0 %v10374_v53 }
 0x225   :  { %2765 = vmatprep.subr.bf16.mxu0 %v10377_v55  ;;  %3489 = vmatpush2.bf16.msra.mxu1 %v10070_v45  ;;  %v10401_v45 = vld [vmem:[#allocation11 + $0x224] ss:$24 sps:$4 sm:$0xff]  }
 0x226   :  { %3490 = vmatprep.subr.bf16.mxu1 %v10083_v2  ;;  %v10406_v2 = vld [vmem:[#allocation11 + $0x220] ss:$24 sps:$4 sm:$0xff]  }
 0x228   :  { %2766 = vmatpush2.bf16.msra.mxu0 %v10382_v9 }
 0x229   :  { %2767 = vmatprep.subr.bf16.mxu0 %v10385_v13  ;;  %3491 = vmatpush2.bf16.msra.mxu1 %v10086_v6  ;;  %v10409_v6 = vld [vmem:[#allocation11 + $0x1f4] ss:$24 sps:$4 sm:$0xff]  }
 0x22a   :  { %3492 = vmatprep.subr.bf16.mxu1 %v10099_v33  ;;  %v10414_v33 = vld [vmem:[#allocation11 + $0x1f0] ss:$24 sps:$4 sm:$0xff]  }
 0x22c   :  { %2768 = vmatpush2.bf16.msra.mxu0 %v10390_v25 }
 0x22d   :  { %2769 = vmatprep.subr.bf16.mxu0 %v10393_v26  ;;  %3493 = vmatpush2.bf16.msra.mxu1 %v10102_v34  ;;  %v10417_v34 = vld [vmem:[#allocation11 + $0x1c4] ss:$24 sps:$4 sm:$0xff]  }
 0x22e   :  { %3494 = vmatprep.subr.bf16.mxu1 %v10117_v54  ;;  %v10422_v54 = vld [vmem:[#allocation11 + $0x1c0] ss:$24 sps:$4 sm:$0xff]  }
 0x230   :  { %2770 = vmatpush2.bf16.msra.mxu0 %v10398_v41 }
 0x231   :  { %2771 = vmatprep.subr.bf16.mxu0 %v10401_v45  ;;  %3495 = vmatpush2.bf16.msra.mxu1 %v10115_v11  ;;  %v10425_v11 = vld [vmem:[#allocation11 + $0x194] ss:$24 sps:$4 sm:$0xff]  }
 0x232   :  { %3496 = vmatprep.subr.bf16.mxu1 %v10124_v12  ;;  %v10430_v12 = vld [vmem:[#allocation11 + $0x190] ss:$24 sps:$4 sm:$0xff]  }
 0x234   :  { %2772 = vmatpush2.bf16.msra.mxu0 %v10406_v2 }
 0x235   :  { %2773 = vmatprep.subr.bf16.mxu0 %v10409_v6  ;;  %3497 = vmatpush2.bf16.msra.mxu1 %v10133_v52  ;;  %v9646_v52 = vld [vmem:[#allocation11 + $0x15c] ss:$24 sps:$4 sm:$0xff]  }
 0x236   :  { %3498 = vmatprep.subr.bf16.mxu1 %v10140_v43  ;;  %v9647_v43 = vld [vmem:[#allocation11 + $0x158] ss:$24 sps:$4 sm:$0xff]  }
 0x238   :  { %2774 = vmatpush2.bf16.msra.mxu0 %v10414_v33 }
 0x239   :  { %2775 = vmatprep.subr.bf16.mxu0 %v10417_v34  ;;  %3499 = vmatpush2.bf16.msra.mxu1 %v10149_v22  ;;  %v9648_v22 = vld [vmem:[#allocation11 + $0x12c] ss:$24 sps:$4 sm:$0xff]  }
 0x23a   :  { %3500 = vmatprep.subr.bf16.mxu1 %v10157_v44  ;;  %v9649_v44 = vld [vmem:[#allocation11 + $0x128] ss:$24 sps:$4 sm:$0xff]  }
 0x23c   :  { %2776 = vmatpush2.bf16.msra.mxu0 %v10422_v54 }
 0x23d   :  { %2777 = vmatprep.subr.bf16.mxu0 %v10425_v11  ;;  %3501 = vmatpush2.bf16.msra.mxu1 %v10167_v20  ;;  %v9651_v20 = vld [vmem:[#allocation11 + $0xf8] ss:$24 sps:$4 sm:$0xff]  }
 0x23e   :  { %3502 = vmatprep.subr.bf16.mxu1 %v10179_v1  ;;  %v9652_v1 = vld [vmem:[#allocation11 + $0xcc] ss:$24 sps:$4 sm:$0xff]  }
 0x240   :  { %2778 = vmatpush2.bf16.msra.mxu0 %v10430_v12 }
 0x241   :  { %3513 = vmatprep.subr.bf16.mxu0 %v9646_v52  ;;  %3503 = vmatpush2.bf16.msra.mxu1 %v10193_v37  ;;  %v9655_v37 = vld [vmem:[#allocation11 + $0x98] ss:$24 sps:$4 sm:$0xff]  }
 0x242   :  { %3554 = vmatprep.subr.bf16.mxu1 %v10207_v5  ;;  %v11543_v5 = vld [vmem:[#allocation19_spill] sm:$0xff] }
 0x243   :  { %2780 = vmatmul.mubr.bf16.vlgmr.msra.gmra.mxu0 %v10312_v60 }
 0x244   :  { %3514 = vmatpush1.bf16.msra.mxu0 %v9647_v43 }
 0x245   :  { %3515 = vmatprep.subr.bf16.mxu0 %v9648_v22 }
 0x248   :  { %3516 = vmatpush1.bf16.msra.mxu0 %v9649_v44 }
 0x249   :  { %3517 = vmatprep.subr.bf16.mxu0 %v9650_v36 }
 0x24c   :  { %3518 = vmatpush1.bf16.msra.mxu0 %v9651_v20  ;;  %v11556_v20 = vld [vmem:[#allocation33_spill] sm:$0xff] }
 0x24d   :  { %3519 = vmatprep.subr.bf16.mxu0 %v9652_v1 }
 0x250   :  { %3520 = vmatpush1.bf16.msra.mxu0 %v9653_v56  ;;  %v11557_v56 = vld [vmem:[#allocation32_spill] sm:$0xff] }
 0x251   :  { %3521 = vmatprep.subr.bf16.mxu0 %v9654_v30 }
 0x254   :  { %3522 = vmatpush1.bf16.msra.mxu0 %v9655_v37 }
 0x255   :  { %3523 = vmatprep.subr.bf16.mxu0 %v10024_v57  ;;  %v11545_v57 = vld [vmem:[#allocation21_spill] sm:$0xff] }
 0x258   :  { %3524 = vmatpush1.bf16.msra.mxu0 %v10028_v0  ;;  %v11546_v0 = vld [vmem:[#allocation23_spill] sm:$0xff] }
 0x259   :  { %3525 = vmatprep.subr.bf16.mxu0 %v10040_v15  ;;  %v11547_v15 = vld [vmem:[#allocation22_spill] sm:$0xff] }
 0x25c   :  { %3526 = vmatpush1.bf16.msra.mxu0 %v10044_v38  ;;  %v11548_v38 = vld [vmem:[#allocation24_spill] sm:$0xff] }
 0x25d   :  { %3527 = vmatprep.subr.bf16.mxu0 %v10056_v28  ;;  %v11549_v28 = vld [vmem:[#allocation25_spill] sm:$0xff] }
 0x260   :  { %3528 = vmatpush1.bf16.msra.mxu0 %v10060_v35  ;;  %v11550_v35 = vld [vmem:[#allocation26_spill] sm:$0xff] }
 0x261   :  { %3529 = vmatprep.subr.bf16.mxu0 %v10072_v46  ;;  %v11551_v46 = vld [vmem:[#allocation27_spill] sm:$0xff] }
 0x264   :  { %3530 = vmatpush2.bf16.msra.mxu0 %v10076_v51  ;;  %v11552_v51 = vld [vmem:[#allocation28_spill] sm:$0xff] }
 0x265   :  { %3531 = vmatprep.subr.bf16.mxu0 %v10088_v27  ;;  %v11553_v27 = vld [vmem:[#allocation29_spill] sm:$0xff] }
 0x268   :  { %3532 = vmatpush2.bf16.msra.mxu0 %v11543_v5 }
 0x269   :  { %3533 = vmatprep.subr.bf16.mxu0 %v11544_v16  ;;  %v2073_v16 = vld [vmem:[%s2072_s14] ss:$8 sm:$0xf] }
 0x26c   :  { %3534 = vmatpush2.bf16.msra.mxu0 %v11545_v57  ;;  %v2074_v57 = vld [vmem:[%s2072_s14] ss:$8 sm:$0x30]  ;;  %s6107_s14 = scalar_lea.vmem [#allocation2], %s6106_s13 }
 0x26d   :  { %3535 = vmatprep.subr.bf16.mxu0 %v11546_v0 }
 0x270   :  { %3536 = vmatpush2.bf16.msra.mxu0 %v11547_v15  ;;  %v2075_v15 = vor.u32 %v2074_v57, %v2073_v16 }
 0x271   :  { %3537 = vmatprep.subr.bf16.mxu0 %v11548_v38  ;;  %v11558_v38 = vld [vmem:[#allocation35_spill] sm:$0xff] }
 0x274   :  { %3538 = vmatpush2.bf16.msra.mxu0 %v11549_v28 }
 0x275   :  { %3539 = vmatprep.subr.bf16.mxu0 %v11550_v35  ;;  %v11559_v35 = vld [vmem:[#allocation34_spill] sm:$0xff] }
 0x278   :  { %3540 = vmatpush2.bf16.msra.mxu0 %v11551_v46 }
 0x279   :  { %3541 = vmatprep.subr.bf16.mxu0 %v11552_v51 }
 0x27c   :  { %3542 = vmatpush2.bf16.msra.mxu0 %v11553_v27 }
 0x27d   :  { %3543 = vmatprep.subr.bf16.mxu0 %v11554_v32 }
 0x280   :  { %3544 = vmatpush2.bf16.msra.mxu0 %v11555_v42 }
 0x2c3   :  { %v2699_v18 = vpop.f32.mrf.mxu0  ;;  %v2740_v60 = vpop.f32.mrf.mxu1 }
 0x2c4   :  { %v2700_v30 = vadd.f32 %v2699_v18, %v11557_v56  ;;  %v2741_v46 = vadd.f32 %v2740_v60, %v11559_v35 }
 0x2c5   :  { %v2701_v10 = vpop.f32.mrf.mxu0  ;;  %v2742_v52 = vpop.f32.mrf.mxu1 }
 0x2c6   :  { %v2702_v1 = vadd.f32 %v2701_v10, %v11556_v20  ;;  %v2743_v28 = vadd.f32 %v2742_v52, %v11558_v38  ;;  %v2814_v10 = vrot.slane %v2075_v15, 2 }
 0x2c7   :  { %v2703_v43 = vpop.f32.mrf.mxu0  ;;  %v2744_v22 = vpop.f32.mrf.mxu1 }
 0x2c8   :  { %v2790_v37 = vcombine.low %v2700_v30, %v2702_v1  ;;  %v2818_v27 = vcombine.low %v2741_v46, %v2743_v28 }
 0x2c9   :  { %v2704_v44 = vpop.f32.mrf.mxu0  ;;  %v2745_v36 = vpop.f32.mrf.mxu1 }
 0x2ca   :  { %v2797_v5 = vrot.slane %v2790_v37, %v10273_v47  ;;  %v2825_v42 = vrot.slane %v2818_v27, %v10273_v47 }
 0x2cc   :  { %v2804_v0 = vrot.slane %v2797_v5, %v10273_v47  ;;  %v2832_v18 = vrot.slane %v2825_v42, %v10273_v47 }
 0x2ce   :  { %v2806_v51 = vadd.f32 %v2804_v0, %v2075_v15  ;;  %v2834_v43 = vadd.f32 %v2832_v18, %v2814_v10 }
 0x2d0   :  { %v8063_v32 = vmul.f32 -1.442695, %v2806_v51  ;;  %v8064_v22 = vmul.f32 -1.442695, %v2834_v43 }
 0x2d2   :  { %9574 = vpow2.f32 %v8063_v32  ;;  %v2860_v32 = vrot.slane %v2075_v15, 4 }
 0x2d3   :  { %9576 = vpow2.f32 %v8064_v22 }
 0x2df   :  { %v9575_v44 = vpop.eup %9574 }
 0x2e0   :  { %v2810_v36 = vadd.f32 1.0, %v9575_v44  ;;  %v9577_v37 = vpop.eup %9576 }
 0x2e1   :  { %v2838_v0 = vadd.f32 1.0, %v9577_v37  ;;  %v10612_v37 = vld [vmem:[#allocation11 + $0x2d0] ss:$24 sps:$4 sm:$0xff]  }
 0x2e2   :  { %9578 = vrcp.f32 %v2810_v36 }
 0x2e3   :  { %9580 = vrcp.f32 %v2838_v0  ;;  %v10624_v0 = vld [vmem:[#allocation11 + $0x2a0] ss:$24 sps:$4 sm:$0xff]  }
 0x2ef   :  { %v9579_v51 = vpop.eup %9578 }
 0x2f0   :  { %v9581_v18 = vpop.eup %9580 }
 0x2f1   :  { %v2864_v10 = vsub.f32 1.0, %v9581_v18  ;;  %v2866_v44 = vmul.f32 %v9581_v18, %v10301_v8  ;;  %v10514_v8 = vld [vmem:[#allocation11 + $0x150] ss:$24 sps:$4 sm:$0xff]   ;;  %v10646_v18 = vld [vmem:[#allocation11 + $0x240] ss:$24 sps:$4 sm:$0xff]  }
 0x303   :  { %v2781_v1 = vpop.f32.mrf.mxu0 }
 0x304   :  { %v2782_v52 = vadd.f32 %v2781_v1, %v10283_v4 }
 0x305   :  { %v2783_v30 = vpop.f32.mrf.mxu0 }
 0x306   :  { %v2784_v60 = vadd.f32 %v2783_v30, %v10287_v61 }
 0x307   :  { %v2785_v5 = vpop.f32.mrf.mxu0 }
 0x308   :  { %v2843_v16 = vcombine.low %v2782_v52, %v2784_v60  ;;  %v10610_v60 = vld [vmem:[#allocation11 + $0x2d4] ss:$24 sps:$4 sm:$0xff]  }
 0x309   :  { %v2786_v57 = vpop.f32.mrf.mxu0  ;;  %v10614_v5 = vld [vmem:[#allocation11 + $0x2dc] ss:$24 sps:$4 sm:$0xff]  }
 0x30a   :  { %v2850_v28 = vrot.slane %v2843_v16, %v10273_v47  ;;  %11572 = vst [vmem:[#allocation31_spill] sm:$0xff] %v10614_v5  ;;  %v10617_v16 = vld [vmem:[#allocation11 + $0x2d8] ss:$24 sps:$4 sm:$0xff]   ;;  %v10622_v57 = vld [vmem:[#allocation11 + $0x2a4] ss:$24 sps:$4 sm:$0xff]  }
 0x30b   :  { %11573 = vst [vmem:[#allocation35_spill] sm:$0xff] %v10617_v16 }
 0x30c   :  { %v2857_v46 = vrot.slane %v2850_v28, %v10273_v47  ;;  %v10626_v28 = vld [vmem:[#allocation11 + $0x2ac] ss:$24 sps:$4 sm:$0xff]  }
 0x30d   :  { %11574 = vst [vmem:[#allocation34_spill] sm:$0xff] %v10626_v28 }
 0x30e   :  { %v2859_v27 = vmul.f32 %v9579_v51, %v2857_v46  ;;  %v10629_v46 = vld [vmem:[#allocation11 + $0x2a8] ss:$24 sps:$4 sm:$0xff]   ;;  %v10634_v51 = vld [vmem:[#allocation11 + $0x274] ss:$24 sps:$4 sm:$0xff]  }
 0x30f   :  { %11575 = vst [vmem:[#allocation36_spill] sm:$0xff] %v10629_v46 }
 0x310   :  { %v2862_v42 = vadd.f32 %v2860_v32, %v2859_v27  ;;  %v10636_v27 = vld [vmem:[#allocation11 + $0x270] ss:$24 sps:$4 sm:$0xff]   ;;  %v10638_v32 = vld [vmem:[#allocation11 + $0x27c] ss:$24 sps:$4 sm:$0xff]  }
 0x311   :  { %11576 = vst [vmem:[#allocation37_spill] sm:$0xff] %v10638_v32 }
 0x312   :  { %9582 = vtanh.f32 %v2862_v42  ;;  %v10641_v42 = vld [vmem:[#allocation11 + $0x278] ss:$24 sps:$4 sm:$0xff]  }
 0x313   :  { %11577 = vst [vmem:[#allocation38_spill] sm:$0xff] %v10641_v42 }
 0x31f   :  { %v9583_v43 = vpop.eup %9582 }
 0x320   :  { %v2865_v22 = vmul.f32 %v9583_v43, %v2864_v10  ;;  %v10648_v10 = vld [vmem:[#allocation11 + $0x244] ss:$24 sps:$4 sm:$0xff]   ;;  %v10650_v43 = vld [vmem:[#allocation11 + $0x248] ss:$24 sps:$4 sm:$0xff]  }
 0x321   :  { %11578 = vst [vmem:[#allocation39_spill] sm:$0xff] %v10650_v43 }
 0x322   :  { %v10474_v36 = vadd.f32 %v2866_v44, %v2865_v22  ;;  %v10652_v22 = vld [vmem:[#allocation11 + $0x24c] ss:$24 sps:$4 sm:$0xff]  }
 0x323   :  { %11579 = vst [vmem:[#allocation40_spill] sm:$0xff] %v10652_v22  ;;  %v10654_v44 = vld [vmem:[#allocation11 + $0x214] ss:$24 sps:$4 sm:$0xff]  }
 0x324   :  { %2869 = vst.msk [vmem:[#allocation13 + $0x1] ss:$8 sm:$0x3] %vm10297_vm0, %v10474_v36  ;;  %v2891_v1 = vrot.slane %v10474_v36, %v9911_v19  ;;  %v2887_v15 = vrot.slane %v10474_v36, %v9921_v29 }
 0x326   :  { %v2895_v30 = vpack.c.bf16 %v2891_v1, %v2891_v1  ;;  %v2894_v52 = vpack.c.bf16 %v2887_v15, %v2887_v15  ;;  %v10657_v1 = vld [vmem:[#allocation11 + $0x21c] ss:$24 sps:$4 sm:$0xff]   ;;  %v10661_v15 = vld [vmem:[#allocation11 + $0x210] ss:$24 sps:$4 sm:$0xff]  }
 0x327   :  { %11580 = vst [vmem:[#allocation41_spill] sm:$0xff] %v10657_v1 }
 0x328   :  { %3504 = vmatprep.mubr.bf16.mxu1 %v2895_v30  ;;  %3545 = vmatprep.mubr.bf16.mxu0 %v2895_v30 }
 0x329   :  { %3505 = vmatmul.mubr.bf16.vlgmr.msra.gmra.mxu1 %v2894_v52  ;;  %3546 = vmatmul.mubr.bf16.vlgmr.msra.gmra.mxu0 %v2894_v52 }
 0x32a   :  { %3555 = vmatpush1.bf16.msra.mxu1 %v10310_v58  ;;  %3586 = vmatprep.mubr.bf16.mxu1 %v2895_v30  ;;  %v10516_v58 = vld [vmem:[#allocation11 + $0x154] ss:$24 sps:$4 sm:$0xff]   ;;  %v10665_v30 = vld [vmem:[#allocation11 + $0x218] ss:$24 sps:$4 sm:$0xff]  }
 0x32b   :  { %3556 = vmatprep.subr.bf16.mxu1 %v10314_v21  ;;  %v10518_v21 = vld [vmem:[#allocation11 + $0x158] ss:$24 sps:$4 sm:$0xff]   ;;  %4279 = vmatprep.subr.bf16.mxu0 %v10516_v58  ;;  %11581 = vst [vmem:[#allocation42_spill] sm:$0xff] %v10665_v30 }
 0x32c   :  { %4280 = vmatpush1.bf16.msra.mxu0 %v10514_v8 }
 0x32e   :  { %3557 = vmatpush1.bf16.msra.mxu1 %v10319_v3  ;;  %v10520_v3 = vld [vmem:[#allocation11 + $0x15c] ss:$24 sps:$4 sm:$0xff]  }
 0x32f   :  { %3558 = vmatprep.subr.bf16.mxu1 %v10322_v23  ;;  %v10522_v23 = vld [vmem:[#allocation11 + $0x124] ss:$24 sps:$4 sm:$0xff]  }
 0x330   :  { %4281 = vmatprep.subr.bf16.mxu0 %v10522_v23 }
 0x332   :  { %3559 = vmatpush1.bf16.msra.mxu1 %v10326_v50  ;;  %v10525_v50 = vld [vmem:[#allocation11 + $0x12c] ss:$24 sps:$4 sm:$0xff]  }
 0x333   :  { %3560 = vmatprep.subr.bf16.mxu1 %v10329_v7  ;;  %v10529_v7 = vld [vmem:[#allocation11 + $0x120] ss:$24 sps:$4 sm:$0xff]  }
 0x334   :  { %4282 = vmatpush1.bf16.msra.mxu0 %v10529_v7 }
 0x336   :  { %3561 = vmatpush1.bf16.msra.mxu1 %v10334_v40  ;;  %v10533_v40 = vld [vmem:[#allocation11 + $0x128] ss:$24 sps:$4 sm:$0xff]  }
 0x337   :  { %3562 = vmatprep.subr.bf16.mxu1 %v10337_v49  ;;  %v10535_v49 = vld [vmem:[#allocation11 + $0xf4] ss:$24 sps:$4 sm:$0xff]  }
 0x338   :  { %4283 = vmatprep.subr.bf16.mxu0 %v10535_v49 }
 0x33a   :  { %3563 = vmatpush1.bf16.msra.mxu1 %v10342_v59  ;;  %v10538_v59 = vld [vmem:[#allocation11 + $0xfc] ss:$24 sps:$4 sm:$0xff]  }
 0x33b   :  { %3564 = vmatprep.subr.bf16.mxu1 %v10345_v17  ;;  %11560 = vst [vmem:[#allocation19_spill] sm:$0xff] %v10538_v59  ;;  %v10541_v17 = vld [vmem:[#allocation11 + $0xf0] ss:$24 sps:$4 sm:$0xff]  }
 0x33c   :  { %4284 = vmatpush1.bf16.msra.mxu0 %v10541_v17 }
 0x33e   :  { %3565 = vmatpush1.bf16.msra.mxu1 %v10350_v31  ;;  %v10545_v31 = vld [vmem:[#allocation11 + $0xf8] ss:$24 sps:$4 sm:$0xff]  }
 0x33f   :  { %3566 = vmatprep.subr.bf16.mxu1 %v10353_v14  ;;  %11561 = vst [vmem:[#allocation20_spill] sm:$0xff] %v10545_v31  ;;  %v10547_v14 = vld [vmem:[#allocation11 + $0xc4] ss:$24 sps:$4 sm:$0xff]  }
 0x340   :  { %4285 = vmatprep.subr.bf16.mxu0 %v10547_v14 }
 0x342   :  { %3567 = vmatpush1.bf16.msra.mxu1 %v10358_v24  ;;  %v10550_v24 = vld [vmem:[#allocation11 + $0xcc] ss:$24 sps:$4 sm:$0xff]  }
 0x343   :  { %3568 = vmatprep.subr.bf16.mxu1 %v10361_v48  ;;  %11562 = vst [vmem:[#allocation21_spill] sm:$0xff] %v10550_v24  ;;  %v10553_v48 = vld [vmem:[#allocation11 + $0xc0] ss:$24 sps:$4 sm:$0xff]  }
 0x344   :  { %4286 = vmatpush1.bf16.msra.mxu0 %v10553_v48 }
 0x346   :  { %3569 = vmatpush1.bf16.msra.mxu1 %v10366_v62  ;;  %v10557_v62 = vld [vmem:[#allocation11 + $0xc8] ss:$24 sps:$4 sm:$0xff]  }
 0x347   :  { %3570 = vmatprep.subr.bf16.mxu1 %v10369_v39  ;;  %11563 = vst [vmem:[#allocation23_spill] sm:$0xff] %v10557_v62  ;;  %v10559_v39 = vld [vmem:[#allocation11 + $0x94] ss:$24 sps:$4 sm:$0xff]  }
 0x348   :  { %4287 = vmatprep.subr.bf16.mxu0 %v10559_v39 }
 0x34a   :  { %3571 = vmatpush2.bf16.msra.mxu1 %v10374_v53  ;;  %v10562_v53 = vld [vmem:[#allocation11 + $0x9c] ss:$24 sps:$4 sm:$0xff]  }
 0x34b   :  { %3572 = vmatprep.subr.bf16.mxu1 %v10377_v55  ;;  %11564 = vst [vmem:[#allocation22_spill] sm:$0xff] %v10562_v53  ;;  %v10565_v55 = vld [vmem:[#allocation11 + $0x90] ss:$24 sps:$4 sm:$0xff]  }
 0x34c   :  { %4288 = vmatpush1.bf16.msra.mxu0 %v10565_v55 }
 0x34e   :  { %3573 = vmatpush2.bf16.msra.mxu1 %v10382_v9  ;;  %v10569_v9 = vld [vmem:[#allocation11 + $0x98] ss:$24 sps:$4 sm:$0xff]  }
 0x34f   :  { %3574 = vmatprep.subr.bf16.mxu1 %v10385_v13  ;;  %11565 = vst [vmem:[#allocation24_spill] sm:$0xff] %v10569_v9  ;;  %v10571_v13 = vld [vmem:[#allocation11 + $0x64] ss:$24 sps:$4 sm:$0xff]  }
 0x350   :  { %4289 = vmatprep.subr.bf16.mxu0 %v10571_v13 }
 0x352   :  { %3575 = vmatpush2.bf16.msra.mxu1 %v10390_v25  ;;  %v10574_v25 = vld [vmem:[#allocation11 + $0x6c] ss:$24 sps:$4 sm:$0xff]  }
 0x353   :  { %3576 = vmatprep.subr.bf16.mxu1 %v10393_v26  ;;  %11566 = vst [vmem:[#allocation25_spill] sm:$0xff] %v10574_v25  ;;  %v10577_v26 = vld [vmem:[#allocation11 + $0x60] ss:$24 sps:$4 sm:$0xff]  }
 0x354   :  { %4290 = vmatpush1.bf16.msra.mxu0 %v10577_v26 }
 0x356   :  { %3577 = vmatpush2.bf16.msra.mxu1 %v10398_v41  ;;  %v10581_v41 = vld [vmem:[#allocation11 + $0x68] ss:$24 sps:$4 sm:$0xff]  }
 0x357   :  { %3578 = vmatprep.subr.bf16.mxu1 %v10401_v45  ;;  %11567 = vst [vmem:[#allocation26_spill] sm:$0xff] %v10581_v41  ;;  %v10583_v45 = vld [vmem:[#allocation11 + $0x34] ss:$24 sps:$4 sm:$0xff]  }
 0x358   :  { %4291 = vmatprep.subr.bf16.mxu0 %v10583_v45 }
 0x35a   :  { %3579 = vmatpush2.bf16.msra.mxu1 %v10406_v2  ;;  %v10586_v2 = vld [vmem:[#allocation11 + $0x3c] ss:$24 sps:$4 sm:$0xff]  }
 0x35b   :  { %3580 = vmatprep.subr.bf16.mxu1 %v10409_v6  ;;  %11568 = vst [vmem:[#allocation27_spill] sm:$0xff] %v10586_v2  ;;  %v10589_v6 = vld [vmem:[#allocation11 + $0x30] ss:$24 sps:$4 sm:$0xff]  }
 0x35c   :  { %4292 = vmatpush1.bf16.msra.mxu0 %v10589_v6 }
 0x35e   :  { %3581 = vmatpush2.bf16.msra.mxu1 %v10414_v33  ;;  %v10593_v33 = vld [vmem:[#allocation11 + $0x38] ss:$24 sps:$4 sm:$0xff]  }
 0x35f   :  { %3582 = vmatprep.subr.bf16.mxu1 %v10417_v34  ;;  %11569 = vst [vmem:[#allocation28_spill] sm:$0xff] %v10593_v33  ;;  %v10598_v34 = vld [vmem:[#allocation11 + $0x4] ss:$24 sps:$4 sm:$0xff]  }
 0x360   :  { %4293 = vmatprep.subr.bf16.mxu0 %v10598_v34 }
 0x362   :  { %3583 = vmatpush2.bf16.msra.mxu1 %v10422_v54  ;;  %v10600_v54 = vld [vmem:[#allocation11] ss:$24 sps:$4 sm:$0xff]  }
 0x363   :  { %3584 = vmatprep.subr.bf16.mxu1 %v10425_v11  ;;  %v10602_v11 = vld [vmem:[#allocation11 + $0xc] ss:$24 sps:$4 sm:$0xff]   ;;  %4294 = vmatpush1.bf16.msra.mxu0 %v10600_v54 }
 0x364   :  { %11570 = vst [vmem:[#allocation29_spill] sm:$0xff] %v10602_v11  ;;  %4295 = vmatprep.subr.bf16.mxu0 %v10610_v60 }
 0x366   :  { %3585 = vmatpush2.bf16.msra.mxu1 %v10430_v12  ;;  %v10605_v12 = vld [vmem:[#allocation11 + $0x8] ss:$24 sps:$4 sm:$0xff]  }
 0x367   :  { %4320 = vmatprep.subr.bf16.mxu1 %v10520_v3  ;;  %11571 = vst [vmem:[#allocation30_spill] sm:$0xff] %v10605_v12  ;;  %4296 = vmatpush2.bf16.msra.mxu0 %v10612_v37 }
 0x368   :  { %4297 = vmatprep.subr.bf16.mxu0 %v10622_v57 }
 0x369   :  { %3587 = vmatmul.mubr.bf16.vlgmr.msra.gmra.mxu1 %v2894_v52  ;;  %v10667_v52 = vld [vmem:[#allocation11 + $0x1e4] ss:$24 sps:$4 sm:$0xff]  }
 0x36a   :  { %4321 = vmatpush1.bf16.msra.mxu1 %v10518_v21 }
 0x36b   :  { %4322 = vmatprep.subr.bf16.mxu1 %v10525_v50  ;;  %4298 = vmatpush2.bf16.msra.mxu0 %v10624_v0 }
 0x36c   :  { %4299 = vmatprep.subr.bf16.mxu0 %v10634_v51 }
 0x36e   :  { %4323 = vmatpush1.bf16.msra.mxu1 %v10533_v40 }
 0x36f   :  { %4324 = vmatprep.subr.bf16.mxu1 %v10538_v59  ;;  %4300 = vmatpush2.bf16.msra.mxu0 %v10636_v27 }
 0x370   :  { %4301 = vmatprep.subr.bf16.mxu0 %v10648_v10 }
 0x372   :  { %4325 = vmatpush1.bf16.msra.mxu1 %v10545_v31 }
 0x373   :  { %4326 = vmatprep.subr.bf16.mxu1 %v10550_v24  ;;  %4302 = vmatpush2.bf16.msra.mxu0 %v10646_v18 }
 0x374   :  { %4303 = vmatprep.subr.bf16.mxu0 %v10654_v44 }
 0x376   :  { %4327 = vmatpush1.bf16.msra.mxu1 %v10557_v62  ;;  %v2881_v62 = vld [vmem:[%s2879_s2] ss:$8 sm:$0x30] }
 0x377   :  { %4328 = vmatprep.subr.bf16.mxu1 %v10562_v53  ;;  %4304 = vmatpush2.bf16.msra.mxu0 %v10661_v15  ;;  %v2880_v53 = vld [vmem:[%s2879_s2] ss:$8 sm:$0xf]  ;;  %s6914_s2 = scalar_lea.vmem [#allocation2], %s6913_s19 }
 0x378   :  { %4305 = vmatprep.subr.bf16.mxu0 %v10667_v52 }
 0x37a   :  { %4329 = vmatpush1.bf16.msra.mxu1 %v10569_v9 }
 0x37b   :  { %4330 = vmatprep.subr.bf16.mxu1 %v10574_v25 }
 0x37e   :  { %4331 = vmatpush1.bf16.msra.mxu1 %v10581_v41 }
 0x37f   :  { %4332 = vmatprep.subr.bf16.mxu1 %v10586_v2 }
 0x382   :  { %4333 = vmatpush1.bf16.msra.mxu1 %v10593_v33 }
 0x383   :  { %4334 = vmatprep.subr.bf16.mxu1 %v10602_v11 }
 0x386   :  { %4335 = vmatpush1.bf16.msra.mxu1 %v10605_v12 }
 0x387   :  { %4336 = vmatprep.subr.bf16.mxu1 %v10614_v5  ;;  %v10701_v5 = vld [vmem:[#allocation11 + $0x188] ss:$24 sps:$4 sm:$0xff]  }
 0x388   :  { %11587 = vst [vmem:[#allocation48_spill] sm:$0xff] %v10701_v5 }
 0x38a   :  { %4337 = vmatpush2.bf16.msra.mxu1 %v10617_v16  ;;  %v10694_v16 = vld [vmem:[#allocation11 + $0x18c] ss:$24 sps:$4 sm:$0xff]  }
 0x38b   :  { %4338 = vmatprep.subr.bf16.mxu1 %v10626_v28  ;;  %v10689_v28 = vld [vmem:[#allocation11 + $0x1b8] ss:$24 sps:$4 sm:$0xff]   ;;  %11586 = vst [vmem:[#allocation47_spill] sm:$0xff] %v10694_v16 }
 0x38c   :  { %11585 = vst [vmem:[#allocation46_spill] sm:$0xff] %v10689_v28 }
 0x38e   :  { %4339 = vmatpush2.bf16.msra.mxu1 %v10629_v46  ;;  %v10682_v46 = vld [vmem:[#allocation11 + $0x1bc] ss:$24 sps:$4 sm:$0xff]  }
 0x38f   :  { %4340 = vmatprep.subr.bf16.mxu1 %v10638_v32  ;;  %v10673_v32 = vld [vmem:[#allocation11 + $0x1e0] ss:$24 sps:$4 sm:$0xff]   ;;  %11584 = vst [vmem:[#allocation45_spill] sm:$0xff] %v10682_v46 }
 0x390   :  { %4306 = vmatpush2.bf16.msra.mxu0 %v10673_v32 }
 0x392   :  { %4341 = vmatpush2.bf16.msra.mxu1 %v10641_v42  ;;  %v10670_v42 = vld [vmem:[#allocation11 + $0x1ec] ss:$24 sps:$4 sm:$0xff]  }
 0x393   :  { %4342 = vmatprep.subr.bf16.mxu1 %v10652_v22  ;;  %11582 = vst [vmem:[#allocation43_spill] sm:$0xff] %v10670_v42  ;;  %v10677_v22 = vld [vmem:[#allocation11 + $0x1e8] ss:$24 sps:$4 sm:$0xff]  }
 0x394   :  { %11583 = vst [vmem:[#allocation44_spill] sm:$0xff] %v10677_v22 }
 0x396   :  { %4343 = vmatpush2.bf16.msra.mxu1 %v10650_v43  ;;  %v10679_v43 = vld [vmem:[#allocation11 + $0x1b4] ss:$24 sps:$4 sm:$0xff]  }
 0x397   :  { %4344 = vmatprep.subr.bf16.mxu1 %v10657_v1  ;;  %v10685_v1 = vld [vmem:[#allocation11 + $0x1b0] ss:$24 sps:$4 sm:$0xff]   ;;  %4307 = vmatprep.subr.bf16.mxu0 %v10679_v43 }
 0x398   :  { %4308 = vmatpush2.bf16.msra.mxu0 %v10685_v1 }
 0x39a   :  { %4345 = vmatpush2.bf16.msra.mxu1 %v10665_v30  ;;  %v10691_v30 = vld [vmem:[#allocation11 + $0x184] ss:$24 sps:$4 sm:$0xff]  }
 0x39b   :  { %4346 = vmatprep.subr.bf16.mxu1 %v10670_v42  ;;  %v10697_v42 = vld [vmem:[#allocation11 + $0x180] ss:$24 sps:$4 sm:$0xff]   ;;  %4309 = vmatprep.subr.bf16.mxu0 %v10691_v30 }
 0x39c   :  { %4310 = vmatpush2.bf16.msra.mxu0 %v10697_v42 }
 0x39e   :  { %4347 = vmatpush2.bf16.msra.mxu1 %v10677_v22  ;;  %v10706_v22 = vld [vmem:[#allocation11 + $0x164] ss:$24 sps:$4 sm:$0xff]  }
 0x39f   :  { %4348 = vmatprep.subr.bf16.mxu1 %v10682_v46  ;;  %4361 = vmatprep.subr.bf16.mxu0 %v10706_v22 }
 0x3a2   :  { %4349 = vmatpush2.bf16.msra.mxu1 %v10689_v28 }
 0x3a3   :  { %4350 = vmatprep.subr.bf16.mxu1 %v10694_v16 }
 0x3a6   :  { %4351 = vmatpush2.bf16.msra.mxu1 %v10701_v5 }
 0x3a7   :  { %5086 = vmatprep.subr.bf16.mxu1 %v10516_v58 }
 0x3e9   :  { %v3506_v46 = vpop.f32.mrf.mxu1  ;;  %v3547_v12 = vpop.f32.mrf.mxu0 }
 0x3ea   :  { %v3507_v5 = vadd.f32 %v3506_v46, %v11557_v56 }
 0x3eb   :  { %v3508_v11 = vpop.f32.mrf.mxu1  ;;  %v3549_v28 = vpop.f32.mrf.mxu0 }
 0x3ec   :  { %v3509_v16 = vadd.f32 %v3508_v11, %v11556_v20 }
 0x3ed   :  { %v3510_v33 = vpop.f32.mrf.mxu1  ;;  %v3551_v2 = vpop.f32.mrf.mxu0 }
 0x3ee   :  { %v3597_v9 = vcombine.low %v3507_v5, %v3509_v16  ;;  %v2882_v2 = vor.u32 %v2881_v62, %v2880_v53 }
 0x3ef   :  { %v3511_v41 = vpop.f32.mrf.mxu1  ;;  %v3552_v25 = vpop.f32.mrf.mxu0 }
 0x3f0   :  { %v3604_v58 = vrot.slane %v3597_v9, %v10273_v47  ;;  %v3550_v25 = vadd.f32 %v3549_v28, %v11558_v38  ;;  %v3548_v41 = vadd.f32 %v3547_v12, %v11559_v35  ;;  %v3621_v16 = vrot.slane %v2882_v2, 2 }
 0x3f2   :  { %v3611_v33 = vrot.slane %v3604_v58, %v10273_v47  ;;  %v3625_v11 = vcombine.low %v3548_v41, %v3550_v25 }
 0x3f4   :  { %v3613_v24 = vadd.f32 %v3611_v33, %v2882_v2  ;;  %v3632_v46 = vrot.slane %v3625_v11, %v10273_v47 }
 0x3f6   :  { %v8163_v20 = vmul.f32 -1.442695, %v3613_v24  ;;  %v3639_v5 = vrot.slane %v3632_v46, %v10273_v47 }
 0x3f8   :  { %9584 = vpow2.f32 %v8163_v20  ;;  %v3641_v9 = vadd.f32 %v3639_v5, %v3621_v16 }
 0x3fa   :  { %v8164_v56 = vmul.f32 -1.442695, %v3641_v9 }
 0x3fc   :  { %9586 = vpow2.f32 %v8164_v56 }
 0x405   :  { %v9585_v31 = vpop.eup %9584 }
 0x406   :  { %v3617_v59 = vadd.f32 1.0, %v9585_v31  ;;  %v3667_v31 = vrot.slane %v2882_v2, 4 }
 0x408   :  { %9588 = vrcp.f32 %v3617_v59 }
 0x409   :  { %v9587_v58 = vpop.eup %9586 }
 0x40a   :  { %v3645_v20 = vadd.f32 1.0, %v9587_v58  ;;  %v10732_v58 = vld [vmem:[#allocation11 + $0x160] ss:$24 sps:$4 sm:$0xff]  }
 0x40c   :  { %9590 = vrcp.f32 %v3645_v20  ;;  %v10744_v20 = vld [vmem:[#allocation11 + $0x104] ss:$24 sps:$4 sm:$0xff]  }
 0x415   :  { %v9589_v46 = vpop.eup %9588 }
 0x419   :  { %v9591_v5 = vpop.eup %9590 }
 0x41a   :  { %v3671_v16 = vsub.f32 1.0, %v9591_v5 }
 0x429   :  { %v3588_v62 = vpop.f32.mrf.mxu1 }
 0x42a   :  { %v3589_v28 = vadd.f32 %v3588_v62, %v10283_v4 }
 0x42b   :  { %v3590_v53 = vpop.f32.mrf.mxu1 }
 0x42c   :  { %v3591_v12 = vadd.f32 %v3590_v53, %v10287_v61  ;;  %v3673_v53 = vmul.f32 %v9591_v5, %v10474_v36  ;;  %v10741_v36 = vld [vmem:[#allocation11 + $0x130] ss:$24 sps:$4 sm:$0xff]   ;;  %v11603_v5 = vld [vmem:[#allocation36_spill] sm:$0xff] }
 0x42d   :  { %v3592_v24 = vpop.f32.mrf.mxu1 }
 0x42e   :  { %v3650_v33 = vcombine.low %v3589_v28, %v3591_v12 }
 0x42f   :  { %v3593_v25 = vpop.f32.mrf.mxu1 }
 0x430   :  { %v3657_v41 = vrot.slane %v3650_v33, %v10273_v47  ;;  %v10736_v25 = vld [vmem:[#allocation11 + $0x134] ss:$24 sps:$4 sm:$0xff]  }
 0x432   :  { %v3664_v11 = vrot.slane %v3657_v41, %v10273_v47  ;;  %v10749_v41 = vld [vmem:[#allocation11 + $0x100] ss:$24 sps:$4 sm:$0xff]  }
 0x434   :  { %v3666_v56 = vmul.f32 %v9589_v46, %v3664_v11  ;;  %v10752_v11 = vld [vmem:[#allocation11 + $0xd4] ss:$24 sps:$4 sm:$0xff]   ;;  %v10757_v46 = vld [vmem:[#allocation11 + $0xd0] ss:$24 sps:$4 sm:$0xff]  }
 0x436   :  { %v3669_v59 = vadd.f32 %v3667_v31, %v3666_v56  ;;  %v11600_v56 = vld [vmem:[#allocation31_spill] sm:$0xff] }
 0x437   :  { %v11601_v31 = vld [vmem:[#allocation35_spill] sm:$0xff] }
 0x438   :  { %9592 = vtanh.f32 %v3669_v59  ;;  %v11602_v59 = vld [vmem:[#allocation34_spill] sm:$0xff] }
 0x445   :  { %v9593_v9 = vpop.eup %9592 }
 0x446   :  { %v3672_v62 = vmul.f32 %v9593_v9, %v3671_v16  ;;  %v11604_v16 = vld [vmem:[#allocation37_spill] sm:$0xff]  ;;  %v11605_v9 = vld [vmem:[#allocation38_spill] sm:$0xff] }
 0x448   :  { %v10723_v24 = vadd.f32 %v3673_v53, %v3672_v62  ;;  %v11606_v62 = vld [vmem:[#allocation40_spill] sm:$0xff]  ;;  %v11607_v53 = vld [vmem:[#allocation39_spill] sm:$0xff] }
 0x44a   :  { %3676 = vst.msk [vmem:[#allocation13 + $0x2] ss:$8 sm:$0x3] %vm10297_vm0, %v10723_v24  ;;  %v3698_v28 = vrot.slane %v10723_v24, %v9911_v19  ;;  %v3694_v2 = vrot.slane %v10723_v24, %v9921_v29 }
 0x44c   :  { %v3702_v12 = vpack.c.bf16 %v3698_v28, %v3698_v28  ;;  %v10734_v33 = vpack.c.bf16 %v3694_v2, %v3694_v2  ;;  %v11608_v28 = vld [vmem:[#allocation41_spill] sm:$0xff]  ;;  %v11609_v2 = vld [vmem:[#allocation42_spill] sm:$0xff] }
 0x44e   :  { %4311 = vmatprep.mubr.bf16.mxu0 %v3702_v12  ;;  %4352 = vmatprep.mubr.bf16.mxu1 %v3702_v12 }
 0x44f   :  { %4312 = vmatmul.mubr.bf16.vlgmr.msra.gmra.mxu0 %v10734_v33  ;;  %4353 = vmatmul.mubr.bf16.vlgmr.msra.gmra.mxu1 %v10734_v33 }
 0x450   :  { %4362 = vmatpush1.bf16.msra.mxu0 %v10732_v58  ;;  %4393 = vmatprep.mubr.bf16.mxu0 %v3702_v12  ;;  %v11610_v12 = vld [vmem:[#allocation43_spill] sm:$0xff] }
 0x451   :  { %4363 = vmatprep.subr.bf16.mxu0 %v10736_v25  ;;  %5087 = vmatpush1.bf16.msra.mxu1 %v10514_v8  ;;  %v10760_v8 = vld [vmem:[#allocation11 + $0xa4] ss:$24 sps:$4 sm:$0xff]  }
 0x452   :  { %5088 = vmatprep.subr.bf16.mxu1 %v10522_v23  ;;  %v10765_v23 = vld [vmem:[#allocation11 + $0xa0] ss:$24 sps:$4 sm:$0xff]  }
 0x454   :  { %4364 = vmatpush1.bf16.msra.mxu0 %v10741_v36 }
 0x455   :  { %4365 = vmatprep.subr.bf16.mxu0 %v10744_v20  ;;  %5089 = vmatpush1.bf16.msra.mxu1 %v10529_v7  ;;  %v10768_v7 = vld [vmem:[#allocation11 + $0x74] ss:$24 sps:$4 sm:$0xff]  }
 0x456   :  { %5090 = vmatprep.subr.bf16.mxu1 %v10535_v49  ;;  %v10773_v49 = vld [vmem:[#allocation11 + $0x70] ss:$24 sps:$4 sm:$0xff]  }
 0x458   :  { %4366 = vmatpush1.bf16.msra.mxu0 %v10749_v41 }
 0x459   :  { %4367 = vmatprep.subr.bf16.mxu0 %v10752_v11  ;;  %5091 = vmatpush1.bf16.msra.mxu1 %v10541_v17  ;;  %v10776_v17 = vld [vmem:[#allocation11 + $0x44] ss:$24 sps:$4 sm:$0xff]  }
 0x45a   :  { %5092 = vmatprep.subr.bf16.mxu1 %v10547_v14  ;;  %v10781_v14 = vld [vmem:[#allocation11 + $0x40] ss:$24 sps:$4 sm:$0xff]  }
 0x45c   :  { %4368 = vmatpush1.bf16.msra.mxu0 %v10757_v46 }
 0x45d   :  { %4369 = vmatprep.subr.bf16.mxu0 %v10760_v8  ;;  %5093 = vmatpush1.bf16.msra.mxu1 %v10553_v48  ;;  %v10784_v48 = vld [vmem:[#allocation11 + $0x14] ss:$24 sps:$4 sm:$0xff]  }
 0x45e   :  { %5094 = vmatprep.subr.bf16.mxu1 %v10559_v39  ;;  %v10789_v39 = vld [vmem:[#allocation11 + $0x10] ss:$24 sps:$4 sm:$0xff]  }
 0x460   :  { %4370 = vmatpush1.bf16.msra.mxu0 %v10765_v23 }
 0x461   :  { %4371 = vmatprep.subr.bf16.mxu0 %v10768_v7  ;;  %5095 = vmatpush1.bf16.msra.mxu1 %v10565_v55  ;;  %v10792_v55 = vld [vmem:[#allocation11 + $0x2e4] ss:$24 sps:$4 sm:$0xff]  }
 0x462   :  { %5096 = vmatprep.subr.bf16.mxu1 %v10571_v13  ;;  %v10797_v13 = vld [vmem:[#allocation11 + $0x2e0] ss:$24 sps:$4 sm:$0xff]  }
 0x464   :  { %4372 = vmatpush1.bf16.msra.mxu0 %v10773_v49 }
 0x465   :  { %4373 = vmatprep.subr.bf16.mxu0 %v10776_v17  ;;  %5097 = vmatpush1.bf16.msra.mxu1 %v10577_v26  ;;  %v10800_v26 = vld [vmem:[#allocation11 + $0x2b4] ss:$24 sps:$4 sm:$0xff]  }
 0x466   :  { %5098 = vmatprep.subr.bf16.mxu1 %v10583_v45  ;;  %v10805_v45 = vld [vmem:[#allocation11 + $0x2b0] ss:$24 sps:$4 sm:$0xff]  }
 0x468   :  { %4374 = vmatpush1.bf16.msra.mxu0 %v10781_v14 }
 0x469   :  { %4375 = vmatprep.subr.bf16.mxu0 %v10784_v48  ;;  %5099 = vmatpush1.bf16.msra.mxu1 %v10589_v6  ;;  %v10808_v6 = vld [vmem:[#allocation11 + $0x284] ss:$24 sps:$4 sm:$0xff]  }
 0x46a   :  { %5100 = vmatprep.subr.bf16.mxu1 %v10598_v34  ;;  %v10813_v34 = vld [vmem:[#allocation11 + $0x280] ss:$24 sps:$4 sm:$0xff]  }
 0x46c   :  { %4376 = vmatpush1.bf16.msra.mxu0 %v10789_v39 }
 0x46d   :  { %4377 = vmatprep.subr.bf16.mxu0 %v10792_v55  ;;  %5101 = vmatpush1.bf16.msra.mxu1 %v10600_v54  ;;  %v10816_v54 = vld [vmem:[#allocation11 + $0x254] ss:$24 sps:$4 sm:$0xff]  }
 0x46e   :  { %5102 = vmatprep.subr.bf16.mxu1 %v10610_v60  ;;  %v10821_v60 = vld [vmem:[#allocation11 + $0x250] ss:$24 sps:$4 sm:$0xff]  }
 0x470   :  { %4378 = vmatpush2.bf16.msra.mxu0 %v10797_v13 }
 0x471   :  { %4379 = vmatprep.subr.bf16.mxu0 %v10800_v26  ;;  %5103 = vmatpush2.bf16.msra.mxu1 %v10612_v37  ;;  %v10824_v37 = vld [vmem:[#allocation11 + $0x224] ss:$24 sps:$4 sm:$0xff]  }
 0x472   :  { %5104 = vmatprep.subr.bf16.mxu1 %v10622_v57  ;;  %v10829_v57 = vld [vmem:[#allocation11 + $0x220] ss:$24 sps:$4 sm:$0xff]  }
 0x474   :  { %4380 = vmatpush2.bf16.msra.mxu0 %v10805_v45 }
 0x475   :  { %4381 = vmatprep.subr.bf16.mxu0 %v10808_v6  ;;  %5105 = vmatpush2.bf16.msra.mxu1 %v10624_v0  ;;  %v10832_v0 = vld [vmem:[#allocation11 + $0x1f4] ss:$24 sps:$4 sm:$0xff]  }
 0x476   :  { %5106 = vmatprep.subr.bf16.mxu1 %v10634_v51  ;;  %v10837_v51 = vld [vmem:[#allocation11 + $0x1f0] ss:$24 sps:$4 sm:$0xff]  }
 0x478   :  { %4382 = vmatpush2.bf16.msra.mxu0 %v10813_v34 }
 0x479   :  { %4383 = vmatprep.subr.bf16.mxu0 %v10816_v54  ;;  %5107 = vmatpush2.bf16.msra.mxu1 %v10636_v27  ;;  %v10840_v27 = vld [vmem:[#allocation11 + $0x1c4] ss:$24 sps:$4 sm:$0xff]  }
 0x47a   :  { %5108 = vmatprep.subr.bf16.mxu1 %v10648_v10  ;;  %v10845_v10 = vld [vmem:[#allocation11 + $0x1c0] ss:$24 sps:$4 sm:$0xff]  }
 0x47c   :  { %4384 = vmatpush2.bf16.msra.mxu0 %v10821_v60 }
 0x47d   :  { %4385 = vmatprep.subr.bf16.mxu0 %v10824_v37  ;;  %5109 = vmatpush2.bf16.msra.mxu1 %v10646_v18  ;;  %v10848_v18 = vld [vmem:[#allocation11 + $0x194] ss:$24 sps:$4 sm:$0xff]  }
 0x47e   :  { %5110 = vmatprep.subr.bf16.mxu1 %v10654_v44  ;;  %v10853_v44 = vld [vmem:[#allocation11 + $0x190] ss:$24 sps:$4 sm:$0xff]  }
 0x480   :  { %4386 = vmatpush2.bf16.msra.mxu0 %v10829_v57 }
 0x481   :  { %4387 = vmatprep.subr.bf16.mxu0 %v10832_v0  ;;  %5111 = vmatpush2.bf16.msra.mxu1 %v10661_v15  ;;  %v11591_v15 = vld [vmem:[#allocation23_spill] sm:$0xff] }
 0x482   :  { %5112 = vmatprep.subr.bf16.mxu1 %v10667_v52  ;;  %v11599_v52 = vld [vmem:[#allocation30_spill] sm:$0xff] }
 0x484   :  { %4388 = vmatpush2.bf16.msra.mxu0 %v10837_v51 }
 0x485   :  { %4389 = vmatprep.subr.bf16.mxu0 %v10840_v27  ;;  %5113 = vmatpush2.bf16.msra.mxu1 %v10673_v32  ;;  %v11588_v32 = vld [vmem:[#allocation19_spill] sm:$0xff] }
 0x486   :  { %5114 = vmatprep.subr.bf16.mxu1 %v10679_v43  ;;  %v11589_v43 = vld [vmem:[#allocation20_spill] sm:$0xff] }
 0x488   :  { %4390 = vmatpush2.bf16.msra.mxu0 %v10845_v10 }
 0x489   :  { %4391 = vmatprep.subr.bf16.mxu0 %v10848_v18  ;;  %5115 = vmatpush2.bf16.msra.mxu1 %v10685_v1  ;;  %v11590_v1 = vld [vmem:[#allocation21_spill] sm:$0xff] }
 0x48a   :  { %5116 = vmatprep.subr.bf16.mxu1 %v10691_v30  ;;  %v11595_v30 = vld [vmem:[#allocation26_spill] sm:$0xff] }
 0x48c   :  { %4392 = vmatpush2.bf16.msra.mxu0 %v10853_v44 }
 0x48d   :  { %5127 = vmatprep.subr.bf16.mxu0 %v10520_v3  ;;  %5117 = vmatpush2.bf16.msra.mxu1 %v10697_v42  ;;  %v11592_v3 = vld [vmem:[#allocation22_spill] sm:$0xff]  ;;  %v11593_v42 = vld [vmem:[#allocation24_spill] sm:$0xff] }
 0x48e   :  { %5168 = vmatprep.subr.bf16.mxu1 %v10706_v22  ;;  %v11594_v22 = vld [vmem:[#allocation25_spill] sm:$0xff] }
 0x48f   :  { %4394 = vmatmul.mubr.bf16.vlgmr.msra.gmra.mxu0 %v10734_v33  ;;  %v11611_v33 = vld [vmem:[#allocation44_spill] sm:$0xff] }
 0x490   :  { %5128 = vmatpush1.bf16.msra.mxu0 %v10518_v21  ;;  %v11596_v21 = vld [vmem:[#allocation27_spill] sm:$0xff] }
 0x491   :  { %5129 = vmatprep.subr.bf16.mxu0 %v10525_v50  ;;  %v11597_v50 = vld [vmem:[#allocation28_spill] sm:$0xff] }
 0x494   :  { %5130 = vmatpush1.bf16.msra.mxu0 %v10533_v40  ;;  %v11598_v40 = vld [vmem:[#allocation29_spill] sm:$0xff] }
 0x495   :  { %5131 = vmatprep.subr.bf16.mxu0 %v11588_v32  ;;  %v11612_v32 = vld [vmem:[#allocation45_spill] sm:$0xff] }
 0x498   :  { %5132 = vmatpush1.bf16.msra.mxu0 %v11589_v43  ;;  %v11613_v43 = vld [vmem:[#allocation46_spill] sm:$0xff] }
 0x499   :  { %5133 = vmatprep.subr.bf16.mxu0 %v11590_v1  ;;  %v11614_v1 = vld [vmem:[#allocation47_spill] sm:$0xff] }
 0x49c   :  { %5134 = vmatpush1.bf16.msra.mxu0 %v11591_v15  ;;  %v11615_v15 = vld [vmem:[#allocation48_spill] sm:$0xff] }
 0x49d   :  { %5135 = vmatprep.subr.bf16.mxu0 %v11592_v3 }
 0x4a0   :  { %5136 = vmatpush1.bf16.msra.mxu0 %v11593_v42 }
 0x4a1   :  { %5137 = vmatprep.subr.bf16.mxu0 %v11594_v22 }
 0x4a4   :  { %5138 = vmatpush1.bf16.msra.mxu0 %v11595_v30 }
 0x4a5   :  { %5139 = vmatprep.subr.bf16.mxu0 %v11596_v21 }
 0x4a8   :  { %5140 = vmatpush1.bf16.msra.mxu0 %v11597_v50 }
 0x4a9   :  { %5141 = vmatprep.subr.bf16.mxu0 %v11598_v40 }
 0x4ac   :  { %5142 = vmatpush1.bf16.msra.mxu0 %v11599_v52 }
 0x4ad   :  { %5143 = vmatprep.subr.bf16.mxu0 %v11600_v56  ;;  %v11616_v56 = vld [vmem:[#allocation33_spill] sm:$0xff] }
 0x4b0   :  { %5144 = vmatpush2.bf16.msra.mxu0 %v11601_v31 }
 0x4b1   :  { %5145 = vmatprep.subr.bf16.mxu0 %v11602_v59  ;;  %v11617_v59 = vld [vmem:[#allocation32_spill] sm:$0xff] }
 0x4b4   :  { %5146 = vmatpush2.bf16.msra.mxu0 %v11603_v5 }
 0x4b5   :  { %5147 = vmatprep.subr.bf16.mxu0 %v11604_v16 }
 0x4b8   :  { %5148 = vmatpush2.bf16.msra.mxu0 %v11605_v9 }
 0x4b9   :  { %5149 = vmatprep.subr.bf16.mxu0 %v11606_v62  ;;  %v3687_v62 = vld [vmem:[%s3686_s24] ss:$8 sm:$0xf] }
 0x4bc   :  { %5150 = vmatpush2.bf16.msra.mxu0 %v11607_v53  ;;  %v3688_v53 = vld [vmem:[%s3686_s24] ss:$8 sm:$0x30] }
 0x4bd   :  { %5151 = vmatprep.subr.bf16.mxu0 %v11608_v28 }
 0x4c0   :  { %5152 = vmatpush2.bf16.msra.mxu0 %v11609_v2  ;;  %v3689_v2 = vor.u32 %v3688_v53, %v3687_v62 }
 0x4c1   :  { %5153 = vmatprep.subr.bf16.mxu0 %v11610_v12 }
 0x4c4   :  { %5154 = vmatpush2.bf16.msra.mxu0 %v11611_v33 }
 0x4c5   :  { %5155 = vmatprep.subr.bf16.mxu0 %v11612_v32 }
 0x4c8   :  { %5156 = vmatpush2.bf16.msra.mxu0 %v11613_v43 }
 0x4c9   :  { %5157 = vmatprep.subr.bf16.mxu0 %v11614_v1 }
 0x4cc   :  { %5158 = vmatpush2.bf16.msra.mxu0 %v11615_v15 }
 0x50f   :  { %v4313_v3 = vpop.f32.mrf.mxu0  ;;  %v4354_v42 = vpop.f32.mrf.mxu1 }
 0x510   :  { %v4314_v5 = vadd.f32 %v4313_v3, %v11617_v59  ;;  %v4355_v33 = vadd.f32 %v4354_v42, %v11559_v35 }
 0x511   :  { %v4315_v22 = vpop.f32.mrf.mxu0  ;;  %v4356_v30 = vpop.f32.mrf.mxu1 }
 0x512   :  { %v4316_v31 = vadd.f32 %v4315_v22, %v11616_v56  ;;  %v4357_v12 = vadd.f32 %v4356_v30, %v11558_v38  ;;  %v4428_v22 = vrot.slane %v3689_v2, 2 }
 0x513   :  { %v4317_v21 = vpop.f32.mrf.mxu0  ;;  %v4358_v50 = vpop.f32.mrf.mxu1 }
 0x514   :  { %v4404_v16 = vcombine.low %v4314_v5, %v4316_v31  ;;  %v4432_v43 = vcombine.low %v4355_v33, %v4357_v12 }
 0x515   :  { %v4318_v40 = vpop.f32.mrf.mxu0  ;;  %v4359_v52 = vpop.f32.mrf.mxu1 }
 0x516   :  { %v4411_v9 = vrot.slane %v4404_v16, %v10273_v47  ;;  %v4439_v15 = vrot.slane %v4432_v43, %v10273_v47 }
 0x518   :  { %v4418_v28 = vrot.slane %v4411_v9, %v10273_v47  ;;  %v4446_v3 = vrot.slane %v4439_v15, %v10273_v47 }
 0x51a   :  { %v4420_v32 = vadd.f32 %v4418_v28, %v3689_v2  ;;  %v4448_v21 = vadd.f32 %v4446_v3, %v4428_v22 }
 0x51c   :  { %v8263_v1 = vmul.f32 -1.442695, %v4420_v32  ;;  %v8264_v50 = vmul.f32 -1.442695, %v4448_v21 }
 0x51e   :  { %9594 = vpow2.f32 %v8263_v1  ;;  %v4474_v1 = vrot.slane %v3689_v2, 4 }
 0x51f   :  { %9596 = vpow2.f32 %v8264_v50 }
 0x52b   :  { %v9595_v40 = vpop.eup %9594 }
 0x52c   :  { %v4424_v52 = vadd.f32 1.0, %v9595_v40  ;;  %v9597_v16 = vpop.eup %9596 }
 0x52d   :  { %v4452_v28 = vadd.f32 1.0, %v9597_v16  ;;  %v11045_v16 = vld [vmem:[#allocation11 + $0x2d0] ss:$24 sps:$4 sm:$0xff]  }
 0x52e   :  { %9598 = vrcp.f32 %v4424_v52 }
 0x52f   :  { %9600 = vrcp.f32 %v4452_v28  ;;  %v11057_v28 = vld [vmem:[#allocation11 + $0x2a0] ss:$24 sps:$4 sm:$0xff]  }
 0x53b   :  { %v9599_v32 = vpop.eup %9598 }
 0x53c   :  { %v9601_v3 = vpop.eup %9600 }
 0x53d   :  { %v4478_v22 = vsub.f32 1.0, %v9601_v3  ;;  %v4480_v40 = vmul.f32 %v9601_v3, %v10723_v24  ;;  %v10947_v24 = vld [vmem:[#allocation11 + $0x150] ss:$24 sps:$4 sm:$0xff]   ;;  %v11076_v3 = vld [vmem:[#allocation11 + $0x244] ss:$24 sps:$4 sm:$0xff]  }
 0x54f   :  { %v4395_v31 = vpop.f32.mrf.mxu0 }
 0x550   :  { %v4396_v30 = vadd.f32 %v4395_v31, %v10283_v4 }
 0x551   :  { %v4397_v5 = vpop.f32.mrf.mxu0 }
 0x552   :  { %v4398_v42 = vadd.f32 %v4397_v5, %v10287_v61 }
 0x553   :  { %v4399_v9 = vpop.f32.mrf.mxu0 }
 0x554   :  { %v4457_v62 = vcombine.low %v4396_v30, %v4398_v42  ;;  %v11043_v42 = vld [vmem:[#allocation11 + $0x2d4] ss:$24 sps:$4 sm:$0xff]  }
 0x555   :  { %v4400_v53 = vpop.f32.mrf.mxu0  ;;  %v11047_v9 = vld [vmem:[#allocation11 + $0x2dc] ss:$24 sps:$4 sm:$0xff]  }
 0x556   :  { %v4464_v12 = vrot.slane %v4457_v62, %v10273_v47  ;;  %11630 = vst [vmem:[#allocation31_spill] sm:$0xff] %v11047_v9  ;;  %v11050_v62 = vld [vmem:[#allocation11 + $0x2d8] ss:$24 sps:$4 sm:$0xff]   ;;  %v11055_v53 = vld [vmem:[#allocation11 + $0x2a4] ss:$24 sps:$4 sm:$0xff]  }
 0x557   :  { %11631 = vst [vmem:[#allocation35_spill] sm:$0xff] %v11050_v62 }
 0x558   :  { %v4471_v33 = vrot.slane %v4464_v12, %v10273_v47  ;;  %v11059_v12 = vld [vmem:[#allocation11 + $0x2ac] ss:$24 sps:$4 sm:$0xff]  }
 0x559   :  { %11632 = vst [vmem:[#allocation34_spill] sm:$0xff] %v11059_v12 }
 0x55a   :  { %v4473_v43 = vmul.f32 %v9599_v32, %v4471_v33  ;;  %v11062_v33 = vld [vmem:[#allocation11 + $0x2a8] ss:$24 sps:$4 sm:$0xff]   ;;  %v11067_v32 = vld [vmem:[#allocation11 + $0x274] ss:$24 sps:$4 sm:$0xff]  }
 0x55b   :  { %11633 = vst [vmem:[#allocation36_spill] sm:$0xff] %v11062_v33 }
 0x55c   :  { %v4476_v15 = vadd.f32 %v4474_v1, %v4473_v43  ;;  %v11069_v43 = vld [vmem:[#allocation11 + $0x270] ss:$24 sps:$4 sm:$0xff]   ;;  %v11071_v1 = vld [vmem:[#allocation11 + $0x27c] ss:$24 sps:$4 sm:$0xff]  }
 0x55d   :  { %11634 = vst [vmem:[#allocation37_spill] sm:$0xff] %v11071_v1 }
 0x55e   :  { %9602 = vtanh.f32 %v4476_v15  ;;  %v11074_v15 = vld [vmem:[#allocation11 + $0x278] ss:$24 sps:$4 sm:$0xff]  }
 0x55f   :  { %11635 = vst [vmem:[#allocation38_spill] sm:$0xff] %v11074_v15 }
 0x56b   :  { %v9603_v21 = vpop.eup %9602 }
 0x56c   :  { %v4479_v50 = vmul.f32 %v9603_v21, %v4478_v22  ;;  %v11080_v22 = vld [vmem:[#allocation11 + $0x240] ss:$24 sps:$4 sm:$0xff]   ;;  %v11082_v21 = vld [vmem:[#allocation11 + $0x24c] ss:$24 sps:$4 sm:$0xff]  }
 0x56d   :  { %11636 = vst [vmem:[#allocation40_spill] sm:$0xff] %v11082_v21 }
 0x56e   :  { %v10907_v52 = vadd.f32 %v4480_v40, %v4479_v50  ;;  %v11086_v50 = vld [vmem:[#allocation11 + $0x248] ss:$24 sps:$4 sm:$0xff]   ;;  %v11088_v40 = vld [vmem:[#allocation11 + $0x214] ss:$24 sps:$4 sm:$0xff]  }
 0x56f   :  { %11637 = vst [vmem:[#allocation39_spill] sm:$0xff] %v11086_v50 }
 0x570   :  { %4483 = vst.msk [vmem:[#allocation13 + $0x3] ss:$8 sm:$0x3] %vm10297_vm0, %v10907_v52  ;;  %v4505_v31 = vrot.slane %v10907_v52, %v9911_v19  ;;  %v4501_v2 = vrot.slane %v10907_v52, %v9921_v29 }
 0x572   :  { %v4509_v5 = vpack.c.bf16 %v4505_v31, %v4505_v31  ;;  %v4508_v30 = vpack.c.bf16 %v4501_v2, %v4501_v2  ;;  %v11091_v31 = vld [vmem:[#allocation11 + $0x21c] ss:$24 sps:$4 sm:$0xff]   ;;  %v11094_v2 = vld [vmem:[#allocation11 + $0x210] ss:$24 sps:$4 sm:$0xff]  }
 0x573   :  { %11638 = vst [vmem:[#allocation41_spill] sm:$0xff] %v11091_v31 }
 0x574   :  { %5118 = vmatprep.mubr.bf16.mxu1 %v4509_v5  ;;  %5159 = vmatprep.mubr.bf16.mxu0 %v4509_v5 }
 0x575   :  { %5119 = vmatmul.mubr.bf16.vlgmr.msra.gmra.mxu1 %v4508_v30  ;;  %5160 = vmatmul.mubr.bf16.vlgmr.msra.gmra.mxu0 %v4508_v30 }
 0x576   :  { %5169 = vmatpush1.bf16.msra.mxu1 %v10732_v58  ;;  %5200 = vmatprep.mubr.bf16.mxu1 %v4509_v5  ;;  %v10949_v58 = vld [vmem:[#allocation11 + $0x154] ss:$24 sps:$4 sm:$0xff]   ;;  %v11098_v5 = vld [vmem:[#allocation11 + $0x218] ss:$24 sps:$4 sm:$0xff]  }
 0x577   :  { %5170 = vmatprep.subr.bf16.mxu1 %v10736_v25  ;;  %v10951_v25 = vld [vmem:[#allocation11 + $0x158] ss:$24 sps:$4 sm:$0xff]   ;;  %5893 = vmatprep.subr.bf16.mxu0 %v10949_v58  ;;  %11639 = vst [vmem:[#allocation42_spill] sm:$0xff] %v11098_v5 }
 0x578   :  { %5894 = vmatpush1.bf16.msra.mxu0 %v10947_v24 }
 0x57a   :  { %5171 = vmatpush1.bf16.msra.mxu1 %v10741_v36  ;;  %v10953_v36 = vld [vmem:[#allocation11 + $0x15c] ss:$24 sps:$4 sm:$0xff]  }
 0x57b   :  { %5172 = vmatprep.subr.bf16.mxu1 %v10744_v20  ;;  %v10955_v20 = vld [vmem:[#allocation11 + $0x124] ss:$24 sps:$4 sm:$0xff]  }
 0x57c   :  { %5895 = vmatprep.subr.bf16.mxu0 %v10955_v20 }
 0x57e   :  { %5173 = vmatpush1.bf16.msra.mxu1 %v10749_v41  ;;  %v10958_v41 = vld [vmem:[#allocation11 + $0x12c] ss:$24 sps:$4 sm:$0xff]  }
 0x57f   :  { %5174 = vmatprep.subr.bf16.mxu1 %v10752_v11  ;;  %v10962_v11 = vld [vmem:[#allocation11 + $0x120] ss:$24 sps:$4 sm:$0xff]  }
 0x580   :  { %5896 = vmatpush1.bf16.msra.mxu0 %v10962_v11 }
 0x582   :  { %5175 = vmatpush1.bf16.msra.mxu1 %v10757_v46  ;;  %v10966_v46 = vld [vmem:[#allocation11 + $0x128] ss:$24 sps:$4 sm:$0xff]  }
 0x583   :  { %5176 = vmatprep.subr.bf16.mxu1 %v10760_v8  ;;  %v10968_v8 = vld [vmem:[#allocation11 + $0xf4] ss:$24 sps:$4 sm:$0xff]  }
 0x584   :  { %5897 = vmatprep.subr.bf16.mxu0 %v10968_v8 }
 0x586   :  { %5177 = vmatpush1.bf16.msra.mxu1 %v10765_v23  ;;  %v10971_v23 = vld [vmem:[#allocation11 + $0xfc] ss:$24 sps:$4 sm:$0xff]  }
 0x587   :  { %5178 = vmatprep.subr.bf16.mxu1 %v10768_v7  ;;  %11618 = vst [vmem:[#allocation19_spill] sm:$0xff] %v10971_v23  ;;  %v10974_v7 = vld [vmem:[#allocation11 + $0xf0] ss:$24 sps:$4 sm:$0xff]  }
 0x588   :  { %5898 = vmatpush1.bf16.msra.mxu0 %v10974_v7 }
 0x58a   :  { %5179 = vmatpush1.bf16.msra.mxu1 %v10773_v49  ;;  %v10978_v49 = vld [vmem:[#allocation11 + $0xf8] ss:$24 sps:$4 sm:$0xff]  }
 0x58b   :  { %5180 = vmatprep.subr.bf16.mxu1 %v10776_v17  ;;  %11619 = vst [vmem:[#allocation20_spill] sm:$0xff] %v10978_v49  ;;  %v10980_v17 = vld [vmem:[#allocation11 + $0xc4] ss:$24 sps:$4 sm:$0xff]  }
 0x58c   :  { %5899 = vmatprep.subr.bf16.mxu0 %v10980_v17 }
 0x58e   :  { %5181 = vmatpush1.bf16.msra.mxu1 %v10781_v14  ;;  %v10983_v14 = vld [vmem:[#allocation11 + $0xcc] ss:$24 sps:$4 sm:$0xff]  }
 0x58f   :  { %5182 = vmatprep.subr.bf16.mxu1 %v10784_v48  ;;  %11620 = vst [vmem:[#allocation21_spill] sm:$0xff] %v10983_v14  ;;  %v10986_v48 = vld [vmem:[#allocation11 + $0xc0] ss:$24 sps:$4 sm:$0xff]  }
 0x590   :  { %5900 = vmatpush1.bf16.msra.mxu0 %v10986_v48 }
 0x592   :  { %5183 = vmatpush1.bf16.msra.mxu1 %v10789_v39  ;;  %v10990_v39 = vld [vmem:[#allocation11 + $0xc8] ss:$24 sps:$4 sm:$0xff]  }
 0x593   :  { %5184 = vmatprep.subr.bf16.mxu1 %v10792_v55  ;;  %11621 = vst [vmem:[#allocation23_spill] sm:$0xff] %v10990_v39  ;;  %v10992_v55 = vld [vmem:[#allocation11 + $0x94] ss:$24 sps:$4 sm:$0xff]  }
 0x594   :  { %5901 = vmatprep.subr.bf16.mxu0 %v10992_v55 }
 0x596   :  { %5185 = vmatpush2.bf16.msra.mxu1 %v10797_v13  ;;  %v10995_v13 = vld [vmem:[#allocation11 + $0x9c] ss:$24 sps:$4 sm:$0xff]  }
 0x597   :  { %5186 = vmatprep.subr.bf16.mxu1 %v10800_v26  ;;  %11622 = vst [vmem:[#allocation22_spill] sm:$0xff] %v10995_v13  ;;  %v10998_v26 = vld [vmem:[#allocation11 + $0x90] ss:$24 sps:$4 sm:$0xff]  }
 0x598   :  { %5902 = vmatpush1.bf16.msra.mxu0 %v10998_v26 }
 0x59a   :  { %5187 = vmatpush2.bf16.msra.mxu1 %v10805_v45  ;;  %v11002_v45 = vld [vmem:[#allocation11 + $0x98] ss:$24 sps:$4 sm:$0xff]  }
 0x59b   :  { %5188 = vmatprep.subr.bf16.mxu1 %v10808_v6  ;;  %11623 = vst [vmem:[#allocation24_spill] sm:$0xff] %v11002_v45  ;;  %v11004_v6 = vld [vmem:[#allocation11 + $0x64] ss:$24 sps:$4 sm:$0xff]  }
 0x59c   :  { %5903 = vmatprep.subr.bf16.mxu0 %v11004_v6 }
 0x59e   :  { %5189 = vmatpush2.bf16.msra.mxu1 %v10813_v34  ;;  %v11007_v34 = vld [vmem:[#allocation11 + $0x6c] ss:$24 sps:$4 sm:$0xff]  }
 0x59f   :  { %5190 = vmatprep.subr.bf16.mxu1 %v10816_v54  ;;  %11624 = vst [vmem:[#allocation25_spill] sm:$0xff] %v11007_v34  ;;  %v11010_v54 = vld [vmem:[#allocation11 + $0x60] ss:$24 sps:$4 sm:$0xff]  }
 0x5a0   :  { %5904 = vmatpush1.bf16.msra.mxu0 %v11010_v54 }
 0x5a2   :  { %5191 = vmatpush2.bf16.msra.mxu1 %v10821_v60  ;;  %v11014_v60 = vld [vmem:[#allocation11 + $0x68] ss:$24 sps:$4 sm:$0xff]  }
 0x5a3   :  { %5192 = vmatprep.subr.bf16.mxu1 %v10824_v37  ;;  %11625 = vst [vmem:[#allocation26_spill] sm:$0xff] %v11014_v60  ;;  %v11016_v37 = vld [vmem:[#allocation11 + $0x34] ss:$24 sps:$4 sm:$0xff]  }
 0x5a4   :  { %5905 = vmatprep.subr.bf16.mxu0 %v11016_v37 }
 0x5a6   :  { %5193 = vmatpush2.bf16.msra.mxu1 %v10829_v57  ;;  %v11019_v57 = vld [vmem:[#allocation11 + $0x3c] ss:$24 sps:$4 sm:$0xff]  }
 0x5a7   :  { %5194 = vmatprep.subr.bf16.mxu1 %v10832_v0  ;;  %11626 = vst [vmem:[#allocation27_spill] sm:$0xff] %v11019_v57  ;;  %v11022_v0 = vld [vmem:[#allocation11 + $0x30] ss:$24 sps:$4 sm:$0xff]  }
 0x5a8   :  { %5906 = vmatpush1.bf16.msra.mxu0 %v11022_v0 }
 0x5aa   :  { %5195 = vmatpush2.bf16.msra.mxu1 %v10837_v51  ;;  %v11026_v51 = vld [vmem:[#allocation11 + $0x38] ss:$24 sps:$4 sm:$0xff]  }
 0x5ab   :  { %5196 = vmatprep.subr.bf16.mxu1 %v10840_v27  ;;  %11627 = vst [vmem:[#allocation28_spill] sm:$0xff] %v11026_v51  ;;  %v11031_v27 = vld [vmem:[#allocation11] ss:$24 sps:$4 sm:$0xff]  }
 0x5ae   :  { %5197 = vmatpush2.bf16.msra.mxu1 %v10845_v10  ;;  %v11033_v10 = vld [vmem:[#allocation11 + $0x4] ss:$24 sps:$4 sm:$0xff]  }
 0x5af   :  { %5198 = vmatprep.subr.bf16.mxu1 %v10848_v18  ;;  %v11035_v18 = vld [vmem:[#allocation11 + $0xc] ss:$24 sps:$4 sm:$0xff]   ;;  %5907 = vmatprep.subr.bf16.mxu0 %v11033_v10 }
 0x5b0   :  { %11628 = vst [vmem:[#allocation29_spill] sm:$0xff] %v11035_v18  ;;  %5908 = vmatpush1.bf16.msra.mxu0 %v11031_v27 }
 0x5b1   :  { %5909 = vmatprep.subr.bf16.mxu0 %v11043_v42 }
 0x5b2   :  { %5199 = vmatpush2.bf16.msra.mxu1 %v10853_v44  ;;  %v11038_v44 = vld [vmem:[#allocation11 + $0x8] ss:$24 sps:$4 sm:$0xff]  }
 0x5b3   :  { %5934 = vmatprep.subr.bf16.mxu1 %v10953_v36  ;;  %11629 = vst [vmem:[#allocation30_spill] sm:$0xff] %v11038_v44 }
 0x5b4   :  { %5910 = vmatpush2.bf16.msra.mxu0 %v11045_v16 }
 0x5b5   :  { %5201 = vmatmul.mubr.bf16.vlgmr.msra.gmra.mxu1 %v4508_v30  ;;  %5911 = vmatprep.subr.bf16.mxu0 %v11055_v53  ;;  %v11100_v30 = vld [vmem:[#allocation11 + $0x1e4] ss:$24 sps:$4 sm:$0xff]  }
 0x5b6   :  { %5935 = vmatpush1.bf16.msra.mxu1 %v10951_v25 }
 0x5b7   :  { %5936 = vmatprep.subr.bf16.mxu1 %v10958_v41 }
 0x5b8   :  { %5912 = vmatpush2.bf16.msra.mxu0 %v11057_v28 }
 0x5b9   :  { %5913 = vmatprep.subr.bf16.mxu0 %v11067_v32 }
 0x5ba   :  { %5937 = vmatpush1.bf16.msra.mxu1 %v10966_v46 }
 0x5bb   :  { %5938 = vmatprep.subr.bf16.mxu1 %v10971_v23 }
 0x5bc   :  { %5914 = vmatpush2.bf16.msra.mxu0 %v11069_v43 }
 0x5bd   :  { %5915 = vmatprep.subr.bf16.mxu0 %v11076_v3 }
 0x5be   :  { %5939 = vmatpush1.bf16.msra.mxu1 %v10978_v49 }
 0x5bf   :  { %5940 = vmatprep.subr.bf16.mxu1 %v10983_v14 }
 0x5c0   :  { %5916 = vmatpush2.bf16.msra.mxu0 %v11080_v22 }
 0x5c1   :  { %5917 = vmatprep.subr.bf16.mxu0 %v11088_v40 }
 0x5c2   :  { %5941 = vmatpush1.bf16.msra.mxu1 %v10990_v39  ;;  %v4495_v39 = vld [vmem:[%s4493_s5] ss:$8 sm:$0x30] }
 0x5c3   :  { %5942 = vmatprep.subr.bf16.mxu1 %v10995_v13  ;;  %v4494_v13 = vld [vmem:[%s4493_s5] ss:$8 sm:$0xf] }
 0x5c4   :  { %5918 = vmatpush2.bf16.msra.mxu0 %v11094_v2 }
 0x5c5   :  { %5919 = vmatprep.subr.bf16.mxu0 %v11100_v30 }
 0x5c6   :  { %5943 = vmatpush1.bf16.msra.mxu1 %v11002_v45 }
 0x5c7   :  { %5944 = vmatprep.subr.bf16.mxu1 %v11007_v34 }
 0x5ca   :  { %5945 = vmatpush1.bf16.msra.mxu1 %v11014_v60 }
 0x5cb   :  { %5946 = vmatprep.subr.bf16.mxu1 %v11019_v57 }
 0x5ce   :  { %5947 = vmatpush1.bf16.msra.mxu1 %v11026_v51 }
 0x5cf   :  { %5948 = vmatprep.subr.bf16.mxu1 %v11035_v18 }
 0x5d2   :  { %5949 = vmatpush1.bf16.msra.mxu1 %v11038_v44 }
 0x5d3   :  { %5950 = vmatprep.subr.bf16.mxu1 %v11047_v9  ;;  %v11134_v9 = vld [vmem:[#allocation11 + $0x188] ss:$24 sps:$4 sm:$0xff]  }
 0x5d4   :  { %11645 = vst [vmem:[#allocation48_spill] sm:$0xff] %v11134_v9 }
 0x5d6   :  { %5951 = vmatpush2.bf16.msra.mxu1 %v11050_v62  ;;  %v11127_v62 = vld [vmem:[#allocation11 + $0x18c] ss:$24 sps:$4 sm:$0xff]  }
 0x5d7   :  { %5952 = vmatprep.subr.bf16.mxu1 %v11059_v12  ;;  %v11122_v12 = vld [vmem:[#allocation11 + $0x1b8] ss:$24 sps:$4 sm:$0xff]   ;;  %11644 = vst [vmem:[#allocation47_spill] sm:$0xff] %v11127_v62 }
 0x5d8   :  { %11643 = vst [vmem:[#allocation46_spill] sm:$0xff] %v11122_v12 }
 0x5da   :  { %5953 = vmatpush2.bf16.msra.mxu1 %v11062_v33  ;;  %v11115_v33 = vld [vmem:[#allocation11 + $0x1bc] ss:$24 sps:$4 sm:$0xff]  }
 0x5db   :  { %5954 = vmatprep.subr.bf16.mxu1 %v11071_v1  ;;  %v11110_v1 = vld [vmem:[#allocation11 + $0x1e8] ss:$24 sps:$4 sm:$0xff]   ;;  %11642 = vst [vmem:[#allocation45_spill] sm:$0xff] %v11115_v33 }
 0x5dc   :  { %11641 = vst [vmem:[#allocation44_spill] sm:$0xff] %v11110_v1 }
 0x5de   :  { %5955 = vmatpush2.bf16.msra.mxu1 %v11074_v15  ;;  %v11103_v15 = vld [vmem:[#allocation11 + $0x1ec] ss:$24 sps:$4 sm:$0xff]  }
 0x5df   :  { %5956 = vmatprep.subr.bf16.mxu1 %v11082_v21  ;;  %11640 = vst [vmem:[#allocation43_spill] sm:$0xff] %v11103_v15  ;;  %v11106_v21 = vld [vmem:[#allocation11 + $0x1e0] ss:$24 sps:$4 sm:$0xff]  }
 0x5e0   :  { %5920 = vmatpush2.bf16.msra.mxu0 %v11106_v21 }
 0x5e2   :  { %5957 = vmatpush2.bf16.msra.mxu1 %v11086_v50  ;;  %v11112_v50 = vld [vmem:[#allocation11 + $0x1b4] ss:$24 sps:$4 sm:$0xff]  }
 0x5e3   :  { %5958 = vmatprep.subr.bf16.mxu1 %v11091_v31  ;;  %v11118_v31 = vld [vmem:[#allocation11 + $0x1b0] ss:$24 sps:$4 sm:$0xff]   ;;  %5921 = vmatprep.subr.bf16.mxu0 %v11112_v50 }
 0x5e4   :  { %5922 = vmatpush2.bf16.msra.mxu0 %v11118_v31 }
 0x5e6   :  { %5959 = vmatpush2.bf16.msra.mxu1 %v11098_v5  ;;  %v11124_v5 = vld [vmem:[#allocation11 + $0x184] ss:$24 sps:$4 sm:$0xff]  }
 0x5e7   :  { %5960 = vmatprep.subr.bf16.mxu1 %v11103_v15  ;;  %v11130_v15 = vld [vmem:[#allocation11 + $0x180] ss:$24 sps:$4 sm:$0xff]   ;;  %5923 = vmatprep.subr.bf16.mxu0 %v11124_v5 }
 0x5e8   :  { %5924 = vmatpush2.bf16.msra.mxu0 %v11130_v15 }
 0x5ea   :  { %5961 = vmatpush2.bf16.msra.mxu1 %v11110_v1  ;;  %v11139_v1 = vld [vmem:[#allocation11 + $0x164] ss:$24 sps:$4 sm:$0xff]  }
 0x5eb   :  { %5962 = vmatprep.subr.bf16.mxu1 %v11115_v33  ;;  %5975 = vmatprep.subr.bf16.mxu0 %v11139_v1 }
 0x5ee   :  { %5963 = vmatpush2.bf16.msra.mxu1 %v11122_v12 }
 0x5ef   :  { %5964 = vmatprep.subr.bf16.mxu1 %v11127_v62 }
 0x5f2   :  { %5965 = vmatpush2.bf16.msra.mxu1 %v11134_v9 }
 0x5f3   :  { %6700 = vmatprep.subr.bf16.mxu1 %v10949_v58 }
 0x635   :  { %v5120_v33 = vpop.f32.mrf.mxu1  ;;  %v5161_v44 = vpop.f32.mrf.mxu0 }
 0x636   :  { %v5121_v9 = vadd.f32 %v5120_v33, %v11617_v59 }
 0x637   :  { %v5122_v18 = vpop.f32.mrf.mxu1  ;;  %v5163_v12 = vpop.f32.mrf.mxu0 }
 0x638   :  { %v5123_v62 = vadd.f32 %v5122_v18, %v11616_v56 }
 0x639   :  { %v5124_v51 = vpop.f32.mrf.mxu1  ;;  %v5165_v57 = vpop.f32.mrf.mxu0 }
 0x63a   :  { %v5211_v45 = vcombine.low %v5121_v9, %v5123_v62  ;;  %v4496_v57 = vor.u32 %v4495_v39, %v4494_v13 }
 0x63b   :  { %v5125_v60 = vpop.f32.mrf.mxu1  ;;  %v5166_v34 = vpop.f32.mrf.mxu0 }
 0x63c   :  { %v5218_v58 = vrot.slane %v5211_v45, %v10273_v47  ;;  %v5164_v34 = vadd.f32 %v5163_v12, %v11558_v38  ;;  %v5162_v60 = vadd.f32 %v5161_v44, %v11559_v35  ;;  %v5235_v62 = vrot.slane %v4496_v57, 2 }
 0x63e   :  { %v5225_v51 = vrot.slane %v5218_v58, %v10273_v47  ;;  %v5239_v18 = vcombine.low %v5162_v60, %v5164_v34 }
 0x640   :  { %v5227_v14 = vadd.f32 %v5225_v51, %v4496_v57  ;;  %v5246_v33 = vrot.slane %v5239_v18, %v10273_v47 }
 0x642   :  { %v8363_v56 = vmul.f32 -1.442695, %v5227_v14  ;;  %v5253_v9 = vrot.slane %v5246_v33, %v10273_v47 }
 0x644   :  { %9604 = vpow2.f32 %v8363_v56  ;;  %v5255_v45 = vadd.f32 %v5253_v9, %v5235_v62 }
 0x646   :  { %v8364_v59 = vmul.f32 -1.442695, %v5255_v45 }
 0x648   :  { %9606 = vpow2.f32 %v8364_v59 }
 0x651   :  { %v9605_v49 = vpop.eup %9604 }
 0x652   :  { %v5231_v23 = vadd.f32 1.0, %v9605_v49  ;;  %v5281_v49 = vrot.slane %v4496_v57, 4 }
 0x654   :  { %9608 = vrcp.f32 %v5231_v23 }
 0x655   :  { %v9607_v58 = vpop.eup %9606 }
 0x656   :  { %v5259_v56 = vadd.f32 1.0, %v9607_v58  ;;  %v11165_v58 = vld [vmem:[#allocation11 + $0x160] ss:$24 sps:$4 sm:$0xff]  }
 0x658   :  { %9610 = vrcp.f32 %v5259_v56  ;;  %v11177_v56 = vld [vmem:[#allocation11 + $0x104] ss:$24 sps:$4 sm:$0xff]  }
 0x661   :  { %v9609_v33 = vpop.eup %9608 }
 0x665   :  { %v9611_v9 = vpop.eup %9610 }
 0x666   :  { %v5285_v62 = vsub.f32 1.0, %v9611_v9 }
 0x675   :  { %v5202_v39 = vpop.f32.mrf.mxu1 }
 0x676   :  { %v5203_v12 = vadd.f32 %v5202_v39, %v10283_v4 }
 0x677   :  { %v5204_v13 = vpop.f32.mrf.mxu1 }
 0x678   :  { %v5205_v44 = vadd.f32 %v5204_v13, %v10287_v61  ;;  %v5287_v13 = vmul.f32 %v9611_v9, %v10907_v52  ;;  %v11174_v52 = vld [vmem:[#allocation11 + $0x130] ss:$24 sps:$4 sm:$0xff]   ;;  %v11661_v9 = vld [vmem:[#allocation36_spill] sm:$0xff] }
 0x679   :  { %v5206_v14 = vpop.f32.mrf.mxu1 }
 0x67a   :  { %v5264_v51 = vcombine.low %v5203_v12, %v5205_v44 }
 0x67b   :  { %v5207_v34 = vpop.f32.mrf.mxu1 }
 0x67c   :  { %v5271_v60 = vrot.slane %v5264_v51, %v10273_v47  ;;  %v11169_v34 = vld [vmem:[#allocation11 + $0x134] ss:$24 sps:$4 sm:$0xff]  }
 0x67e   :  { %v5278_v18 = vrot.slane %v5271_v60, %v10273_v47  ;;  %v11182_v60 = vld [vmem:[#allocation11 + $0x100] ss:$24 sps:$4 sm:$0xff]  }
 0x680   :  { %v5280_v59 = vmul.f32 %v9609_v33, %v5278_v18  ;;  %v11185_v18 = vld [vmem:[#allocation11 + $0xd4] ss:$24 sps:$4 sm:$0xff]   ;;  %v11190_v33 = vld [vmem:[#allocation11 + $0xd0] ss:$24 sps:$4 sm:$0xff]  }
 0x682   :  { %v5283_v23 = vadd.f32 %v5281_v49, %v5280_v59  ;;  %v11658_v59 = vld [vmem:[#allocation31_spill] sm:$0xff] }
 0x683   :  { %v11659_v49 = vld [vmem:[#allocation35_spill] sm:$0xff] }
 0x684   :  { %9612 = vtanh.f32 %v5283_v23  ;;  %v11660_v23 = vld [vmem:[#allocation34_spill] sm:$0xff] }
 0x691   :  { %v9613_v45 = vpop.eup %9612 }
 0x692   :  { %v5286_v39 = vmul.f32 %v9613_v45, %v5285_v62  ;;  %v11662_v62 = vld [vmem:[#allocation37_spill] sm:$0xff]  ;;  %v11663_v45 = vld [vmem:[#allocation38_spill] sm:$0xff] }
 0x694   :  { %v11156_v14 = vadd.f32 %v5287_v13, %v5286_v39  ;;  %v11664_v39 = vld [vmem:[#allocation40_spill] sm:$0xff]  ;;  %v11665_v13 = vld [vmem:[#allocation39_spill] sm:$0xff] }
 0x696   :  { %5290 = vst.msk [vmem:[#allocation13 + $0x4] ss:$8 sm:$0x3] %vm10297_vm0, %v11156_v14  ;;  %v5312_v12 = vrot.slane %v11156_v14, %v9911_v19  ;;  %v5308_v57 = vrot.slane %v11156_v14, %v9921_v29 }
 0x698   :  { %v5316_v44 = vpack.c.bf16 %v5312_v12, %v5312_v12  ;;  %v11167_v51 = vpack.c.bf16 %v5308_v57, %v5308_v57  ;;  %v11666_v12 = vld [vmem:[#allocation41_spill] sm:$0xff]  ;;  %v11667_v57 = vld [vmem:[#allocation42_spill] sm:$0xff] }
 0x69a   :  { %5925 = vmatprep.mubr.bf16.mxu0 %v5316_v44  ;;  %5966 = vmatprep.mubr.bf16.mxu1 %v5316_v44 }
 0x69b   :  { %5926 = vmatmul.mubr.bf16.vlgmr.msra.gmra.mxu0 %v11167_v51  ;;  %5967 = vmatmul.mubr.bf16.vlgmr.msra.gmra.mxu1 %v11167_v51 }
 0x69c   :  { %5976 = vmatpush1.bf16.msra.mxu0 %v11165_v58  ;;  %6007 = vmatprep.mubr.bf16.mxu0 %v5316_v44  ;;  %v11668_v44 = vld [vmem:[#allocation43_spill] sm:$0xff] }
 0x69d   :  { %5977 = vmatprep.subr.bf16.mxu0 %v11169_v34  ;;  %6701 = vmatpush1.bf16.msra.mxu1 %v10947_v24  ;;  %v11193_v24 = vld [vmem:[#allocation11 + $0xa4] ss:$24 sps:$4 sm:$0xff]  }
 0x69e   :  { %6702 = vmatprep.subr.bf16.mxu1 %v10955_v20  ;;  %v11198_v20 = vld [vmem:[#allocation11 + $0xa0] ss:$24 sps:$4 sm:$0xff]  }
 0x6a0   :  { %5978 = vmatpush1.bf16.msra.mxu0 %v11174_v52 }
 0x6a1   :  { %5979 = vmatprep.subr.bf16.mxu0 %v11177_v56  ;;  %6703 = vmatpush1.bf16.msra.mxu1 %v10962_v11  ;;  %v11201_v11 = vld [vmem:[#allocation11 + $0x74] ss:$24 sps:$4 sm:$0xff]  }
 0x6a2   :  { %6704 = vmatprep.subr.bf16.mxu1 %v10968_v8  ;;  %v11206_v8 = vld [vmem:[#allocation11 + $0x70] ss:$24 sps:$4 sm:$0xff]  }
 0x6a4   :  { %5980 = vmatpush1.bf16.msra.mxu0 %v11182_v60 }
 0x6a5   :  { %5981 = vmatprep.subr.bf16.mxu0 %v11185_v18  ;;  %6705 = vmatpush1.bf16.msra.mxu1 %v10974_v7  ;;  %v11209_v7 = vld [vmem:[#allocation11 + $0x44] ss:$24 sps:$4 sm:$0xff]  }
 0x6a6   :  { %6706 = vmatprep.subr.bf16.mxu1 %v10980_v17  ;;  %v11214_v17 = vld [vmem:[#allocation11 + $0x40] ss:$24 sps:$4 sm:$0xff]  }
 0x6a8   :  { %5982 = vmatpush1.bf16.msra.mxu0 %v11190_v33 }
 0x6a9   :  { %5983 = vmatprep.subr.bf16.mxu0 %v11193_v24  ;;  %6707 = vmatpush1.bf16.msra.mxu1 %v10986_v48  ;;  %v11217_v48 = vld [vmem:[#allocation11 + $0x14] ss:$24 sps:$4 sm:$0xff]  }
 0x6aa   :  { %6708 = vmatprep.subr.bf16.mxu1 %v10992_v55  ;;  %v11222_v55 = vld [vmem:[#allocation11 + $0x10] ss:$24 sps:$4 sm:$0xff]  }
 0x6ac   :  { %5984 = vmatpush1.bf16.msra.mxu0 %v11198_v20 }
 0x6ad   :  { %5985 = vmatprep.subr.bf16.mxu0 %v11201_v11  ;;  %6709 = vmatpush1.bf16.msra.mxu1 %v10998_v26  ;;  %v11225_v26 = vld [vmem:[#allocation11 + $0x2e4] ss:$24 sps:$4 sm:$0xff]  }
 0x6ae   :  { %6710 = vmatprep.subr.bf16.mxu1 %v11004_v6  ;;  %v11230_v6 = vld [vmem:[#allocation11 + $0x2e0] ss:$24 sps:$4 sm:$0xff]  }
 0x6b0   :  { %5986 = vmatpush1.bf16.msra.mxu0 %v11206_v8 }
 0x6b1   :  { %5987 = vmatprep.subr.bf16.mxu0 %v11209_v7  ;;  %6711 = vmatpush1.bf16.msra.mxu1 %v11010_v54  ;;  %v11233_v54 = vld [vmem:[#allocation11 + $0x2b4] ss:$24 sps:$4 sm:$0xff]  }
 0x6b2   :  { %6712 = vmatprep.subr.bf16.mxu1 %v11016_v37  ;;  %v11238_v37 = vld [vmem:[#allocation11 + $0x2b0] ss:$24 sps:$4 sm:$0xff]  }
 0x6b4   :  { %5988 = vmatpush1.bf16.msra.mxu0 %v11214_v17 }
 0x6b5   :  { %5989 = vmatprep.subr.bf16.mxu0 %v11217_v48  ;;  %6713 = vmatpush1.bf16.msra.mxu1 %v11022_v0  ;;  %v11241_v0 = vld [vmem:[#allocation11 + $0x284] ss:$24 sps:$4 sm:$0xff]  }
 0x6b6   :  { %6714 = vmatprep.subr.bf16.mxu1 %v11033_v10  ;;  %v11246_v10 = vld [vmem:[#allocation11 + $0x280] ss:$24 sps:$4 sm:$0xff]  }
 0x6b8   :  { %5990 = vmatpush1.bf16.msra.mxu0 %v11222_v55 }
 0x6b9   :  { %5991 = vmatprep.subr.bf16.mxu0 %v11225_v26  ;;  %6715 = vmatpush1.bf16.msra.mxu1 %v11031_v27  ;;  %v11249_v27 = vld [vmem:[#allocation11 + $0x254] ss:$24 sps:$4 sm:$0xff]  }
 0x6ba   :  { %6716 = vmatprep.subr.bf16.mxu1 %v11043_v42  ;;  %v11254_v42 = vld [vmem:[#allocation11 + $0x250] ss:$24 sps:$4 sm:$0xff]  }
 0x6bc   :  { %5992 = vmatpush2.bf16.msra.mxu0 %v11230_v6 }
 0x6bd   :  { %5993 = vmatprep.subr.bf16.mxu0 %v11233_v54  ;;  %6717 = vmatpush2.bf16.msra.mxu1 %v11045_v16  ;;  %v11257_v16 = vld [vmem:[#allocation11 + $0x224] ss:$24 sps:$4 sm:$0xff]  }
 0x6be   :  { %6718 = vmatprep.subr.bf16.mxu1 %v11055_v53  ;;  %v11262_v53 = vld [vmem:[#allocation11 + $0x220] ss:$24 sps:$4 sm:$0xff]  }
 0x6c0   :  { %5994 = vmatpush2.bf16.msra.mxu0 %v11238_v37 }
 0x6c1   :  { %5995 = vmatprep.subr.bf16.mxu0 %v11241_v0  ;;  %6719 = vmatpush2.bf16.msra.mxu1 %v11057_v28  ;;  %v11265_v28 = vld [vmem:[#allocation11 + $0x1f4] ss:$24 sps:$4 sm:$0xff]  }
 0x6c2   :  { %6720 = vmatprep.subr.bf16.mxu1 %v11067_v32  ;;  %v11270_v32 = vld [vmem:[#allocation11 + $0x1f0] ss:$24 sps:$4 sm:$0xff]  }
 0x6c4   :  { %5996 = vmatpush2.bf16.msra.mxu0 %v11246_v10 }
 0x6c5   :  { %5997 = vmatprep.subr.bf16.mxu0 %v11249_v27  ;;  %6721 = vmatpush2.bf16.msra.mxu1 %v11069_v43  ;;  %v11273_v43 = vld [vmem:[#allocation11 + $0x1c4] ss:$24 sps:$4 sm:$0xff]  }
 0x6c6   :  { %6722 = vmatprep.subr.bf16.mxu1 %v11076_v3  ;;  %v11278_v3 = vld [vmem:[#allocation11 + $0x1c0] ss:$24 sps:$4 sm:$0xff]  }
 0x6c8   :  { %5998 = vmatpush2.bf16.msra.mxu0 %v11254_v42 }
 0x6c9   :  { %5999 = vmatprep.subr.bf16.mxu0 %v11257_v16  ;;  %6723 = vmatpush2.bf16.msra.mxu1 %v11080_v22  ;;  %v11281_v22 = vld [vmem:[#allocation11 + $0x194] ss:$24 sps:$4 sm:$0xff]  }
 0x6ca   :  { %6724 = vmatprep.subr.bf16.mxu1 %v11088_v40  ;;  %v11286_v40 = vld [vmem:[#allocation11 + $0x190] ss:$24 sps:$4 sm:$0xff]  }
 0x6cc   :  { %6000 = vmatpush2.bf16.msra.mxu0 %v11262_v53 }
 0x6cd   :  { %6001 = vmatprep.subr.bf16.mxu0 %v11265_v28  ;;  %6725 = vmatpush2.bf16.msra.mxu1 %v11094_v2  ;;  %v11649_v2 = vld [vmem:[#allocation23_spill] sm:$0xff] }
 0x6ce   :  { %6726 = vmatprep.subr.bf16.mxu1 %v11100_v30  ;;  %v11657_v30 = vld [vmem:[#allocation30_spill] sm:$0xff] }
 0x6d0   :  { %6002 = vmatpush2.bf16.msra.mxu0 %v11270_v32 }
 0x6d1   :  { %6003 = vmatprep.subr.bf16.mxu0 %v11273_v43  ;;  %6727 = vmatpush2.bf16.msra.mxu1 %v11106_v21  ;;  %v11646_v21 = vld [vmem:[#allocation19_spill] sm:$0xff] }
 0x6d2   :  { %6728 = vmatprep.subr.bf16.mxu1 %v11112_v50  ;;  %v11647_v50 = vld [vmem:[#allocation20_spill] sm:$0xff] }
 0x6d4   :  { %6004 = vmatpush2.bf16.msra.mxu0 %v11278_v3 }
 0x6d5   :  { %6005 = vmatprep.subr.bf16.mxu0 %v11281_v22  ;;  %6729 = vmatpush2.bf16.msra.mxu1 %v11118_v31  ;;  %v11648_v31 = vld [vmem:[#allocation21_spill] sm:$0xff] }
 0x6d6   :  { %6730 = vmatprep.subr.bf16.mxu1 %v11124_v5  ;;  %v11653_v5 = vld [vmem:[#allocation26_spill] sm:$0xff] }
 0x6d8   :  { %6006 = vmatpush2.bf16.msra.mxu0 %v11286_v40 }
 0x6d9   :  { %6741 = vmatprep.subr.bf16.mxu0 %v10953_v36  ;;  %6731 = vmatpush2.bf16.msra.mxu1 %v11130_v15  ;;  %v11650_v36 = vld [vmem:[#allocation22_spill] sm:$0xff]  ;;  %v11651_v15 = vld [vmem:[#allocation24_spill] sm:$0xff] }
 0x6da   :  { %6782 = vmatprep.subr.bf16.mxu1 %v11139_v1  ;;  %v11652_v1 = vld [vmem:[#allocation25_spill] sm:$0xff] }
 0x6db   :  { %6008 = vmatmul.mubr.bf16.vlgmr.msra.gmra.mxu0 %v11167_v51  ;;  %v11669_v51 = vld [vmem:[#allocation44_spill] sm:$0xff] }
 0x6dc   :  { %6742 = vmatpush1.bf16.msra.mxu0 %v10951_v25  ;;  %v11654_v25 = vld [vmem:[#allocation27_spill] sm:$0xff] }
 0x6dd   :  { %6743 = vmatprep.subr.bf16.mxu0 %v10958_v41  ;;  %v11655_v41 = vld [vmem:[#allocation28_spill] sm:$0xff] }
 0x6e0   :  { %6744 = vmatpush1.bf16.msra.mxu0 %v10966_v46  ;;  %v11656_v46 = vld [vmem:[#allocation29_spill] sm:$0xff] }
 0x6e1   :  { %6745 = vmatprep.subr.bf16.mxu0 %v11646_v21  ;;  %v11670_v21 = vld [vmem:[#allocation45_spill] sm:$0xff] }
 0x6e4   :  { %6746 = vmatpush1.bf16.msra.mxu0 %v11647_v50  ;;  %v11671_v50 = vld [vmem:[#allocation46_spill] sm:$0xff] }
 0x6e5   :  { %6747 = vmatprep.subr.bf16.mxu0 %v11648_v31  ;;  %v11672_v31 = vld [vmem:[#allocation47_spill] sm:$0xff] }
 0x6e8   :  { %6748 = vmatpush1.bf16.msra.mxu0 %v11649_v2  ;;  %v11673_v2 = vld [vmem:[#allocation48_spill] sm:$0xff] }
 0x6e9   :  { %6749 = vmatprep.subr.bf16.mxu0 %v11650_v36 }
 0x6ec   :  { %6750 = vmatpush1.bf16.msra.mxu0 %v11651_v15 }
 0x6ed   :  { %6751 = vmatprep.subr.bf16.mxu0 %v11652_v1 }
 0x6f0   :  { %6752 = vmatpush1.bf16.msra.mxu0 %v11653_v5 }
 0x6f1   :  { %6753 = vmatprep.subr.bf16.mxu0 %v11654_v25 }
 0x6f4   :  { %6754 = vmatpush1.bf16.msra.mxu0 %v11655_v41 }
 0x6f5   :  { %6755 = vmatprep.subr.bf16.mxu0 %v11656_v46 }
 0x6f8   :  { %6756 = vmatpush1.bf16.msra.mxu0 %v11657_v30 }
 0x6f9   :  { %6757 = vmatprep.subr.bf16.mxu0 %v11658_v59  ;;  %v11674_v59 = vld [vmem:[#allocation33_spill] sm:$0xff] }
 0x6fc   :  { %6758 = vmatpush2.bf16.msra.mxu0 %v11659_v49 }
 0x6fd   :  { %6759 = vmatprep.subr.bf16.mxu0 %v11660_v23  ;;  %v11675_v23 = vld [vmem:[#allocation32_spill] sm:$0xff] }
 0x700   :  { %6760 = vmatpush2.bf16.msra.mxu0 %v11661_v9 }
 0x701   :  { %6761 = vmatprep.subr.bf16.mxu0 %v11662_v62 }
 0x704   :  { %6762 = vmatpush2.bf16.msra.mxu0 %v11663_v45 }
 0x705   :  { %6763 = vmatprep.subr.bf16.mxu0 %v11664_v39  ;;  %v5301_v39 = vld [vmem:[%s5300_s9] ss:$8 sm:$0xf] }
 0x708   :  { %6764 = vmatpush2.bf16.msra.mxu0 %v11665_v13  ;;  %v5302_v13 = vld [vmem:[%s5300_s9] ss:$8 sm:$0x30] }
 0x709   :  { %6765 = vmatprep.subr.bf16.mxu0 %v11666_v12 }
 0x70c   :  { %6766 = vmatpush2.bf16.msra.mxu0 %v11667_v57  ;;  %v5303_v57 = vor.u32 %v5302_v13, %v5301_v39 }
 0x70d   :  { %6767 = vmatprep.subr.bf16.mxu0 %v11668_v44 }
 0x710   :  { %6768 = vmatpush2.bf16.msra.mxu0 %v11669_v51 }
 0x711   :  { %6769 = vmatprep.subr.bf16.mxu0 %v11670_v21 }
 0x714   :  { %6770 = vmatpush2.bf16.msra.mxu0 %v11671_v50 }
 0x715   :  { %6771 = vmatprep.subr.bf16.mxu0 %v11672_v31 }
 0x718   :  { %6772 = vmatpush2.bf16.msra.mxu0 %v11673_v2 }
 0x75b   :  { %v5927_v36 = vpop.f32.mrf.mxu0  ;;  %v5968_v15 = vpop.f32.mrf.mxu1 }
 0x75c   :  { %v5928_v9 = vadd.f32 %v5927_v36, %v11675_v23  ;;  %v5969_v51 = vadd.f32 %v5968_v15, %v11559_v35 }
 0x75d   :  { %v5929_v1 = vpop.f32.mrf.mxu0  ;;  %v5970_v5 = vpop.f32.mrf.mxu1 }
 0x75e   :  { %v5930_v49 = vadd.f32 %v5929_v1, %v11674_v59  ;;  %v5971_v44 = vadd.f32 %v5970_v5, %v11558_v38  ;;  %v6042_v1 = vrot.slane %v5303_v57, 2 }
 0x75f   :  { %v5931_v25 = vpop.f32.mrf.mxu0  ;;  %v5972_v41 = vpop.f32.mrf.mxu1 }
 0x760   :  { %v6018_v62 = vcombine.low %v5928_v9, %v5930_v49  ;;  %v6046_v50 = vcombine.low %v5969_v51, %v5971_v44 }
 0x761   :  { %v5932_v46 = vpop.f32.mrf.mxu0  ;;  %v5973_v30 = vpop.f32.mrf.mxu1 }
 0x762   :  { %v6025_v45 = vrot.slane %v6018_v62, %v10273_v47  ;;  %v6053_v2 = vrot.slane %v6046_v50, %v10273_v47 }
 0x764   :  { %v6032_v12 = vrot.slane %v6025_v45, %v10273_v47  ;;  %v6060_v36 = vrot.slane %v6053_v2, %v10273_v47 }
 0x766   :  { %v6034_v21 = vadd.f32 %v6032_v12, %v5303_v57  ;;  %v6062_v25 = vadd.f32 %v6060_v36, %v6042_v1 }
 0x768   :  { %v8463_v31 = vmul.f32 -1.442695, %v6034_v21  ;;  %v8464_v41 = vmul.f32 -1.442695, %v6062_v25 }
 0x76a   :  { %9614 = vpow2.f32 %v8463_v31  ;;  %v6088_v31 = vrot.slane %v5303_v57, 4 }
 0x76b   :  { %9616 = vpow2.f32 %v8464_v41 }
 0x777   :  { %v9615_v46 = vpop.eup %9614 }
 0x778   :  { %v6038_v30 = vadd.f32 1.0, %v9615_v46  ;;  %v9617_v62 = vpop.eup %9616 }
 0x779   :  { %v6066_v12 = vadd.f32 1.0, %v9617_v62  ;;  %v9468_v62 = vld [vmem:[#allocation11 + $0x2d0] ss:$24 sps:$4 sm:$0xff]  }
 0x77a   :  { %9618 = vrcp.f32 %v6038_v30 }
 0x77b   :  { %9620 = vrcp.f32 %v6066_v12  ;;  %v9474_v12 = vld [vmem:[#allocation11 + $0x2a0] ss:$24 sps:$4 sm:$0xff]  }
 0x787   :  { %v9619_v21 = vpop.eup %9618 }
 0x788   :  { %v9621_v36 = vpop.eup %9620 }
 0x789   :  { %v6092_v1 = vsub.f32 1.0, %v9621_v36  ;;  %v6094_v46 = vmul.f32 %v9621_v36, %v11156_v14  ;;  %v9420_v14 = vld [vmem:[#allocation11 + $0x150] ss:$24 sps:$4 sm:$0xff]   ;;  %v9488_v36 = vld [vmem:[#allocation11 + $0x244] ss:$24 sps:$4 sm:$0xff]  }
 0x79b   :  { %v6009_v49 = vpop.f32.mrf.mxu0 }
 0x79c   :  { %v6010_v5 = vadd.f32 %v6009_v49, %v10283_v4 }
 0x79d   :  { %v6011_v9 = vpop.f32.mrf.mxu0 }
 0x79e   :  { %v6012_v15 = vadd.f32 %v6011_v9, %v10287_v61 }
 0x79f   :  { %v6013_v45 = vpop.f32.mrf.mxu0 }
 0x7a0   :  { %v6071_v39 = vcombine.low %v6010_v5, %v6012_v15  ;;  %v9470_v15 = vld [vmem:[#allocation11 + $0x2d4] ss:$24 sps:$4 sm:$0xff]  }
 0x7a1   :  { %v6014_v13 = vpop.f32.mrf.mxu0  ;;  %v9473_v45 = vld [vmem:[#allocation11 + $0x2dc] ss:$24 sps:$4 sm:$0xff]  }
 0x7a2   :  { %v6078_v44 = vrot.slane %v6071_v39, %v10273_v47  ;;  %v9471_v39 = vld [vmem:[#allocation11 + $0x2d8] ss:$24 sps:$4 sm:$0xff]   ;;  %v9476_v13 = vld [vmem:[#allocation11 + $0x2a4] ss:$24 sps:$4 sm:$0xff]  }
 0x7a4   :  { %v6085_v51 = vrot.slane %v6078_v44, %v10273_v47  ;;  %v9479_v44 = vld [vmem:[#allocation11 + $0x2ac] ss:$24 sps:$4 sm:$0xff]  }
 0x7a6   :  { %v6087_v50 = vmul.f32 %v9619_v21, %v6085_v51  ;;  %v9477_v51 = vld [vmem:[#allocation11 + $0x2a8] ss:$24 sps:$4 sm:$0xff]  }
 0x7a7   :  { %v9480_v21 = vld [vmem:[#allocation11 + $0x270] ss:$24 sps:$4 sm:$0xff]  }
 0x7a8   :  { %v6090_v2 = vadd.f32 %v6088_v31, %v6087_v50  ;;  %v9482_v50 = vld [vmem:[#allocation11 + $0x274] ss:$24 sps:$4 sm:$0xff]   ;;  %v9483_v31 = vld [vmem:[#allocation11 + $0x278] ss:$24 sps:$4 sm:$0xff]  }
 0x7aa   :  { %9622 = vtanh.f32 %v6090_v2  ;;  %v9485_v2 = vld [vmem:[#allocation11 + $0x27c] ss:$24 sps:$4 sm:$0xff]  }
 0x7b7   :  { %v9623_v25 = vpop.eup %9622 }
 0x7b8   :  { %v6093_v41 = vmul.f32 %v9623_v25, %v6092_v1  ;;  %v9491_v1 = vld [vmem:[#allocation11 + $0x24c] ss:$24 sps:$4 sm:$0xff]   ;;  %v9486_v25 = vld [vmem:[#allocation11 + $0x240] ss:$24 sps:$4 sm:$0xff]  }
 0x7ba   :  { %v11340_v30 = vadd.f32 %v6094_v46, %v6093_v41  ;;  %v9489_v41 = vld [vmem:[#allocation11 + $0x248] ss:$24 sps:$4 sm:$0xff]   ;;  %v9494_v46 = vld [vmem:[#allocation11 + $0x214] ss:$24 sps:$4 sm:$0xff]  }
 0x7bc   :  { %6097 = vst.msk [vmem:[#allocation13 + $0x5] ss:$8 sm:$0x3] %vm10297_vm0, %v11340_v30  ;;  %v6119_v49 = vrot.slane %v11340_v30, %v9911_v19  ;;  %v6115_v57 = vrot.slane %v11340_v30, %v9921_v29 }
 0x7be   :  { %v6123_v9 = vpack.c.bf16 %v6119_v49, %v6119_v49  ;;  %v6122_v5 = vpack.c.bf16 %v6115_v57, %v6115_v57  ;;  %v9497_v49 = vld [vmem:[#allocation11 + $0x21c] ss:$24 sps:$4 sm:$0xff]   ;;  %v9492_v57 = vld [vmem:[#allocation11 + $0x210] ss:$24 sps:$4 sm:$0xff]  }
 0x7c0   :  { %6732 = vmatprep.mubr.bf16.mxu1 %v6123_v9  ;;  %6773 = vmatprep.mubr.bf16.mxu0 %v6123_v9 }
 0x7c1   :  { %6733 = vmatmul.mubr.bf16.vlgmr.msra.gmra.mxu1 %v6122_v5  ;;  %6774 = vmatmul.mubr.bf16.vlgmr.msra.gmra.mxu0 %v6122_v5 }
 0x7c2   :  { %6783 = vmatpush1.bf16.msra.mxu1 %v11165_v58  ;;  %6814 = vmatprep.mubr.bf16.mxu1 %v6123_v9  ;;  %v9422_v58 = vld [vmem:[#allocation11 + $0x154] ss:$24 sps:$4 sm:$0xff]   ;;  %v9495_v9 = vld [vmem:[#allocation11 + $0x218] ss:$24 sps:$4 sm:$0xff]  }
 0x7c3   :  { %6784 = vmatprep.subr.bf16.mxu1 %v11169_v34  ;;  %v9423_v34 = vld [vmem:[#allocation11 + $0x158] ss:$24 sps:$4 sm:$0xff]   ;;  %7507 = vmatprep.subr.bf16.mxu0 %v9422_v58 }
 0x7c4   :  { %7508 = vmatpush1.bf16.msra.mxu0 %v9420_v14  ;;  %v9503_v14 = vld [vmem:[#allocation11 + $0x1ec] ss:$24 sps:$4 sm:$0xff]   ;;  %v9498_v58 = vld [vmem:[#allocation11 + $0x1e0] ss:$24 sps:$4 sm:$0xff]  }
 0x7c6   :  { %6785 = vmatpush1.bf16.msra.mxu1 %v11174_v52  ;;  %v9425_v52 = vld [vmem:[#allocation11 + $0x15c] ss:$24 sps:$4 sm:$0xff]  }
 0x7c7   :  { %6786 = vmatprep.subr.bf16.mxu1 %v11177_v56  ;;  %v9428_v56 = vld [vmem:[#allocation11 + $0x124] ss:$24 sps:$4 sm:$0xff]  }
 0x7c8   :  { %7509 = vmatprep.subr.bf16.mxu0 %v9428_v56  ;;  %v9509_v56 = vld [vmem:[#allocation11 + $0x1bc] ss:$24 sps:$4 sm:$0xff]  }
 0x7ca   :  { %6787 = vmatpush1.bf16.msra.mxu1 %v11182_v60  ;;  %v9431_v60 = vld [vmem:[#allocation11 + $0x12c] ss:$24 sps:$4 sm:$0xff]  }
 0x7cb   :  { %6788 = vmatprep.subr.bf16.mxu1 %v11185_v18  ;;  %v9426_v18 = vld [vmem:[#allocation11 + $0x120] ss:$24 sps:$4 sm:$0xff]  }
 0x7cc   :  { %7510 = vmatpush1.bf16.msra.mxu0 %v9426_v18  ;;  %v9507_v18 = vld [vmem:[#allocation11 + $0x1b8] ss:$24 sps:$4 sm:$0xff]  }
 0x7ce   :  { %6789 = vmatpush1.bf16.msra.mxu1 %v11190_v33  ;;  %v9429_v33 = vld [vmem:[#allocation11 + $0x128] ss:$24 sps:$4 sm:$0xff]  }
 0x7cf   :  { %6790 = vmatprep.subr.bf16.mxu1 %v11193_v24  ;;  %v9434_v24 = vld [vmem:[#allocation11 + $0xf4] ss:$24 sps:$4 sm:$0xff]  }
 0x7d0   :  { %7511 = vmatprep.subr.bf16.mxu0 %v9434_v24  ;;  %v9515_v24 = vld [vmem:[#allocation11 + $0x18c] ss:$24 sps:$4 sm:$0xff]  }
 0x7d2   :  { %6791 = vmatpush1.bf16.msra.mxu1 %v11198_v20  ;;  %v9437_v20 = vld [vmem:[#allocation11 + $0xfc] ss:$24 sps:$4 sm:$0xff]  }
 0x7d3   :  { %6792 = vmatprep.subr.bf16.mxu1 %v11201_v11  ;;  %v9432_v11 = vld [vmem:[#allocation11 + $0xf0] ss:$24 sps:$4 sm:$0xff]  }
 0x7d4   :  { %7512 = vmatpush1.bf16.msra.mxu0 %v9432_v11  ;;  %v9513_v11 = vld [vmem:[#allocation11 + $0x188] ss:$24 sps:$4 sm:$0xff]  }
 0x7d6   :  { %6793 = vmatpush1.bf16.msra.mxu1 %v11206_v8  ;;  %v9435_v8 = vld [vmem:[#allocation11 + $0xf8] ss:$24 sps:$4 sm:$0xff]  }
 0x7d7   :  { %6794 = vmatprep.subr.bf16.mxu1 %v11209_v7  ;;  %v9440_v7 = vld [vmem:[#allocation11 + $0xc4] ss:$24 sps:$4 sm:$0xff]  }
 0x7d8   :  { %7513 = vmatprep.subr.bf16.mxu0 %v9440_v7 }
 0x7da   :  { %6795 = vmatpush1.bf16.msra.mxu1 %v11214_v17  ;;  %v9443_v17 = vld [vmem:[#allocation11 + $0xcc] ss:$24 sps:$4 sm:$0xff]  }
 0x7db   :  { %6796 = vmatprep.subr.bf16.mxu1 %v11217_v48  ;;  %v9438_v48 = vld [vmem:[#allocation11 + $0xc0] ss:$24 sps:$4 sm:$0xff]  }
 0x7dc   :  { %7514 = vmatpush1.bf16.msra.mxu0 %v9438_v48 }
 0x7de   :  { %6797 = vmatpush1.bf16.msra.mxu1 %v11222_v55  ;;  %v9441_v55 = vld [vmem:[#allocation11 + $0xc8] ss:$24 sps:$4 sm:$0xff]  }
 0x7df   :  { %6798 = vmatprep.subr.bf16.mxu1 %v11225_v26  ;;  %v9446_v26 = vld [vmem:[#allocation11 + $0x94] ss:$24 sps:$4 sm:$0xff]  }
 0x7e0   :  { %7515 = vmatprep.subr.bf16.mxu0 %v9446_v26 }
 0x7e2   :  { %6799 = vmatpush2.bf16.msra.mxu1 %v11230_v6  ;;  %v9449_v6 = vld [vmem:[#allocation11 + $0x9c] ss:$24 sps:$4 sm:$0xff]  }
 0x7e3   :  { %6800 = vmatprep.subr.bf16.mxu1 %v11233_v54  ;;  %v9444_v54 = vld [vmem:[#allocation11 + $0x90] ss:$24 sps:$4 sm:$0xff]  }
 0x7e4   :  { %7516 = vmatpush1.bf16.msra.mxu0 %v9444_v54 }
 0x7e6   :  { %6801 = vmatpush2.bf16.msra.mxu1 %v11238_v37  ;;  %v9447_v37 = vld [vmem:[#allocation11 + $0x98] ss:$24 sps:$4 sm:$0xff]  }
 0x7e7   :  { %6802 = vmatprep.subr.bf16.mxu1 %v11241_v0  ;;  %v9452_v0 = vld [vmem:[#allocation11 + $0x64] ss:$24 sps:$4 sm:$0xff]  }
 0x7e8   :  { %7517 = vmatprep.subr.bf16.mxu0 %v9452_v0 }
 0x7ea   :  { %6803 = vmatpush2.bf16.msra.mxu1 %v11246_v10  ;;  %v9455_v10 = vld [vmem:[#allocation11 + $0x6c] ss:$24 sps:$4 sm:$0xff]  }
 0x7eb   :  { %6804 = vmatprep.subr.bf16.mxu1 %v11249_v27  ;;  %v9450_v27 = vld [vmem:[#allocation11 + $0x60] ss:$24 sps:$4 sm:$0xff]  }
 0x7ec   :  { %7518 = vmatpush1.bf16.msra.mxu0 %v9450_v27 }
 0x7ee   :  { %6805 = vmatpush2.bf16.msra.mxu1 %v11254_v42  ;;  %v9453_v42 = vld [vmem:[#allocation11 + $0x68] ss:$24 sps:$4 sm:$0xff]  }
 0x7ef   :  { %6806 = vmatprep.subr.bf16.mxu1 %v11257_v16  ;;  %v9458_v16 = vld [vmem:[#allocation11 + $0x34] ss:$24 sps:$4 sm:$0xff]  }
 0x7f0   :  { %7519 = vmatprep.subr.bf16.mxu0 %v9458_v16  ;;  %v6108_v16 = vld [vmem:[%s6107_s14] ss:$8 sm:$0xf] }
 0x7f2   :  { %6807 = vmatpush2.bf16.msra.mxu1 %v11262_v53  ;;  %v9461_v53 = vld [vmem:[#allocation11 + $0x3c] ss:$24 sps:$4 sm:$0xff]  }
 0x7f3   :  { %6808 = vmatprep.subr.bf16.mxu1 %v11265_v28  ;;  %v9456_v28 = vld [vmem:[#allocation11 + $0x30] ss:$24 sps:$4 sm:$0xff]  }
 0x7f4   :  { %7520 = vmatpush1.bf16.msra.mxu0 %v9456_v28 }
 0x7f6   :  { %6809 = vmatpush2.bf16.msra.mxu1 %v11270_v32  ;;  %v9459_v32 = vld [vmem:[#allocation11 + $0x38] ss:$24 sps:$4 sm:$0xff]  }
 0x7f7   :  { %6810 = vmatprep.subr.bf16.mxu1 %v11273_v43  ;;  %v9462_v43 = vld [vmem:[#allocation11] ss:$24 sps:$4 sm:$0xff]  }
 0x7fa   :  { %6811 = vmatpush2.bf16.msra.mxu1 %v11278_v3  ;;  %v9464_v3 = vld [vmem:[#allocation11 + $0x4] ss:$24 sps:$4 sm:$0xff]  }
 0x7fb   :  { %6812 = vmatprep.subr.bf16.mxu1 %v11281_v22  ;;  %7521 = vmatprep.subr.bf16.mxu0 %v9464_v3  ;;  %v9467_v22 = vld [vmem:[#allocation11 + $0xc] ss:$24 sps:$4 sm:$0xff]  }
 0x7fc   :  { %7522 = vmatpush1.bf16.msra.mxu0 %v9462_v43 }
 0x7fd   :  { %7523 = vmatprep.subr.bf16.mxu0 %v9470_v15 }
 0x7fe   :  { %6813 = vmatpush2.bf16.msra.mxu1 %v11286_v40  ;;  %v9465_v40 = vld [vmem:[#allocation11 + $0x8] ss:$24 sps:$4 sm:$0xff]  }
 0x7ff   :  { %7548 = vmatprep.subr.bf16.mxu1 %v9425_v52  ;;  %v9506_v52 = vld [vmem:[#allocation11 + $0x1b4] ss:$24 sps:$4 sm:$0xff]  }
 0x800   :  { %7524 = vmatpush2.bf16.msra.mxu0 %v9468_v62 }
 0x801   :  { %6815 = vmatmul.mubr.bf16.vlgmr.msra.gmra.mxu1 %v6122_v5  ;;  %7525 = vmatprep.subr.bf16.mxu0 %v9476_v13  ;;  %v9500_v5 = vld [vmem:[#allocation11 + $0x1e4] ss:$24 sps:$4 sm:$0xff]  }
 0x802   :  { %7549 = vmatpush1.bf16.msra.mxu1 %v9423_v34  ;;  %v9501_v34 = vld [vmem:[#allocation11 + $0x1e8] ss:$24 sps:$4 sm:$0xff]  }
 0x803   :  { %7550 = vmatprep.subr.bf16.mxu1 %v9431_v60  ;;  %v9504_v60 = vld [vmem:[#allocation11 + $0x1b0] ss:$24 sps:$4 sm:$0xff]  }
 0x804   :  { %7526 = vmatpush2.bf16.msra.mxu0 %v9474_v12 }
 0x805   :  { %7527 = vmatprep.subr.bf16.mxu0 %v9482_v50 }
 0x806   :  { %7551 = vmatpush1.bf16.msra.mxu1 %v9429_v33  ;;  %v9512_v33 = vld [vmem:[#allocation11 + $0x184] ss:$24 sps:$4 sm:$0xff]  }
 0x807   :  { %7552 = vmatprep.subr.bf16.mxu1 %v9437_v20  ;;  %v9510_v20 = vld [vmem:[#allocation11 + $0x180] ss:$24 sps:$4 sm:$0xff]  }
 0x808   :  { %7528 = vmatpush2.bf16.msra.mxu0 %v9480_v21 }
 0x809   :  { %7529 = vmatprep.subr.bf16.mxu0 %v9488_v36 }
 0x80a   :  { %7553 = vmatpush1.bf16.msra.mxu1 %v9435_v8  ;;  %v9518_v8 = vld [vmem:[#allocation11 + $0x164] ss:$24 sps:$4 sm:$0xff]  }
 0x80b   :  { %7554 = vmatprep.subr.bf16.mxu1 %v9443_v17 }
 0x80c   :  { %7530 = vmatpush2.bf16.msra.mxu0 %v9486_v25 }
 0x80d   :  { %7531 = vmatprep.subr.bf16.mxu0 %v9494_v46 }
 0x80e   :  { %7555 = vmatpush1.bf16.msra.mxu1 %v9441_v55 }
 0x80f   :  { %7556 = vmatprep.subr.bf16.mxu1 %v9449_v6 }
 0x810   :  { %7532 = vmatpush2.bf16.msra.mxu0 %v9492_v57 }
 0x811   :  { %7533 = vmatprep.subr.bf16.mxu0 %v9500_v5 }
 0x812   :  { %7557 = vmatpush1.bf16.msra.mxu1 %v9447_v37 }
 0x813   :  { %7558 = vmatprep.subr.bf16.mxu1 %v9455_v10 }
 0x814   :  { %7534 = vmatpush2.bf16.msra.mxu0 %v9498_v58 }
 0x815   :  { %7535 = vmatprep.subr.bf16.mxu0 %v9506_v52 }
 0x816   :  { %7559 = vmatpush1.bf16.msra.mxu1 %v9453_v42 }
 0x817   :  { %7560 = vmatprep.subr.bf16.mxu1 %v9461_v53  ;;  %v6109_v53 = vld [vmem:[%s6107_s14] ss:$8 sm:$0x30] }
 0x818   :  { %7536 = vmatpush2.bf16.msra.mxu0 %v9504_v60 }
 0x819   :  { %7537 = vmatprep.subr.bf16.mxu0 %v9512_v33 }
 0x81a   :  { %7561 = vmatpush1.bf16.msra.mxu1 %v9459_v32  ;;  %v6110_v32 = vor.u32 %v6109_v53, %v6108_v16  ;;  %v9542_v16 = vld [vmem:[#allocation11 + $0x2e4] ss:$24 sps:$4 sm:$0xff]   ;;  %v9540_v53 = vld [vmem:[#allocation11 + $0x2e0] ss:$24 sps:$4 sm:$0xff]  }
 0x81b   :  { %7562 = vmatprep.subr.bf16.mxu1 %v9467_v22 }
 0x81c   :  { %7538 = vmatpush2.bf16.msra.mxu0 %v9510_v20 }
 0x81d   :  { %7589 = vmatprep.subr.bf16.mxu0 %v9518_v8  ;;  %v9516_v8 = vld [vmem:[#allocation11 + $0x160] ss:$24 sps:$4 sm:$0xff]  }
 0x81e   :  { %7563 = vmatpush1.bf16.msra.mxu1 %v9465_v40 }
 0x81f   :  { %7564 = vmatprep.subr.bf16.mxu1 %v9473_v45 }
 0x822   :  { %7565 = vmatpush2.bf16.msra.mxu1 %v9471_v39  ;;  %v6849_v39 = vrot.slane %v6110_v32, 2 }
 0x823   :  { %7566 = vmatprep.subr.bf16.mxu1 %v9479_v44 }
 0x826   :  { %7567 = vmatpush2.bf16.msra.mxu1 %v9477_v51 }
 0x827   :  { %7568 = vmatprep.subr.bf16.mxu1 %v9485_v2 }
 0x82a   :  { %7569 = vmatpush2.bf16.msra.mxu1 %v9483_v31 }
 0x82b   :  { %7570 = vmatprep.subr.bf16.mxu1 %v9491_v1 }
 0x82e   :  { %7571 = vmatpush2.bf16.msra.mxu1 %v9489_v41 }
 0x82f   :  { %7572 = vmatprep.subr.bf16.mxu1 %v9497_v49 }
 0x832   :  { %7573 = vmatpush2.bf16.msra.mxu1 %v9495_v9 }
 0x833   :  { %7574 = vmatprep.subr.bf16.mxu1 %v9503_v14  ;;  %v6895_v14 = vrot.slane %v6110_v32, 4 }
 0x836   :  { %7575 = vmatpush2.bf16.msra.mxu1 %v9501_v34 }
 0x837   :  { %7576 = vmatprep.subr.bf16.mxu1 %v9509_v56 }
 0x83a   :  { %7577 = vmatpush2.bf16.msra.mxu1 %v9507_v18 }
 0x83b   :  { %7578 = vmatprep.subr.bf16.mxu1 %v9515_v24 }
 0x83e   :  { %7579 = vmatpush2.bf16.msra.mxu1 %v9513_v11 }
 0x881   :  { %v6734_v7 = vpop.f32.mrf.mxu1  ;;  %v6775_v17 = vpop.f32.mrf.mxu0 }
 0x882   :  { %v6735_v10 = vadd.f32 %v6734_v7, %v11675_v23  ;;  %v6776_v3 = vadd.f32 %v6775_v17, %v11559_v35  ;;  %v9521_v17 = vld [vmem:[#allocation11 + $0x134] ss:$24 sps:$4 sm:$0xff]  }
 0x883   :  { %v6736_v48 = vpop.f32.mrf.mxu1  ;;  %v6777_v55 = vpop.f32.mrf.mxu0 }
 0x884   :  { %v6737_v0 = vadd.f32 %v6736_v48, %v11674_v59  ;;  %v6778_v43 = vadd.f32 %v6777_v55, %v11558_v38  ;;  %v9524_v48 = vld [vmem:[#allocation11 + $0x104] ss:$24 sps:$4 sm:$0xff]   ;;  %v9525_v55 = vld [vmem:[#allocation11 + $0xd0] ss:$24 sps:$4 sm:$0xff]  }
 0x885   :  { %v6738_v26 = vpop.f32.mrf.mxu1  ;;  %v6779_v6 = vpop.f32.mrf.mxu0 }
 0x886   :  { %v6825_v27 = vcombine.low %v6735_v10, %v6737_v0  ;;  %v6853_v40 = vcombine.low %v6776_v3, %v6778_v43  ;;  %v9530_v26 = vld [vmem:[#allocation11 + $0xa4] ss:$24 sps:$4 sm:$0xff]   ;;  %v9528_v6 = vld [vmem:[#allocation11 + $0xa0] ss:$24 sps:$4 sm:$0xff]  }
 0x887   :  { %v6739_v54 = vpop.f32.mrf.mxu1  ;;  %v6780_v37 = vpop.f32.mrf.mxu0  ;;  %v9536_v0 = vld [vmem:[#allocation11 + $0x44] ss:$24 sps:$4 sm:$0xff]   ;;  %v9534_v10 = vld [vmem:[#allocation11 + $0x40] ss:$24 sps:$4 sm:$0xff]  }
 0x888   :  { %v6832_v42 = vrot.slane %v6825_v27, %v10273_v47  ;;  %v6860_v62 = vrot.slane %v6853_v40, %v10273_v47  ;;  %v9533_v54 = vld [vmem:[#allocation11 + $0x74] ss:$24 sps:$4 sm:$0xff]   ;;  %v9531_v37 = vld [vmem:[#allocation11 + $0x70] ss:$24 sps:$4 sm:$0xff]   ;;  %v9548_v43 = vld [vmem:[#allocation11 + $0x284] ss:$24 sps:$4 sm:$0xff]  }
 0x889   :  { %v9539_v27 = vld [vmem:[#allocation11 + $0x14] ss:$24 sps:$4 sm:$0xff]   ;;  %v9546_v3 = vld [vmem:[#allocation11 + $0x280] ss:$24 sps:$4 sm:$0xff]   ;;  %v9549_v40 = vld [vmem:[#allocation11 + $0x250] ss:$24 sps:$4 sm:$0xff]  }
 0x88a   :  { %v6839_v28 = vrot.slane %v6832_v42, %v10273_v47  ;;  %v6867_v45 = vrot.slane %v6860_v62, %v10273_v47  ;;  %v9537_v42 = vld [vmem:[#allocation11 + $0x10] ss:$24 sps:$4 sm:$0xff]   ;;  %v9552_v62 = vld [vmem:[#allocation11 + $0x220] ss:$24 sps:$4 sm:$0xff]  }
 0x88c   :  { %v6841_v22 = vadd.f32 %v6839_v28, %v6110_v32  ;;  %v6869_v13 = vadd.f32 %v6867_v45, %v6849_v39  ;;  %v9545_v28 = vld [vmem:[#allocation11 + $0x2b4] ss:$24 sps:$4 sm:$0xff]   ;;  %v9543_v32 = vld [vmem:[#allocation11 + $0x2b0] ss:$24 sps:$4 sm:$0xff]  }
 0x88d   :  { %v9557_v45 = vld [vmem:[#allocation11 + $0x1f4] ss:$24 sps:$4 sm:$0xff]   ;;  %v9555_v39 = vld [vmem:[#allocation11 + $0x1f0] ss:$24 sps:$4 sm:$0xff]  }
 0x88e   :  { %v8563_v15 = vmul.f32 -1.442695, %v6841_v22  ;;  %v8564_v12 = vmul.f32 -1.442695, %v6869_v13  ;;  %v9551_v22 = vld [vmem:[#allocation11 + $0x254] ss:$24 sps:$4 sm:$0xff]  }
 0x88f   :  { %v9560_v13 = vld [vmem:[#allocation11 + $0x1c4] ss:$24 sps:$4 sm:$0xff]  }
 0x890   :  { %9624 = vpow2.f32 %v8563_v15  ;;  %v9554_v15 = vld [vmem:[#allocation11 + $0x224] ss:$24 sps:$4 sm:$0xff]  }
 0x891   :  { %9626 = vpow2.f32 %v8564_v12  ;;  %v9558_v12 = vld [vmem:[#allocation11 + $0x1c0] ss:$24 sps:$4 sm:$0xff]  }
 0x89d   :  { %v9625_v44 = vpop.eup %9624 }
 0x89e   :  { %v6845_v51 = vadd.f32 1.0, %v9625_v44  ;;  %v9627_v36 = vpop.eup %9626  ;;  %v9563_v44 = vld [vmem:[#allocation11 + $0x194] ss:$24 sps:$4 sm:$0xff]  }
 0x89f   :  { %v6873_v46 = vadd.f32 1.0, %v9627_v36 }
 0x8a0   :  { %9628 = vrcp.f32 %v6845_v51  ;;  %v9561_v51 = vld [vmem:[#allocation11 + $0x190] ss:$24 sps:$4 sm:$0xff]  }
 0x8a1   :  { %9630 = vrcp.f32 %v6873_v46 }
 0x8ad   :  { %v9629_v9 = vpop.eup %9628 }
 0x8ae   :  { %v9631_v34 = vpop.eup %9630 }
 0x8af   :  { %v6899_v52 = vsub.f32 1.0, %v9631_v34  ;;  %v6901_v18 = vmul.f32 %v9631_v34, %v11340_v30  ;;  %v9519_v30 = vld [vmem:[#allocation11 + $0x130] ss:$24 sps:$4 sm:$0xff]  }
 0x8c1   :  { %v6816_v21 = vpop.f32.mrf.mxu1 }
 0x8c2   :  { %v6817_v31 = vadd.f32 %v6816_v21, %v10283_v4 }
 0x8c3   :  { %v6818_v50 = vpop.f32.mrf.mxu1 }
 0x8c4   :  { %v6819_v2 = vadd.f32 %v6818_v50, %v10287_v61 }
 0x8c5   :  { %v6820_v1 = vpop.f32.mrf.mxu1 }
 0x8c6   :  { %v6878_v25 = vcombine.low %v6817_v31, %v6819_v2 }
 0x8c7   :  { %v6821_v41 = vpop.f32.mrf.mxu1 }
 0x8c8   :  { %v6885_v49 = vrot.slane %v6878_v25, %v10273_v47 }
 0x8ca   :  { %v6892_v57 = vrot.slane %v6885_v49, %v10273_v47 }
 0x8cc   :  { %v6894_v5 = vmul.f32 %v9629_v9, %v6892_v57 }
 0x8ce   :  { %v6897_v58 = vadd.f32 %v6895_v14, %v6894_v5  ;;  %v6915_v5 = vld [vmem:[%s6914_s2] ss:$8 sm:$0xf] }
 0x8cf   :  { %v6916_v14 = vld [vmem:[%s6914_s2] ss:$8 sm:$0x30] }
 0x8d0   :  { %9632 = vtanh.f32 %v6897_v58  ;;  %v6917_v34 = vor.u32 %v6916_v14, %v6915_v5 }
 0x8dd   :  { %v9633_v56 = vpop.eup %9632 }
 0x8de   :  { %v6900_v60 = vmul.f32 %v9633_v56, %v6899_v52 }
 0x8e0   :  { %v11393_v33 = vadd.f32 %v6901_v18, %v6900_v60 }
 0x8e2   :  { %6904 = vst.msk [vmem:[#allocation13 + $0x6] ss:$8 sm:$0x3] %vm10297_vm0, %v11393_v33  ;;  %v6926_v24 = vrot.slane %v11393_v33, %v9911_v19  ;;  %v6922_v20 = vrot.slane %v11393_v33, %v9921_v29  ;;  %v9522_v19 = vld [vmem:[#allocation11 + $0x100] ss:$24 sps:$4 sm:$0xff]  }
 0x8e3   :  { %v9527_v29 = vld [vmem:[#allocation11 + $0xd4] ss:$24 sps:$4 sm:$0xff]  }
 0x8e4   :  { %v6930_v11 = vpack.c.bf16 %v6926_v24, %v6926_v24  ;;  %v11402_v7 = vpack.c.bf16 %v6922_v20, %v6922_v20  ;;  %v7656_v20 = vrot.slane %v6917_v34, 2 }
 0x8e6   :  { %7539 = vmatprep.mubr.bf16.mxu0 %v6930_v11  ;;  %7580 = vmatprep.mubr.bf16.mxu1 %v6930_v11 }
 0x8e7   :  { %7540 = vmatmul.mubr.bf16.vlgmr.msra.gmra.mxu0 %v11402_v7  ;;  %7581 = vmatmul.mubr.bf16.vlgmr.msra.gmra.mxu1 %v11402_v7 }
 0x8e8   :  { %7590 = vmatpush1.bf16.msra.mxu0 %v9516_v8  ;;  %7621 = vmatprep.mubr.bf16.mxu0 %v6930_v11 }
 0x8e9   :  { %7591 = vmatprep.subr.bf16.mxu0 %v9521_v17 }
 0x8ec   :  { %7592 = vmatpush1.bf16.msra.mxu0 %v9519_v30 }
 0x8ed   :  { %7593 = vmatprep.subr.bf16.mxu0 %v9524_v48 }
 0x8f0   :  { %7594 = vmatpush1.bf16.msra.mxu0 %v9522_v19 }
 0x8f1   :  { %7595 = vmatprep.subr.bf16.mxu0 %v9527_v29 }
 0x8f4   :  { %7596 = vmatpush1.bf16.msra.mxu0 %v9525_v55 }
 0x8f5   :  { %7597 = vmatprep.subr.bf16.mxu0 %v9530_v26 }
 0x8f8   :  { %7598 = vmatpush1.bf16.msra.mxu0 %v9528_v6 }
 0x8f9   :  { %7599 = vmatprep.subr.bf16.mxu0 %v9533_v54 }
 0x8fc   :  { %7600 = vmatpush1.bf16.msra.mxu0 %v9531_v37 }
 0x8fd   :  { %7601 = vmatprep.subr.bf16.mxu0 %v9536_v0 }
 0x900   :  { %7602 = vmatpush1.bf16.msra.mxu0 %v9534_v10 }
 0x901   :  { %7603 = vmatprep.subr.bf16.mxu0 %v9539_v27  ;;  %v7702_v27 = vrot.slane %v6917_v34, 4 }
 0x904   :  { %7604 = vmatpush1.bf16.msra.mxu0 %v9537_v42 }
 0x905   :  { %7605 = vmatprep.subr.bf16.mxu0 %v9542_v16 }
 0x908   :  { %7606 = vmatpush2.bf16.msra.mxu0 %v9540_v53 }
 0x909   :  { %7607 = vmatprep.subr.bf16.mxu0 %v9545_v28 }
 0x90c   :  { %7608 = vmatpush2.bf16.msra.mxu0 %v9543_v32 }
 0x90d   :  { %7609 = vmatprep.subr.bf16.mxu0 %v9548_v43 }
 0x910   :  { %7610 = vmatpush2.bf16.msra.mxu0 %v9546_v3 }
 0x911   :  { %7611 = vmatprep.subr.bf16.mxu0 %v9551_v22 }
 0x914   :  { %7612 = vmatpush2.bf16.msra.mxu0 %v9549_v40 }
 0x915   :  { %7613 = vmatprep.subr.bf16.mxu0 %v9554_v15 }
 0x918   :  { %7614 = vmatpush2.bf16.msra.mxu0 %v9552_v62 }
 0x919   :  { %7615 = vmatprep.subr.bf16.mxu0 %v9557_v45 }
 0x91c   :  { %7616 = vmatpush2.bf16.msra.mxu0 %v9555_v39 }
 0x91d   :  { %7617 = vmatprep.subr.bf16.mxu0 %v9560_v13 }
 0x920   :  { %7618 = vmatpush2.bf16.msra.mxu0 %v9558_v12 }
 0x921   :  { %7619 = vmatprep.subr.bf16.mxu0 %v9563_v44 }
 0x924   :  { %7620 = vmatpush2.bf16.msra.mxu0 %v9561_v51 }
 0x927   :  { %7622 = vmatmul.mubr.bf16.vlgmr.msra.gmra.mxu0 %v11402_v7 }
 0x9a7   :  { %v7541_v21 = vpop.f32.mrf.mxu0  ;;  %v7582_v50 = vpop.f32.mrf.mxu1 }
 0x9a8   :  { %v7542_v49 = vadd.f32 %v7541_v21, %v11675_v23  ;;  %v7583_v56 = vadd.f32 %v7582_v50, %v11559_v35 }
 0x9a9   :  { %v7543_v31 = vpop.f32.mrf.mxu0  ;;  %v7584_v2 = vpop.f32.mrf.mxu1 }
 0x9aa   :  { %v7544_v46 = vadd.f32 %v7543_v31, %v11674_v59  ;;  %v7585_v52 = vadd.f32 %v7584_v2, %v11558_v38 }
 0x9ab   :  { %v7545_v36 = vpop.f32.mrf.mxu0  ;;  %v7586_v1 = vpop.f32.mrf.mxu1 }
 0x9ac   :  { %v7632_v57 = vcombine.low %v7542_v49, %v7544_v46  ;;  %v7660_v59 = vcombine.low %v7583_v56, %v7585_v52 }
 0x9ad   :  { %v7546_v25 = vpop.f32.mrf.mxu0  ;;  %v7587_v41 = vpop.f32.mrf.mxu1 }
 0x9ae   :  { %v7639_v9 = vrot.slane %v7632_v57, %v10273_v47  ;;  %v7667_v23 = vrot.slane %v7660_v59, %v10273_v47 }
 0x9b0   :  { %v7646_v58 = vrot.slane %v7639_v9, %v10273_v47  ;;  %v7674_v24 = vrot.slane %v7667_v23, %v10273_v47 }
 0x9b2   :  { %v7648_v60 = vadd.f32 %v7646_v58, %v6917_v34  ;;  %v7676_v11 = vadd.f32 %v7674_v24, %v7656_v20 }
 0x9b4   :  { %v8663_v18 = vmul.f32 -1.442695, %v7648_v60  ;;  %v8664_v8 = vmul.f32 -1.442695, %v7676_v11 }
 0x9b6   :  { %9634 = vpow2.f32 %v8663_v18 }
 0x9b7   :  { %9636 = vpow2.f32 %v8664_v8 }
 0x9c3   :  { %v9635_v7 = vpop.eup %9634 }
 0x9c4   :  { %v7652_v17 = vadd.f32 1.0, %v9635_v7  ;;  %v9637_v19 = vpop.eup %9636 }
 0x9c5   :  { %v7680_v6 = vadd.f32 1.0, %v9637_v19 }
 0x9c6   :  { %9638 = vrcp.f32 %v7652_v17 }
 0x9c7   :  { %9640 = vrcp.f32 %v7680_v6 }
 0x9d3   :  { %v9639_v0 = vpop.eup %9638 }
 0x9d4   :  { %v9641_v16 = vpop.eup %9640 }
 0x9d5   :  { %v7706_v53 = vsub.f32 1.0, %v9641_v16 }
 0x9e7   :  { %v7623_v30 = vpop.f32.mrf.mxu0 }
 0x9e8   :  { %v7624_v38 = vadd.f32 %v7623_v30, %v10283_v4 }
 0x9e9   :  { %v7625_v48 = vpop.f32.mrf.mxu0 }
 0x9ea   :  { %v7626_v35 = vadd.f32 %v7625_v48, %v10287_v61  ;;  %v7708_v61 = vmul.f32 %v9641_v16, %v11393_v33 }
 0x9eb   :  { %v7627_v29 = vpop.f32.mrf.mxu0 }
 0x9ec   :  { %v7685_v55 = vcombine.low %v7624_v38, %v7626_v35 }
 0x9ed   :  { %v7628_v26 = vpop.f32.mrf.mxu0 }
 0x9ee   :  { %v7692_v54 = vrot.slane %v7685_v55, %v10273_v47 }
 0x9f0   :  { %v7699_v37 = vrot.slane %v7692_v54, %v10273_v47 }
 0x9f2   :  { %v7701_v10 = vmul.f32 %v9639_v0, %v7699_v37 }
 0x9f4   :  { %v7704_v42 = vadd.f32 %v7702_v27, %v7701_v10 }
 0x9f6   :  { %9642 = vtanh.f32 %v7704_v42 }
 0xa03   :  { %v9643_v4 = vpop.eup %9642 }
 0xa04   :  { %v7707_v28 = vmul.f32 %v9643_v4, %v7706_v53 }
 0xa06   :  { %v7709_v32 = vadd.f32 %v7708_v61, %v7707_v28 }
 0xa08   :  { %7711 = vst.msk [vmem:[#allocation13 + $0x7] ss:$8 sm:$0x3] %vm10297_vm0, %v7709_v32 }
 0xa09   :  { %9755 = shalt.err (!%p9752_p10)
}
 0xa0a   :  { %7722 = dma.vmem_to_hbm [thread:$0]  %s7720_s21, 256, %s11432_s7, [#allocation7]  }
 0xa0b   :  { %9772 = dma.done.wait [#allocation7], 256  }
 0xa0c   :  { %9773 = vsyncadd [#allocation7], 4294967040 }
 0xa0d   :  { %7726 = vsyncpa [#allocation6], 1 }
 0xa0e   :  { %7727 = vsyncpa [#allocation9], 1 }
 0xa0f   :  { %7728 = vsyncpa [#allocation12], 1 }
 0xa10   :  { %7729 = vsyncpa [#allocation7], 1 }

</bundles_post_ra>
